<compile_context>
chip_gen: v6e
topology: v6e:2x2x1
jax: 0.10.0
libtpu: 0.0.40
codegen_flags: <defaults>
</compile_context>

<pallas_src>
import numpy as np
import jax
import jax.numpy as jnp
from jax.experimental import pallas as pl
from jax.experimental.pallas import tpu as pltpu

_B = 2          # batch size baked into the stacked weight packing
_N_PAD = 1024   # final linear's 1001 output columns padded to a lane-aligned 1024


# ---------------------------------------------------------------------------
# Fused Pallas kernel
# ---------------------------------------------------------------------------
def _elu(a):
    # ELU(alpha=1): x if x > 0 else exp(x) - 1   (min() keeps exp() from overflowing)
    return jnp.where(a > 0.0, a, jnp.exp(jnp.minimum(a, 0.0)) - 1.0)


def _deconv_elu_stage(x_cl, d_bf16, wbig, bcol):
    """One batch-stacked ConvTranspose1d + ELU.

    x_cl   : (B*Cin,  Lin)  f32, row = b*Cin + ci
    d_bf16 : (Lin, Lpad)    bf16 0/1 dilation+padding matrix
    wbig   : (K*B*Cout, B*Cin) f32 block-diagonal, row = k*B*Cout + b*Cout + co,
             value = W[ci, co, K-1-k] on the matching batch block
    bcol   : (B*Cout, 1)    f32
    returns (B*Cout, Lout)  f32
    """
    two_cout = bcol.shape[0]
    k = wbig.shape[0] // two_cout
    lout = d_bf16.shape[1] - (k - 1)
    # dilation + padding as a bf16 0/1 matmul (single MXU pass), f32 accumulation
    xpad = jnp.dot(x_cl.astype(jnp.bfloat16), d_bf16,
                   preferred_element_type=jnp.float32)              # (B*Cin, Lpad)
    # all (k, ci) taps for both batch elements in one small matmul
    z = jnp.dot(wbig, xpad, preferred_element_type=jnp.float32)     # (K*B*Cout, Lpad)
    # K shifted adds, pairwise tree to shorten the serial chain (K <= 7, static)
    terms = [z[kk * two_cout:(kk + 1) * two_cout, kk:kk + lout] for kk in range(k)]
    while len(terms) > 1:
        nxt = [terms[i] + terms[i + 1] for i in range(0, len(terms) - 1, 2)]
        if len(terms) % 2:
            nxt.append(terms[-1])
        terms = nxt
    return _elu(terms[0] + bcol)


def _decoder_kernel(x_ref, sp_ref, b_out_ref, d2_ref, d3_hbm, d4_hbm, wout_hbm,
                    o_ref,
                    d3_v, d4_v, wout_v, sem):
    # ---- kick off the bulk HBM reads immediately, in the order they are needed,
    #      so they overlap the deconv chain instead of serializing before it ----
    cp_d3 = pltpu.make_async_copy(d3_hbm, d3_v, sem.at[0]); cp_d3.start()
    cp_d4 = pltpu.make_async_copy(d4_hbm, d4_v, sem.at[1]); cp_d4.start()
    cp_w = pltpu.make_async_copy(wout_hbm, wout_v, sem.at[2]); cp_w.start()

    # ---- small packed parameters (one consolidated (32,128) f32 array) ----
    w_in = sp_ref[0:2, 0:36]        # linear_input weight^T        (2, 36)
    b_in = sp_ref[2:3, 0:36]        # linear_input bias            (1, 36)
    w1 = sp_ref[0:14, 40:41]        # deconv1 weight, batch-tiled  (14, 1)
    b1 = sp_ref[0:14, 41:42]        # deconv1 bias,   batch-tiled  (14, 1)
    b2 = sp_ref[0:10, 42:43]        # deconv2 bias,   batch-tiled  (10, 1)
    b3 = sp_ref[0:6, 43:44]         # deconv3 bias,   batch-tiled  (6, 1)
    b4 = sp_ref[0:2, 44:45]         # deconv4 bias,   batch-tiled  (2, 1)
    e2 = sp_ref[0:14, 45:47]        # 0/1 batch->channel expansion (14, 2)
    w2 = sp_ref[0:30, 48:62]        # deconv2 stacked taps         (30, 14)
    w3 = sp_ref[0:30, 64:74]        # deconv3 stacked taps         (30, 10)
    w4 = sp_ref[0:14, 80:86]        # deconv4 stacked taps         (14, 6)

    # ---- linear_input: (B,2)@(2,36)+b as 2 broadcast MACs on the VPU ----
    x = x_ref[...]                                                   # (2, 2)
    h = b_in + x[:, 0:1] * w_in[0:1, :] + x[:, 1:2] * w_in[1:2, :]   # (2, 36)

    # ---- stack batch onto the channel/sublane axis (row = b*7 + c) ----
    h_st = e2[:, 0:1] * h[0:1, :] + e2[:, 1:2] * h[1:2, :]           # (14, 36)

    # ---- deconv1 (kernel_size=1, stride=1): broadcast MAC + ELU ----
    a1 = _elu(w1 * h_st + b1)                                        # (14, 36)

    # ---- deconv2..4, block-diagonal stacked: 2 matmuls per stage for both batches
    a2 = _deconv_elu_stage(a1, d2_ref[...], w2, b2)                  # (10, 110)
    cp_d3.wait()
    a3 = _deconv_elu_stage(a2, d3_v[...], w3, b3)                    # (6, 333)
    cp_d4.wait()
    a4 = _deconv_elu_stage(a3, d4_v[...], w4, b4)                    # (2, 1001)

    # a4 IS the flattened activation (Cout == 1 -> row b = batch b).  No scratch.
    hf = a4.astype(jnp.bfloat16)
    cp_w.wait()                                                      # w_out now in VMEM
    y = jnp.dot(hf, wout_v[...], preferred_element_type=jnp.float32) + b_out_ref[...]
    o_ref[...] = y[:, 0:1001]                                        # direct (B,1001) store


# ---------------------------------------------------------------------------
# One-time parameter packing (tap flip, block-diag batch stacking, D matrices,
# bf16 / lane padding).  Runs on host, not per forward.
# ---------------------------------------------------------------------------
def _dilation_pad_matrix_np(lin, k, s, p, op):
    """0/1 matrix D (Lin, Lpad): x @ D == zero-dilate(stride=s) then pad (K-1-p, K-1-p+op)."""
    lout = (lin - 1) * s - 2 * p + k + op
    lpad = lout + k - 1
    pad_l = k - 1 - p
    d = np.zeros((lin, lpad), np.float32)
    d[np.arange(lin), pad_l + s * np.arange(lin)] = 1.0
    return d


def _pack_deconv_stacked(w, b, batch):
    """ConvTranspose1d weight (Cin,Cout,K) -> block-diagonal stacked tap matrix.

    wbig[k*B*Cout + bb*Cout + co, bb*Cin + ci] = w[ci, co, K-1-k]   (taps flipped)
    bcol = bias tiled over the batch, shape (B*Cout, 1)
    """
    w = np.asarray(w, np.float32)
    b = np.asarray(b, np.float32)
    cin, cout, k = w.shape
    wbig = np.zeros((k * batch * cout, batch * cin), np.float32)
    for kk in range(k):
        tap = w[:, :, k - 1 - kk].T                                  # (cout, cin)
        for bb in range(batch):
            r0 = kk * batch * cout + bb * cout
            wbig[r0:r0 + cout, bb * cin:(bb + 1) * cin] = tap
    bcol = np.tile(b.reshape(cout, 1), (batch, 1))
    return wbig, bcol


def init_raw_params(key):
    """Parameters in the PyTorch module's native layouts."""
    ks = jax.random.split(key, 12)

    def n(k, shape, scale=0.1):
        return (scale * jax.random.normal(k, shape)).astype(jnp.float32)

    return dict(
        lin_in_w=n(ks[0], (36, 2)), lin_in_b=n(ks[1], (36,)),
        dc1_w=n(ks[2], (1, 7, 1)), dc1_b=n(ks[3], (7,)),
        dc2_w=n(ks[4], (7, 5, 3)), dc2_b=n(ks[5], (5,)),
        dc3_w=n(ks[6], (5, 3, 5)), dc3_b=n(ks[7], (3,)),
        dc4_w=n(ks[8], (3, 1, 7)), dc4_b=n(ks[9], (1,)),
        lin_out_w=n(ks[10], (1001, 1001)), lin_out_b=n(ks[11], (1001,)),
    )


def pack_params(raw, batch=_B):
    assert batch == _B, "kernel slicing is packed for batch=2"

    # --- consolidated small-parameter pack (one input DMA, sliced in-kernel) ---
    sp = np.zeros((32, 128), np.float32)
    sp[0:2, 0:36] = np.asarray(raw["lin_in_w"], np.float32).T        # (2, 36)
    sp[2, 0:36] = np.asarray(raw["lin_in_b"], np.float32)
    w1 = np.asarray(raw["dc1_w"], np.float32)[0, :, 0]               # (7,)
    b1 = np.asarray(raw["dc1_b"], np.float32)                        # (7,)
    sp[0:7 * batch, 40] = np.tile(w1, batch)
    sp[0:7 * batch, 41] = np.tile(b1, batch)

    w2s, b2s = _pack_deconv_stacked(raw["dc2_w"], raw["dc2_b"], batch)  # (30,14),(10,1)
    w3s, b3s = _pack_deconv_stacked(raw["dc3_w"], raw["dc3_b"], batch)  # (30,10),(6,1)
    w4s, b4s = _pack_deconv_stacked(raw["dc4_w"], raw["dc4_b"], batch)  # (14,6),(2,1)
    sp[0:b2s.shape[0], 42] = b2s[:, 0]
    sp[0:b3s.shape[0], 43] = b3s[:, 0]
    sp[0:b4s.shape[0], 44] = b4s[:, 0]
    for r in range(batch * 7):                                       # 0/1 expansion matrix
        sp[r, 45 + r // 7] = 1.0
    sp[0:w2s.shape[0], 48:48 + w2s.shape[1]] = w2s
    sp[0:w3s.shape[0], 64:64 + w3s.shape[1]] = w3s
    sp[0:w4s.shape[0], 80:80 + w4s.shape[1]] = w4s

    # --- dilation/padding matrices (exact 0/1, stored bf16 = half the HBM read) ---
    d2 = _dilation_pad_matrix_np(36, 3, 3, 0, 2)                     # (36, 112)
    d3 = _dilation_pad_matrix_np(110, 5, 3, 0, 1)                    # (110, 337)
    d4 = _dilation_pad_matrix_np(333, 7, 3, 1, 0)                    # (333, 1007)

    # --- final Linear: weight^T padded to 1024 lane-aligned columns, bf16 ---
    w_out = np.zeros((1001, _N_PAD), np.float32)
    w_out[:, 0:1001] = np.asarray(raw["lin_out_w"], np.float32).T
    b_out = np.zeros((1, _N_PAD), np.float32)
    b_out[0, 0:1001] = np.asarray(raw["lin_out_b"], np.float32)

    return dict(
        sp=jnp.asarray(sp),
        b_out=jnp.asarray(b_out),
        d2=jnp.asarray(d2).astype(jnp.bfloat16),
        d3=jnp.asarray(d3).astype(jnp.bfloat16),
        d4=jnp.asarray(d4).astype(jnp.bfloat16),
        w_out=jnp.asarray(w_out).astype(jnp.bfloat16),
    )


# ---------------------------------------------------------------------------
# Forward
# ---------------------------------------------------------------------------
_VMEM_SPEC = pl.BlockSpec(memory_space=pltpu.MemorySpace.VMEM)
_ANY_SPEC = pl.BlockSpec(memory_space=pl.ANY)   # stays in HBM; DMA'd manually


@jax.jit
def decoder_forward(p, x):
    assert x.shape[0] == _B, "weights are packed for batch=2"
    return pl.pallas_call(
        _decoder_kernel,
        out_shape=jax.ShapeDtypeStruct((_B, 1001), jnp.float32),
        in_specs=[_VMEM_SPEC, _VMEM_SPEC, _VMEM_SPEC, _VMEM_SPEC,   # x, sp, b_out, d2
                  _ANY_SPEC, _ANY_SPEC, _ANY_SPEC],                 # d3, d4, w_out (HBM)
        out_specs=_VMEM_SPEC,
        scratch_shapes=[
            pltpu.VMEM((110, 337), jnp.bfloat16),                   # d3 landing buffer
            pltpu.VMEM((333, 1007), jnp.bfloat16),                  # d4 landing buffer
            pltpu.VMEM((1001, _N_PAD), jnp.bfloat16),               # w_out landing buffer
            pltpu.SemaphoreType.DMA((3,)),
        ],
    )(x, p["sp"], p["b_out"], p["d2"], p["d3"], p["d4"], p["w_out"])


# ---------------------------------------------------------------------------
# Plain-JAX f32 reference (mirror of the PyTorch module) for a correctness check
# ---------------------------------------------------------------------------
def _ref_elu(a):
    return jnp.where(a > 0.0, a, jnp.exp(jnp.minimum(a, 0.0)) - 1.0)


def _ref_deconv1d(x_ncl, w, b, stride, padding, output_padding):
    B, Cin, Lin = x_ncl.shape
    _, Cout, K = w.shape
    Lout = (Lin - 1) * stride - 2 * padding + K + output_padding
    if stride > 1:
        xd = jnp.zeros((B, Cin, Lin, stride), x_ncl.dtype).at[:, :, :, 0].set(x_ncl)
        xd = xd.reshape(B, Cin, Lin * stride)[:, :, : (Lin - 1) * stride + 1]
    else:
        xd = x_ncl
    pad_l = K - 1 - padding
    pad_r = K - 1 - padding + output_padding
    xpad = jnp.pad(xd, ((0, 0), (0, 0), (pad_l, pad_r)))
    wf = w[:, :, ::-1]
    out = jnp.zeros((B, Cout, Lout), jnp.float32)
    for k in range(K):
        out = out + jnp.einsum("bcl,cd->bdl", xpad[:, :, k:k + Lout], wf[:, :, k],
                               precision=jax.lax.Precision.HIGHEST)
    return out + b[None, :, None]


def reference_forward(raw, x):
    h = jnp.dot(x, raw["lin_in_w"].T, precision=jax.lax.Precision.HIGHEST) + raw["lin_in_b"]
    h = h[:, None, :]                                               # unsqueeze(1): (B,1,36)
    h = _ref_elu(_ref_deconv1d(h, raw["dc1_w"], raw["dc1_b"], 1, 0, 0))
    h = _ref_elu(_ref_deconv1d(h, raw["dc2_w"], raw["dc2_b"], 3, 0, 2))
    h = _ref_elu(_ref_deconv1d(h, raw["dc3_w"], raw["dc3_b"], 3, 0, 1))
    h = _ref_elu(_ref_deconv1d(h, raw["dc4_w"], raw["dc4_b"], 3, 1, 0))
    h = h.reshape(h.shape[0], -1)                                   # Flatten: (B, 1001)
    return jnp.dot(h, raw["lin_out_w"].T,
                   precision=jax.lax.Precision.HIGHEST) + raw["lin_out_b"]


if __name__ == "__main__":
    key = jax.random.PRNGKey(0)
    pkey, xkey = jax.random.split(key)
    raw = init_raw_params(pkey)
    params = pack_params(raw)
    x = jax.random.normal(xkey, (_B, 2), dtype=jnp.float32)

    y = jax.block_until_ready(decoder_forward(params, x))
    assert y.shape == (_B, 1001), y.shape
    assert bool(jnp.all(jnp.isfinite(y)))

    y_ref = jax.block_until_ready(reference_forward(raw, x))
    err = float(np.max(np.abs(np.asarray(y) - np.asarray(y_ref))))
    assert np.allclose(np.asarray(y), np.asarray(y_ref), rtol=2e-2, atol=2e-2), err

    print("KERNEL_OK")
</pallas_src>

<mosaic_0001>
module attributes {stable_mosaic.version = 11 : i64} {
  func.func @_decoder_kernel(%arg0: memref<2x2xf32, #tpu.memory_space<vmem>>, %arg1: memref<32x128xf32, #tpu.memory_space<vmem>>, %arg2: memref<1x1024xf32, #tpu.memory_space<vmem>>, %arg3: memref<36x112xbf16, #tpu.memory_space<vmem>>, %arg4: memref<110x337xbf16, #tpu.memory_space<any>>, %arg5: memref<333x1007xbf16, #tpu.memory_space<any>>, %arg6: memref<1001x1024xbf16, #tpu.memory_space<any>>, %arg7: memref<2x1001xf32, #tpu.memory_space<vmem>>, %arg8: memref<110x337xbf16, #tpu.memory_space<vmem>>, %arg9: memref<333x1007xbf16, #tpu.memory_space<vmem>>, %arg10: memref<1001x1024xbf16, #tpu.memory_space<vmem>>, %arg11: memref<3x!tpu.dma_semaphore, #tpu.memory_space<semaphore_mem>>) attributes {dimension_semantics = [], scalar_prefetch = 0 : i64, scratch_operands = 4 : i64, tpu.core_type = #tpu.core_type<tc>} {
    %c0_i32 = arith.constant 0 : i32
    %0 = tpu.memref_slice %arg11[%c0_i32] : memref<3x!tpu.dma_semaphore, #tpu.memory_space<semaphore_mem>> -> memref<1x!tpu.dma_semaphore, #tpu.memory_space<semaphore_mem>>
    %1 = tpu.memref_squeeze %0 : memref<1x!tpu.dma_semaphore, #tpu.memory_space<semaphore_mem>> -> memref<!tpu.dma_semaphore, #tpu.memory_space<semaphore_mem>>
    tpu.enqueue_dma source(%arg4 : memref<110x337xbf16, #tpu.memory_space<any>>) target(%arg8 : memref<110x337xbf16, #tpu.memory_space<vmem>>) target_semaphore(%1 : memref<!tpu.dma_semaphore, #tpu.memory_space<semaphore_mem>>)
    %c1_i32 = arith.constant 1 : i32
    %2 = tpu.memref_slice %arg11[%c1_i32] : memref<3x!tpu.dma_semaphore, #tpu.memory_space<semaphore_mem>> -> memref<1x!tpu.dma_semaphore, #tpu.memory_space<semaphore_mem>>
    %3 = tpu.memref_squeeze %2 : memref<1x!tpu.dma_semaphore, #tpu.memory_space<semaphore_mem>> -> memref<!tpu.dma_semaphore, #tpu.memory_space<semaphore_mem>>
    tpu.enqueue_dma source(%arg5 : memref<333x1007xbf16, #tpu.memory_space<any>>) target(%arg9 : memref<333x1007xbf16, #tpu.memory_space<vmem>>) target_semaphore(%3 : memref<!tpu.dma_semaphore, #tpu.memory_space<semaphore_mem>>)
    %c2_i32 = arith.constant 2 : i32
    %4 = tpu.memref_slice %arg11[%c2_i32] : memref<3x!tpu.dma_semaphore, #tpu.memory_space<semaphore_mem>> -> memref<1x!tpu.dma_semaphore, #tpu.memory_space<semaphore_mem>>
    %5 = tpu.memref_squeeze %4 : memref<1x!tpu.dma_semaphore, #tpu.memory_space<semaphore_mem>> -> memref<!tpu.dma_semaphore, #tpu.memory_space<semaphore_mem>>
    tpu.enqueue_dma source(%arg6 : memref<1001x1024xbf16, #tpu.memory_space<any>>) target(%arg10 : memref<1001x1024xbf16, #tpu.memory_space<vmem>>) target_semaphore(%5 : memref<!tpu.dma_semaphore, #tpu.memory_space<semaphore_mem>>)
    %c0 = arith.constant 0 : index
    %c0_0 = arith.constant 0 : index
    %6 = vector.load %arg1[%c0, %c0_0] : memref<32x128xf32, #tpu.memory_space<vmem>>, vector<2x36xf32>
    %c2 = arith.constant 2 : index
    %c0_1 = arith.constant 0 : index
    %7 = vector.load %arg1[%c2, %c0_1] : memref<32x128xf32, #tpu.memory_space<vmem>>, vector<1x36xf32>
    %c0_2 = arith.constant 0 : index
    %c40 = arith.constant 40 : index
    %8 = vector.load %arg1[%c0_2, %c40] : memref<32x128xf32, #tpu.memory_space<vmem>>, vector<14x1xf32>
    %c0_3 = arith.constant 0 : index
    %c41 = arith.constant 41 : index
    %9 = vector.load %arg1[%c0_3, %c41] : memref<32x128xf32, #tpu.memory_space<vmem>>, vector<14x1xf32>
    %c0_4 = arith.constant 0 : index
    %c42 = arith.constant 42 : index
    %10 = vector.load %arg1[%c0_4, %c42] : memref<32x128xf32, #tpu.memory_space<vmem>>, vector<10x1xf32>
    %c0_5 = arith.constant 0 : index
    %c43 = arith.constant 43 : index
    %11 = vector.load %arg1[%c0_5, %c43] : memref<32x128xf32, #tpu.memory_space<vmem>>, vector<6x1xf32>
    %c0_6 = arith.constant 0 : index
    %c44 = arith.constant 44 : index
    %12 = vector.load %arg1[%c0_6, %c44] : memref<32x128xf32, #tpu.memory_space<vmem>>, vector<2x1xf32>
    %c0_7 = arith.constant 0 : index
    %c45 = arith.constant 45 : index
    %13 = vector.load %arg1[%c0_7, %c45] : memref<32x128xf32, #tpu.memory_space<vmem>>, vector<14x2xf32>
    %c0_8 = arith.constant 0 : index
    %c48 = arith.constant 48 : index
    %14 = vector.load %arg1[%c0_8, %c48] : memref<32x128xf32, #tpu.memory_space<vmem>>, vector<30x14xf32>
    %c0_9 = arith.constant 0 : index
    %c64 = arith.constant 64 : index
    %15 = vector.load %arg1[%c0_9, %c64] : memref<32x128xf32, #tpu.memory_space<vmem>>, vector<30x10xf32>
    %c0_10 = arith.constant 0 : index
    %c80 = arith.constant 80 : index
    %16 = vector.load %arg1[%c0_10, %c80] : memref<32x128xf32, #tpu.memory_space<vmem>>, vector<14x6xf32>
    %c0_11 = arith.constant 0 : index
    %c0_12 = arith.constant 0 : index
    %17 = vector.load %arg0[%c0_11, %c0_12] : memref<2x2xf32, #tpu.memory_space<vmem>>, vector<2x2xf32>
    %18 = vector.extract_strided_slice %17 {offsets = [0, 0], sizes = [2, 1], strides = [1, 1]} : vector<2x2xf32> to vector<2x1xf32>
    %19 = vector.extract_strided_slice %6 {offsets = [0, 0], sizes = [1, 36], strides = [1, 1]} : vector<2x36xf32> to vector<1x36xf32>
    %20 = vector.broadcast %18 : vector<2x1xf32> to vector<2x36xf32>
    %21 = vector.broadcast %19 : vector<1x36xf32> to vector<2x36xf32>
    %22 = arith.mulf %20, %21 : vector<2x36xf32>
    %23 = vector.broadcast %7 : vector<1x36xf32> to vector<2x36xf32>
    %24 = arith.addf %23, %22 : vector<2x36xf32>
    %25 = vector.extract_strided_slice %17 {offsets = [0, 1], sizes = [2, 1], strides = [1, 1]} : vector<2x2xf32> to vector<2x1xf32>
    %26 = vector.extract_strided_slice %6 {offsets = [1, 0], sizes = [1, 36], strides = [1, 1]} : vector<2x36xf32> to vector<1x36xf32>
    %27 = vector.broadcast %25 : vector<2x1xf32> to vector<2x36xf32>
    %28 = vector.broadcast %26 : vector<1x36xf32> to vector<2x36xf32>
    %29 = arith.mulf %27, %28 : vector<2x36xf32>
    %30 = arith.addf %24, %29 : vector<2x36xf32>
    %31 = vector.extract_strided_slice %13 {offsets = [0, 0], sizes = [14, 1], strides = [1, 1]} : vector<14x2xf32> to vector<14x1xf32>
    %32 = vector.extract_strided_slice %30 {offsets = [0, 0], sizes = [1, 36], strides = [1, 1]} : vector<2x36xf32> to vector<1x36xf32>
    %33 = vector.broadcast %31 : vector<14x1xf32> to vector<14x36xf32>
    %34 = vector.broadcast %32 : vector<1x36xf32> to vector<14x36xf32>
    %35 = arith.mulf %33, %34 : vector<14x36xf32>
    %36 = vector.extract_strided_slice %13 {offsets = [0, 1], sizes = [14, 1], strides = [1, 1]} : vector<14x2xf32> to vector<14x1xf32>
    %37 = vector.extract_strided_slice %30 {offsets = [1, 0], sizes = [1, 36], strides = [1, 1]} : vector<2x36xf32> to vector<1x36xf32>
    %38 = vector.broadcast %36 : vector<14x1xf32> to vector<14x36xf32>
    %39 = vector.broadcast %37 : vector<1x36xf32> to vector<14x36xf32>
    %40 = arith.mulf %38, %39 : vector<14x36xf32>
    %41 = arith.addf %35, %40 : vector<14x36xf32>
    %42 = vector.broadcast %8 : vector<14x1xf32> to vector<14x36xf32>
    %43 = arith.mulf %42, %41 : vector<14x36xf32>
    %44 = vector.broadcast %9 : vector<14x1xf32> to vector<14x36xf32>
    %45 = arith.addf %43, %44 : vector<14x36xf32>
    %cst = arith.constant 0.000000e+00 : f32
    %46 = vector.broadcast %cst : f32 to vector<14x36xf32>
    %47 = arith.cmpf ogt, %45, %46 : vector<14x36xf32>
    %cst_13 = arith.constant 0.000000e+00 : f32
    %48 = vector.broadcast %cst_13 : f32 to vector<14x36xf32>
    %49 = arith.minimumf %45, %48 : vector<14x36xf32>
    %50 = math.exp %49 : vector<14x36xf32>
    %cst_14 = arith.constant 1.000000e+00 : f32
    %51 = vector.broadcast %cst_14 : f32 to vector<14x36xf32>
    %52 = arith.subf %50, %51 : vector<14x36xf32>
    %53 = arith.select %47, %45, %52 : vector<14x36xi1>, vector<14x36xf32>
    %c0_15 = arith.constant 0 : index
    %c0_16 = arith.constant 0 : index
    %54 = vector.load %arg3[%c0_15, %c0_16] : memref<36x112xbf16, #tpu.memory_space<vmem>>, vector<36x112xbf16>
    %55 = arith.truncf %53 : vector<14x36xf32> to vector<14x36xbf16>
    %cst_17 = arith.constant dense<0.000000e+00> : vector<14x112xf32>
    %56 = tpu.matmul %55, %54, %cst_17 {dimension_numbers = #tpu.dot_dimension_numbers<[1], [0], [0], [1], [0, 0, 1, 1], [], []>} : vector<14x36xbf16>, vector<36x112xbf16>, vector<14x112xf32> -> vector<14x112xf32>
    %cst_18 = arith.constant dense<0.000000e+00> : vector<30x112xf32>
    %57 = tpu.matmul %14, %56, %cst_18 {dimension_numbers = #tpu.dot_dimension_numbers<[1], [0], [0], [1], [0, 0, 1, 1], [], []>} : vector<30x14xf32>, vector<14x112xf32>, vector<30x112xf32> -> vector<30x112xf32>
    %58 = vector.extract_strided_slice %57 {offsets = [0, 0], sizes = [10, 110], strides = [1, 1]} : vector<30x112xf32> to vector<10x110xf32>
    %59 = vector.extract_strided_slice %57 {offsets = [10, 1], sizes = [10, 110], strides = [1, 1]} : vector<30x112xf32> to vector<10x110xf32>
    %60 = vector.extract_strided_slice %57 {offsets = [20, 2], sizes = [10, 110], strides = [1, 1]} : vector<30x112xf32> to vector<10x110xf32>
    %61 = arith.addf %58, %59 : vector<10x110xf32>
    %62 = arith.addf %61, %60 : vector<10x110xf32>
    %63 = vector.broadcast %10 : vector<10x1xf32> to vector<10x110xf32>
    %64 = arith.addf %62, %63 : vector<10x110xf32>
    %cst_19 = arith.constant 0.000000e+00 : f32
    %65 = vector.broadcast %cst_19 : f32 to vector<10x110xf32>
    %66 = arith.cmpf ogt, %64, %65 : vector<10x110xf32>
    %cst_20 = arith.constant 0.000000e+00 : f32
    %67 = vector.broadcast %cst_20 : f32 to vector<10x110xf32>
    %68 = arith.minimumf %64, %67 : vector<10x110xf32>
    %69 = math.exp %68 : vector<10x110xf32>
    %cst_21 = arith.constant 1.000000e+00 : f32
    %70 = vector.broadcast %cst_21 : f32 to vector<10x110xf32>
    %71 = arith.subf %69, %70 : vector<10x110xf32>
    %72 = arith.select %66, %64, %71 : vector<10x110xi1>, vector<10x110xf32>
    %c0_i32_22 = arith.constant 0 : i32
    %73 = tpu.memref_slice %arg11[%c0_i32_22] : memref<3x!tpu.dma_semaphore, #tpu.memory_space<semaphore_mem>> -> memref<1x!tpu.dma_semaphore, #tpu.memory_space<semaphore_mem>>
    %74 = tpu.memref_squeeze %73 : memref<1x!tpu.dma_semaphore, #tpu.memory_space<semaphore_mem>> -> memref<!tpu.dma_semaphore, #tpu.memory_space<semaphore_mem>>
    tpu.wait_dma2 semaphore(%74 : memref<!tpu.dma_semaphore, #tpu.memory_space<semaphore_mem>>) src(%arg4 : memref<110x337xbf16, #tpu.memory_space<any>>) dst(%arg8 : memref<110x337xbf16, #tpu.memory_space<vmem>>)
    %c0_23 = arith.constant 0 : index
    %c0_24 = arith.constant 0 : index
    %75 = vector.load %arg8[%c0_23, %c0_24] : memref<110x337xbf16, #tpu.memory_space<vmem>>, vector<110x337xbf16>
    %76 = arith.truncf %72 : vector<10x110xf32> to vector<10x110xbf16>
    %cst_25 = arith.constant dense<0.000000e+00> : vector<10x337xf32>
    %77 = tpu.matmul %76, %75, %cst_25 {dimension_numbers = #tpu.dot_dimension_numbers<[1], [0], [0], [1], [0, 0, 1, 1], [], []>} : vector<10x110xbf16>, vector<110x337xbf16>, vector<10x337xf32> -> vector<10x337xf32>
    %cst_26 = arith.constant dense<0.000000e+00> : vector<30x337xf32>
    %78 = tpu.matmul %15, %77, %cst_26 {dimension_numbers = #tpu.dot_dimension_numbers<[1], [0], [0], [1], [0, 0, 1, 1], [], []>} : vector<30x10xf32>, vector<10x337xf32>, vector<30x337xf32> -> vector<30x337xf32>
    %79 = vector.extract_strided_slice %78 {offsets = [0, 0], sizes = [6, 333], strides = [1, 1]} : vector<30x337xf32> to vector<6x333xf32>
    %80 = vector.extract_strided_slice %78 {offsets = [6, 1], sizes = [6, 333], strides = [1, 1]} : vector<30x337xf32> to vector<6x333xf32>
    %81 = vector.extract_strided_slice %78 {offsets = [12, 2], sizes = [6, 333], strides = [1, 1]} : vector<30x337xf32> to vector<6x333xf32>
    %82 = vector.extract_strided_slice %78 {offsets = [18, 3], sizes = [6, 333], strides = [1, 1]} : vector<30x337xf32> to vector<6x333xf32>
    %83 = vector.extract_strided_slice %78 {offsets = [24, 4], sizes = [6, 333], strides = [1, 1]} : vector<30x337xf32> to vector<6x333xf32>
    %84 = arith.addf %79, %80 : vector<6x333xf32>
    %85 = arith.addf %81, %82 : vector<6x333xf32>
    %86 = arith.addf %84, %85 : vector<6x333xf32>
    %87 = arith.addf %86, %83 : vector<6x333xf32>
    %88 = vector.broadcast %11 : vector<6x1xf32> to vector<6x333xf32>
    %89 = arith.addf %87, %88 : vector<6x333xf32>
    %cst_27 = arith.constant 0.000000e+00 : f32
    %90 = vector.broadcast %cst_27 : f32 to vector<6x333xf32>
    %91 = arith.cmpf ogt, %89, %90 : vector<6x333xf32>
    %cst_28 = arith.constant 0.000000e+00 : f32
    %92 = vector.broadcast %cst_28 : f32 to vector<6x333xf32>
    %93 = arith.minimumf %89, %92 : vector<6x333xf32>
    %94 = math.exp %93 : vector<6x333xf32>
    %cst_29 = arith.constant 1.000000e+00 : f32
    %95 = vector.broadcast %cst_29 : f32 to vector<6x333xf32>
    %96 = arith.subf %94, %95 : vector<6x333xf32>
    %97 = arith.select %91, %89, %96 : vector<6x333xi1>, vector<6x333xf32>
    %c1_i32_30 = arith.constant 1 : i32
    %98 = tpu.memref_slice %arg11[%c1_i32_30] : memref<3x!tpu.dma_semaphore, #tpu.memory_space<semaphore_mem>> -> memref<1x!tpu.dma_semaphore, #tpu.memory_space<semaphore_mem>>
    %99 = tpu.memref_squeeze %98 : memref<1x!tpu.dma_semaphore, #tpu.memory_space<semaphore_mem>> -> memref<!tpu.dma_semaphore, #tpu.memory_space<semaphore_mem>>
    tpu.wait_dma2 semaphore(%99 : memref<!tpu.dma_semaphore, #tpu.memory_space<semaphore_mem>>) src(%arg5 : memref<333x1007xbf16, #tpu.memory_space<any>>) dst(%arg9 : memref<333x1007xbf16, #tpu.memory_space<vmem>>)
    %c0_31 = arith.constant 0 : index
    %c0_32 = arith.constant 0 : index
    %100 = vector.load %arg9[%c0_31, %c0_32] : memref<333x1007xbf16, #tpu.memory_space<vmem>>, vector<333x1007xbf16>
    %101 = arith.truncf %97 : vector<6x333xf32> to vector<6x333xbf16>
    %cst_33 = arith.constant dense<0.000000e+00> : vector<6x1007xf32>
    %102 = tpu.matmul %101, %100, %cst_33 {dimension_numbers = #tpu.dot_dimension_numbers<[1], [0], [0], [1], [0, 0, 1, 1], [], []>} : vector<6x333xbf16>, vector<333x1007xbf16>, vector<6x1007xf32> -> vector<6x1007xf32>
    %cst_34 = arith.constant dense<0.000000e+00> : vector<14x1007xf32>
    %103 = tpu.matmul %16, %102, %cst_34 {dimension_numbers = #tpu.dot_dimension_numbers<[1], [0], [0], [1], [0, 0, 1, 1], [], []>} : vector<14x6xf32>, vector<6x1007xf32>, vector<14x1007xf32> -> vector<14x1007xf32>
    %104 = vector.extract_strided_slice %103 {offsets = [0, 0], sizes = [2, 1001], strides = [1, 1]} : vector<14x1007xf32> to vector<2x1001xf32>
    %105 = vector.extract_strided_slice %103 {offsets = [2, 1], sizes = [2, 1001], strides = [1, 1]} : vector<14x1007xf32> to vector<2x1001xf32>
    %106 = vector.extract_strided_slice %103 {offsets = [4, 2], sizes = [2, 1001], strides = [1, 1]} : vector<14x1007xf32> to vector<2x1001xf32>
    %107 = vector.extract_strided_slice %103 {offsets = [6, 3], sizes = [2, 1001], strides = [1, 1]} : vector<14x1007xf32> to vector<2x1001xf32>
    %108 = vector.extract_strided_slice %103 {offsets = [8, 4], sizes = [2, 1001], strides = [1, 1]} : vector<14x1007xf32> to vector<2x1001xf32>
    %109 = vector.extract_strided_slice %103 {offsets = [10, 5], sizes = [2, 1001], strides = [1, 1]} : vector<14x1007xf32> to vector<2x1001xf32>
    %110 = vector.extract_strided_slice %103 {offsets = [12, 6], sizes = [2, 1001], strides = [1, 1]} : vector<14x1007xf32> to vector<2x1001xf32>
    %111 = arith.addf %104, %105 : vector<2x1001xf32>
    %112 = arith.addf %106, %107 : vector<2x1001xf32>
    %113 = arith.addf %108, %109 : vector<2x1001xf32>
    %114 = arith.addf %111, %112 : vector<2x1001xf32>
    %115 = arith.addf %113, %110 : vector<2x1001xf32>
    %116 = arith.addf %114, %115 : vector<2x1001xf32>
    %117 = vector.broadcast %12 : vector<2x1xf32> to vector<2x1001xf32>
    %118 = arith.addf %116, %117 : vector<2x1001xf32>
    %cst_35 = arith.constant 0.000000e+00 : f32
    %119 = vector.broadcast %cst_35 : f32 to vector<2x1001xf32>
    %120 = arith.cmpf ogt, %118, %119 : vector<2x1001xf32>
    %cst_36 = arith.constant 0.000000e+00 : f32
    %121 = vector.broadcast %cst_36 : f32 to vector<2x1001xf32>
    %122 = arith.minimumf %118, %121 : vector<2x1001xf32>
    %123 = math.exp %122 : vector<2x1001xf32>
    %cst_37 = arith.constant 1.000000e+00 : f32
    %124 = vector.broadcast %cst_37 : f32 to vector<2x1001xf32>
    %125 = arith.subf %123, %124 : vector<2x1001xf32>
    %126 = arith.select %120, %118, %125 : vector<2x1001xi1>, vector<2x1001xf32>
    %127 = arith.truncf %126 : vector<2x1001xf32> to vector<2x1001xbf16>
    %c2_i32_38 = arith.constant 2 : i32
    %128 = tpu.memref_slice %arg11[%c2_i32_38] : memref<3x!tpu.dma_semaphore, #tpu.memory_space<semaphore_mem>> -> memref<1x!tpu.dma_semaphore, #tpu.memory_space<semaphore_mem>>
    %129 = tpu.memref_squeeze %128 : memref<1x!tpu.dma_semaphore, #tpu.memory_space<semaphore_mem>> -> memref<!tpu.dma_semaphore, #tpu.memory_space<semaphore_mem>>
    tpu.wait_dma2 semaphore(%129 : memref<!tpu.dma_semaphore, #tpu.memory_space<semaphore_mem>>) src(%arg6 : memref<1001x1024xbf16, #tpu.memory_space<any>>) dst(%arg10 : memref<1001x1024xbf16, #tpu.memory_space<vmem>>)
    %c0_39 = arith.constant 0 : index
    %c0_40 = arith.constant 0 : index
    %130 = vector.load %arg10[%c0_39, %c0_40] : memref<1001x1024xbf16, #tpu.memory_space<vmem>>, vector<1001x1024xbf16>
    %cst_41 = arith.constant dense<0.000000e+00> : vector<2x1024xf32>
    %131 = tpu.matmul %127, %130, %cst_41 {dimension_numbers = #tpu.dot_dimension_numbers<[1], [0], [0], [1], [0, 0, 1, 1], [], []>} : vector<2x1001xbf16>, vector<1001x1024xbf16>, vector<2x1024xf32> -> vector<2x1024xf32>
    %c0_42 = arith.constant 0 : index
    %c0_43 = arith.constant 0 : index
    %132 = vector.load %arg2[%c0_42, %c0_43] : memref<1x1024xf32, #tpu.memory_space<vmem>>, vector<1x1024xf32>
    %133 = vector.broadcast %132 : vector<1x1024xf32> to vector<2x1024xf32>
    %134 = arith.addf %131, %133 : vector<2x1024xf32>
    %135 = vector.extract_strided_slice %134 {offsets = [0, 0], sizes = [2, 1001], strides = [1, 1]} : vector<2x1024xf32> to vector<2x1001xf32>
    %c0_44 = arith.constant 0 : index
    %c0_45 = arith.constant 0 : index
    %136 = vector.load %arg7[%c0_44, %c0_45] : memref<2x1001xf32, #tpu.memory_space<vmem>>, vector<2x1001xf32>
    tpu.vector_store %arg7[%c0_44, %c0_45], %135 {strides = array<i32>} : memref<2x1001xf32, #tpu.memory_space<vmem>>, vector<2x1001xf32>,
    return
  }
}

</mosaic_0001>

<bundles_post_ra>
// kernel: decoder_forward.1
= control target key start
LH: loop header
LB: loop body
LE: loop exit
PB: predicated region body
PF: predicated region fallthrough
CT: control target
= control target key end

     0   :  { %12 = vsyncpa [#allocation7], 0  ;;  %s8594_s0 = inlined_call_operand.hbm [shape: f32[2,2], index: 0, kind: input, shape index: {}]   ;;  %s8595_s1 = inlined_call_operand.hbm [shape: f32[32,128], index: 1, kind: input, shape index: {}]   ;;  %s8596_s2 = inlined_call_operand.hbm [shape: f32[1,1024], index: 2, kind: input, shape index: {}]   ;;  %s8597_s3 = inlined_call_operand.hbm [shape: bf16[36,112], index: 3, kind: input, shape index: {}]   ;;  %s8598_s4 = inlined_call_operand.hbm [shape: bf16[110,337], index: 4, kind: input, shape index: {}]   ;;  %s8599_s5 = inlined_call_operand.hbm [shape: bf16[333,1007], index: 5, kind: input, shape index: {}]   ;;  %s8600_s6 = inlined_call_operand.hbm [shape: bf16[1001,1024], index: 6, kind: input, shape index: {}]   ;;  %s8601_s7 = inlined_call_operand.hbm [shape: f32[2,1001], index: 7, kind: output, shape index: {}]  }
   0x1   :  { %13 = vsyncpa [#allocation10], 0 }
   0x2   :  { %14 = vsyncpa [#allocation13], 0 }
   0x3   :  { %15 = vsyncpa [#allocation8], 0  ;;  %s7984_s24 = smov [#allocation9]  }
   0x4   :  { %s31_s25 = sshll.u32 %s7984_s24, 4  ;;  %s32_s25 = int_to_ptr.vmem [resolvable:$true] %s31_s25 }
   0x5   :  { %s7818_s26 = scalar_lea.vmem %s32_s25, 512  ;;  %p7823_p1 = scmp.lt.s32.totalorder %s32_s25, %s32_s25 }
   0x6   :  { %p7819_p0 = scmp.ne.s32.totalorder %s32_s25, %s7818_s26  ;;  %p7824_p2 = scmp.lt.s32.totalorder %s7818_s26, %s7818_s26 }
   0x8   :  { %p7825_p3 = por %p7824_p2, %p7823_p1 }
   0xa   :  { %p7826_p4 = pnand %p7825_p3, %p7819_p0 }
   0xc   :  { %7829 = shalt.err (!%p7826_p4)
}
   0xd   :  { %s7985_s27 = smov 128   ;;  %s7986_s28 = smov 8  }
   0xe   :  { %37 = dma.hbm_to_vmem [thread:$0]  %s8595_s1, 512, %s32_s25, [#allocation10], %s7985_s27, %s7985_s27, %s7986_s28  }
   0xf   :  { %s7987_s8 = smov [#allocation6]   ;;  %s7988_s10 = smov [#allocation11]  }
  0x10   :  { %s22_s9 = sshll.u32 %s7987_s8, 4  ;;  %s44_s11 = sshll.u32 %s7988_s10, 4  ;;  %s23_s9 = int_to_ptr.vmem [resolvable:$true] %s22_s9  ;;  %s45_s11 = int_to_ptr.vmem [resolvable:$true] %s44_s11 }
  0x11   :  { %s7838_s12 = scalar_lea.vmem %s23_s9, 32  ;;  %p7843_p6 = scmp.lt.s32.totalorder %s23_s9, %s23_s9 }
  0x12   :  { %p7839_p5 = scmp.ne.s32.totalorder %s23_s9, %s7838_s12  ;;  %p7844_p7 = scmp.lt.s32.totalorder %s7838_s12, %s7838_s12 }
  0x14   :  { %p7845_p8 = por %p7844_p7, %p7843_p6 }
  0x16   :  { %p7846_p9 = pnand %p7845_p8, %p7839_p5 }
  0x18   :  { %7849 = shalt.err (!%p7846_p9)
}
  0x19   :  { %25 = dma.hbm_to_vmem [thread:$0]  %s8594_s0, 32, %s23_s9, [#allocation7]  }
  0x1a   :  { %s7858_s15 = scalar_lea.vmem %s45_s11, 128  ;;  %p7863_p11 = scmp.lt.s32.totalorder %s45_s11, %s45_s11 }
  0x1b   :  { %p7859_p10 = scmp.ne.s32.totalorder %s45_s11, %s7858_s15  ;;  %p7864_p12 = scmp.lt.s32.totalorder %s7858_s15, %s7858_s15 }
  0x1d   :  { %p7865_p13 = por %p7864_p12, %p7863_p11 }
  0x1f   :  { %p7866_p0 = pnand %p7865_p13, %p7859_p10 }
  0x21   :  { %7869 = shalt.err (!%p7866_p0)
}
  0x22   :  { %47 = dma.hbm_to_vmem [thread:$0]  %s8596_s2, 128, %s45_s11, [#allocation10]  }
  0x23   :  { %s7989_s17 = smov [#allocation12]  }
  0x24   :  { %s53_s18 = sshll.u32 %s7989_s17, 4  ;;  %s54_s18 = int_to_ptr.vmem [resolvable:$true] %s53_s18 }
  0x25   :  { %s7878_s19 = scalar_lea.vmem %s54_s18, 320  ;;  %p7883_p2 = scmp.lt.s32.totalorder %s54_s18, %s54_s18 }
  0x26   :  { %p7879_p1 = scmp.ne.s32.totalorder %s54_s18, %s7878_s19  ;;  %p7884_p3 = scmp.lt.s32.totalorder %s7878_s19, %s7878_s19 }
  0x28   :  { %p7885_p4 = por %p7884_p3, %p7883_p2 }
  0x2a   :  { %p7886_p5 = pnand %p7885_p4, %p7879_p1 }
  0x2c   :  { %7889 = shalt.err (!%p7886_p5)
}
  0x2d   :  { %s7990_s0 = smov 64   ;;  %s7991_s20 = smov 4  }
  0x2e   :  { %59 = dma.hbm_to_vmem [thread:$0]  %s8597_s3, 320, %s54_s18, [#allocation13], %s7990_s0, %s7990_s0, %s7991_s20  }
  0x2f   :  { %7970 = dma.done.wait [#allocation7], 32  }
  0x30   :  { %7971 = vsyncadd [#allocation7], 4294967264 }
  0x31   :  { %7972 = dma.done.wait [#allocation10], 640  }
  0x32   :  { %7973 = vsyncadd [#allocation10], 4294966656 }
  0x33   :  { %7974 = dma.done.wait [#allocation13], 320  }
  0x34   :  { %7975 = vsyncadd [#allocation13], 4294966976  ;;  %v7992_v0 = vmov 45   ;;  %v7993_v1 = vmov 0   ;;  %v8069_v2 = vld [vmem:[#allocation9] sm:$0x3f]  ;;  %v123_v18 = vlaneseq }
  0x35   :  { %7737 = vset.pattern.permute.xlu1 %v7992_v0  ;;  %7735 = vset.pattern.permute.xlu0 %v7993_v1  ;;  %v117_v3 = vld [vmem:[#allocation6] sm:$0x3]  ;;  %v8071_v4 = vld [vmem:[#allocation9] sm:$0xff]  ;;  %v8074_v5 = vld [vmem:[#allocation9 + $0x8] sm:$0x3f]  ;;  %v7994_v6 = vmov 1  }
  0x36   :  { %120 = vperm.xlu0 %7735, %v117_v3   ;;  %145 = vperm.xlu1 %7737, %v8071_v4   ;;  %v7995_v7 = vmov 46   ;;  %v7996_v8 = vmov 40   ;;  %v7997_v9 = vmov 41   ;;  %v7745_v10 = vld [vmem:[#allocation12 + $0x10] ss:$0 sps:$4 sm:$0x33]  }
  0x37   :  { %vm232_vm0 = vcmask 1041408   ;;  %v7998_v11 = vmov 0.0   ;;  %v7746_v13 = vld [vmem:[#allocation12 + $0x8] sm:$0xff]   ;;  %v7747_v14 = vld [vmem:[#allocation12] sm:$0xff]   ;;  %vm7999_vm1 = vmmov 0   ;;  %s8000_s2 = smov 80  }
  0x38   :  { %7657 = vmatprep.subr.bf16.mxu0 %v7998_v11  ;;  %v234_v12 = vsel %vm232_vm0, %v7745_v10, 0  ;;  %7663 = vmatprep.mubr.msk.bf16.mxu0 %vm7999_vm1, %v7998_v11  ;;  %v8089_v15 = vld [vmem:[#allocation9 + $0x8] sm:$0xff]  ;;  %v8093_v16 = vld [vmem:[#allocation9 + $0x10] sm:$0xff]  ;;  %v8095_v17 = vld [vmem:[#allocation9 + $0x18] sm:$0x3f]  ;;  %v8099_v19 = vshrl.u32 %v123_v18, 7 }
  0x39   :  { %7658 = vmatpush3.bf16.msra.mxu0 %v234_v12  ;;  %v8104_v21 = vld [vmem:[#allocation9] sm:$0x3]  ;;  %v6874_v26 = vld [vmem:[#allocation9 + $0x2] ss:$0 sm:$0xff]  ;;  %vm228_vm4 = vcmask 293888   ;;  %vm288_vm5 = vcmask 113664  }
  0x3a   :  { %7736 = vset.pattern.permute.xlu0 %v7994_v6  ;;  %150 = vperm.xlu1 %7737, %v8074_v5   ;;  %v8102_v20 = vsub.s32 0, %v8099_v19  ;;  %v8109_v23 = vsub.s32 1, %v8099_v19  ;;  %v112_v0 = vld [vmem:[#allocation9 + $0x8] sm:$0x3]  ;;  %vm297_vm6 = vcmask 1045504   ;;  %vm400_vm7 = vcmask 1043456  }
  0x3b   :  { %134 = vperm.xlu0 %7736, %v117_v3   ;;  %7659 = vmatprep.subr.bf16.mxu0 %v7998_v11  ;;  %v8001_v3 = vmov 42   ;;  %s8002_s3 = smov 127   ;;  %s8003_s23 = smov 126  }
  0x3c   :  { %v126_v22 = vrot.slane %v8104_v21, %v8102_v20  ;;  %v140_v28 = vrot.slane %v8104_v21, %v8109_v23  ;;  %s8004_s24 = smov [#allocation2]   ;;  %s8005_s26 = smov [#allocation3]  }
  0x3d   :  { %7660 = vmatpush3.bf16.msra.mxu0 %v7746_v13  ;;  %s80_s25 = sshll.u32 %s8004_s24, 4  ;;  %s92_s27 = sshll.u32 %s8005_s26, 4  ;;  %s81_s25 = int_to_ptr.vmem [resolvable:$true] %s80_s25  ;;  %s93_s27 = int_to_ptr.vmem [resolvable:$true] %s92_s27 }
  0x3e   :  { %7738 = vset.pattern.permute.xlu1 %v7995_v7  ;;  %7661 = vmatprep.subr.bf16.mxu0 %v7998_v11  ;;  %s7898_s28 = scalar_lea.vmem %s81_s25, 2688  ;;  %p7903_p7 = scmp.lt.s32.totalorder %s81_s25, %s81_s25 }
  0x3f   :  { %160 = vperm.xlu1 %7738, %v8071_v4   ;;  %7739 = vset.pattern.permute.xlu0 %v7995_v7  ;;  %p7899_p6 = scmp.ne.s32.totalorder %s81_s25, %s7898_s28  ;;  %p7904_p8 = scmp.lt.s32.totalorder %s7898_s28, %s7898_s28 }
  0x40   :  { %164 = vperm.xlu0 %7739, %v8074_v5  }
  0x41   :  { %7662 = vmatpush3.bf16.msra.mxu0 %v7747_v14  ;;  %p7905_p9 = por %p7904_p8, %p7903_p7 }
  0x43   :  { %7740 = vset.pattern.permute.xlu1 %v7996_v8  ;;  %p7906_p10 = pnand %p7905_p9, %p7899_p6 }
  0x44   :  { %176 = vperm.xlu1 %7740, %v8071_v4   ;;  %7741 = vset.pattern.permute.xlu0 %v7997_v9 }
  0x45   :  { %186 = vperm.xlu0 %7741, %v8071_v4  }
  0x48   :  { %180 = vperm.xlu1 %7740, %v8074_v5  }
  0x49   :  { %282 = vrot.lane.b32.xlu0 %v8089_v15, %s8000_s2 }
  0x4a   :  { %7744 = vset.pattern.permute.xlu0 %v8001_v3 }
  0x4c   :  { %7742 = vset.pattern.permute.xlu1 %v7997_v9 }
  0x4d   :  { %190 = vperm.xlu1 %7742, %v8074_v5   ;;  %286 = vrot.lane.b32.xlu0 %v8095_v17, %s8000_s2 }
  0x51   :  { %280 = vrot.lane.b32.xlu1 %v8071_v4, %s8000_s2  ;;  %418 = vperm.xlu0 %7744, %v112_v0  }
  0x52   :  { %7743 = vset.pattern.permute.xlu1 %v8001_v3 }
  0x55   :  { %284 = vrot.lane.b32.xlu1 %v8093_v16, %s8000_s2 }
  0x59   :  { %413 = vperm.xlu1 %7743, %v8071_v4  }
  0xb1   :  { %v146_v24 = vpop.permute.xlu1 %145  ;;  %v121_v25 = vpop.permute.xlu0 %120 }
  0xb2   :  { %v127_v27 = vmul.f32 %v126_v22, %v121_v25 }
  0xb4   :  { %v132_v29 = vadd.f32 %v6874_v26, %v127_v27 }
  0xb5   :  { %v151_v30 = vpop.permute.xlu1 %150 }
  0xb6   :  { %v135_v31 = vpop.permute.xlu0 %134 }
  0xb7   :  { %v141_v32 = vmul.f32 %v140_v28, %v135_v31 }
  0xb9   :  { %v142_v33 = vadd.f32 %v141_v32, %v132_v29 }
  0xba   :  { %v161_v34 = vpop.permute.xlu1 %160 }
  0xbb   :  { %v156_v35 = vrot.slane %v142_v33, %v8102_v20  ;;  %v170_v36 = vrot.slane %v142_v33, %v8109_v23  ;;  %v165_v37 = vpop.permute.xlu0 %164 }
  0xbd   :  { %v171_v38 = vmul.f32 %v170_v36, %v161_v34  ;;  %v157_v39 = vmul.f32 %v156_v35, %v146_v24  ;;  %v172_v43 = vmul.f32 %v170_v36, %v165_v37  ;;  %v158_v45 = vmul.f32 %v156_v35, %v151_v30 }
  0xbf   :  { %v177_v40 = vpop.permute.xlu1 %176  ;;  %v173_v41 = vadd.f32 %v171_v38, %v157_v39  ;;  %v174_v49 = vadd.f32 %v172_v43, %v158_v45 }
  0xc0   :  { %v187_v42 = vpop.permute.xlu0 %186 }
  0xc1   :  { %v183_v44 = vmul.f32 %v177_v40, %v173_v41 }
  0xc3   :  { %v193_v46 = vadd.f32 %v187_v42, %v183_v44  ;;  %v181_v47 = vpop.permute.xlu1 %180 }
  0xc4   :  { %v184_v51 = vmul.f32 %v181_v47, %v174_v49  ;;  %v283_v9 = vpop.permute.xlu0 %282 }
  0xc5   :  { %v197_v48 = vmin.f32 %v193_v46, 0.0  ;;  %vm195_vm2 = vcmp.gt.f32.partialorder %v193_v46, 0.0 }
  0xc7   :  { %v199_v50 = vmul.f32 1.442695, %v197_v48 }
  0xc8   :  { %v191_v52 = vpop.permute.xlu1 %190  ;;  %v287_v13 = vpop.permute.xlu0 %286 }
  0xc9   :  { %v194_v53 = vadd.f32 %v191_v52, %v184_v51  ;;  %7748 = vpow2.f32 %v199_v50 }
  0xcb   :  { %v198_v54 = vmin.f32 %v194_v53, 0.0  ;;  %vm196_vm3 = vcmp.gt.f32.partialorder %v194_v53, 0.0 }
  0xcc   :  { %v281_v63 = vpop.permute.xlu1 %280 }
  0xcd   :  { %v201_v55 = vmul.f32 1.442695, %v198_v54  ;;  %7671 = vmatprep.mubr.msk.f32.mxu1 %vm288_vm5, %v281_v63 }
  0xcf   :  { %7750 = vpow2.f32 %v201_v55 }
  0xd0   :  { %v285_v12 = vpop.permute.xlu1 %284 }
  0xd6   :  { %v7749_v56 = vpop.eup %7748 }
  0xd7   :  { %v6875_v57 = vadd.f32 -1.0, %v7749_v56 }
  0xd9   :  { %v205_v60 = vsel %vm195_vm2, %v193_v46, %v6875_v57 }
  0xdc   :  { %v7751_v58 = vpop.eup %7750 }
  0xdd   :  { %v6876_v59 = vadd.f32 -1.0, %v7751_v58 }
  0xdf   :  { %v206_v61 = vsel %vm196_vm3, %v194_v53, %v6876_v59 }
  0xe0   :  { %v212_v62 = vpack.c.bf16 %v206_v61, %v205_v60 }
  0xe2   :  { %7664 = vmatmul.mubr.msk.bf16.vlgmr.msra.gmra.mxu0 %vm228_vm4, %v212_v62 }
 0x1a2   :  { %v270_v6 = vpop.f32.mrf.mxu0 }
 0x1a4   :  { %v7665_v7 = vpop.f32.mrf.mxu0 }
 0x1a6   :  { %v273_v8 = vpop.f32.mrf.mxu0 }
 0x1a7   :  { %7667 = vmatprep.subr.msk.mxu1 %vm297_vm6, %v273_v8 }
 0x1a8   :  { %v7666_v10 = vpop.f32.mrf.mxu0  ;;  %7668 = vmatpush3.msk.msra.mxu1 %vm297_vm6, %v273_v8 }
 0x1a9   :  { %7669 = vmatprep.subr.mxu1 %v270_v6 }
 0x1aa   :  { %7670 = vmatpush3.msra.mxu1 %v270_v6 }
 0x1ab   :  { %7672 = vmatmul.mubr.msk.f32.vlgmr.msra.gmra.mxu1 %vm288_vm5, %v283_v9 }
 0x1ac   :  { %7674 = vmatprep.mubr.msk.f32.mxu1 %vm288_vm5, %v285_v12 }
 0x1af   :  { %7675 = vmatmul.mubr.msk.f32.gmra.mxu1 %vm288_vm5, %v287_v13 }
 0x26b   :  { %v7673_v14 = vpop.f32.mrf.mxu1 }
 0x26c   :  { %v388_v29 = vrot.slane %v7673_v14, 2 }
 0x26d   :  { %v367_v18 = vpop.f32.mrf.mxu1 }
 0x26f   :  { %v7676_v22 = vpop.f32.mrf.mxu1 }
 0x270   :  { %v402_v25 = vrot.slane %v7676_v22, 4 }
 0x271   :  { %v377_v24 = vpop.f32.mrf.mxu1 }
 0x272   :  { %v389_v26 = vrot.slane %v377_v24, 2  ;;  %v401_v27 = vrot.slane %v377_v24, 4 }
 0x274   :  { %393 = vrot.lane.b32.xlu1 %v389_v26, %s8002_s3  ;;  %v403_v28 = vsel %vm400_vm7, %v401_v27, %v402_v25  ;;  %v390_v30 = vsel %vm297_vm6, %v388_v29, %v389_v26 }
 0x275   :  { %404 = vrot.lane.b32.xlu0 %v403_v28, %s8003_s23 }
 0x278   :  { %391 = vrot.lane.b32.xlu1 %v390_v30, %s8002_s3 }
 0x27c   :  { %406 = vrot.lane.b32.xlu1 %v402_v25, %s8003_s23 }
 0x27d   :  { %7909 = shalt.err (!%p7906_p10)  }
 0x27e   :  { %83 = dma.hbm_to_vmem [thread:$0]  %s8598_s4, 2688, %s81_s25, [#allocation5] }
 0x27f   :  { %s7918_s8 = scalar_lea.vmem %s93_s27, 21504  ;;  %p7923_p12 = scmp.lt.s32.totalorder %s93_s27, %s93_s27 }
 0x280   :  { %p7919_p11 = scmp.ne.s32.totalorder %s93_s27, %s7918_s8  ;;  %p7924_p13 = scmp.lt.s32.totalorder %s7918_s8, %s7918_s8 }
 0x282   :  { %p7925_p0 = por %p7924_p13, %p7923_p12 }
 0x284   :  { %p7926_p1 = pnand %p7925_p0, %p7919_p11 }
 0x286   :  { %7929 = shalt.err (!%p7926_p1)  }
 0x287   :  { %95 = dma.hbm_to_vmem [thread:$0]  %s8599_s5, 21504, %s93_s27, [#allocation5 + $0x1] }
 0x288   :  { %s8006_s11 = smov [#allocation4]  }
 0x289   :  { %s104_s12 = sshll.u32 %s8006_s11, 4  ;;  %s105_s12 = int_to_ptr.vmem [resolvable:$true] %s104_s12 }
 0x28a   :  { %s7938_s13 = scalar_lea.vmem %s105_s12, 64512  ;;  %p7943_p3 = scmp.lt.s32.totalorder %s105_s12, %s105_s12 }
 0x28b   :  { %p7939_p2 = scmp.ne.s32.totalorder %s105_s12, %s7938_s13  ;;  %p7944_p4 = scmp.lt.s32.totalorder %s7938_s13, %s7938_s13 }
 0x28d   :  { %p7945_p5 = por %p7944_p4, %p7943_p3 }
 0x28f   :  { %p7946_p6 = pnand %p7945_p5, %p7939_p2 }
 0x291   :  { %7949 = shalt.err (!%p7946_p6)  }
 0x292   :  { %107 = dma.hbm_to_vmem [thread:$0]  %s8600_s6, 64512, %s105_s12, [#allocation5 + $0x2]  ;;  %v414_v31 = vpop.permute.xlu1 %413  ;;  %v419_v32 = vpop.permute.xlu0 %418 }
 0x2e6   :  { %v394_v33 = vpop.permute.xlu1 %393 }
 0x2e7   :  { %v405_v36 = vpop.permute.xlu0 %404  ;;  %v398_v37 = vadd.f32 %v7673_v14, %v394_v33 }
 0x2ea   :  { %v392_v34 = vpop.permute.xlu1 %391 }
 0x2eb   :  { %v397_v35 = vadd.f32 %v392_v34, %v367_v18 }
 0x2ed   :  { %v410_v38 = vadd.f32 %v405_v36, %v397_v35 }
 0x2ee   :  { %v407_v39 = vpop.permute.xlu1 %406 }
 0x2ef   :  { %v421_v40 = vadd.f32 %v414_v31, %v410_v38  ;;  %v411_v41 = vadd.f32 %v407_v39, %v398_v37 }
 0x2f1   :  { %v425_v42 = vmin.f32 %v421_v40, 0.0  ;;  %v422_v43 = vadd.f32 %v419_v32, %v411_v41  ;;  %vm423_vm8 = vcmp.gt.f32.partialorder %v421_v40, 0.0 }
 0x2f3   :  { %v427_v44 = vmul.f32 1.442695, %v425_v42  ;;  %v426_v45 = vmin.f32 %v422_v43, 0.0  ;;  %vm424_vm9 = vcmp.gt.f32.partialorder %v422_v43, 0.0 }
 0x2f5   :  { %7752 = vpow2.f32 %v427_v44  ;;  %v429_v46 = vmul.f32 1.442695, %v426_v45 }
 0x2f7   :  { %7754 = vpow2.f32 %v429_v46 }
 0x302   :  { %v7753_v47 = vpop.eup %7752 }
 0x303   :  { %v6886_v48 = vadd.f32 -1.0, %v7753_v47 }
 0x304   :  { %v7755_v49 = vpop.eup %7754 }
 0x305   :  { %v433_v50 = vsel %vm423_vm8, %v421_v40, %v6886_v48  ;;  %v6887_v51 = vadd.f32 -1.0, %v7755_v49 }
 0x307   :  { %v434_v52 = vsel %vm424_vm9, %v422_v43, %v6887_v51 }
 0x308   :  { %7976 = dma.done.wait [#allocation5], 2688 }
 0x309   :  { %7977 = vsyncadd [#allocation5], 4294964608  ;;  %7677 = vmatprep.subr.bf16.mxu0 %v7998_v11  ;;  %623 = vmatprep.mubr.bf16.mxu1 %v7993_v1  ;;  %vm581_vm10 = vcmask 1046528   ;;  %v7758_v53 = vld [vmem:[#allocation2 + $0x94] ss:$12 sps:$4 sm:$0x7f]   ;;  %v467_v14 = vpack.c.bf16 %v434_v52, %v433_v50 }
 0x30a   :  { %7691 = vmatprep.mubr.msk.bf16.mxu0 %vm7999_vm1, %v7998_v11  ;;  %675 = vrot.lane.b32.xlu0 %v8071_v4, %s7990_s0  ;;  %v7760_v54 = vld [vmem:[#allocation2 + $0x90] ss:$12 sps:$4 sm:$0x7f]   ;;  %v7761_v55 = vld [vmem:[#allocation2 + $0x98] ss:$12 sps:$4 sm:$0x7f]  }
 0x30b   :  { %679 = vrot.lane.b32.xlu1 %v8093_v16, %s7990_s0  ;;  %6909 = vmatprep.subr.msk.bf16.mxu1 %vm581_vm10, %v7758_v53  ;;  %v583_v56 = vsel %vm581_vm10, %v7760_v54, 0  ;;  %v7762_v57 = vld [vmem:[#allocation2 + $0x7c] ss:$12 sps:$4 sm:$0xff]   ;;  %v7764_v58 = vld [vmem:[#allocation2 + $0x78] ss:$12 sps:$4 sm:$0xff]   ;;  %v589_v59 = vsel %vm581_vm10, %v7761_v55, 0 }
 0x30c   :  { %594 = vmatpush1.bf16.msra.mxu1 %v583_v56  ;;  %7678 = vmatpush3.bf16.msra.mxu0 %v589_v59  ;;  %v7765_v16 = vld [vmem:[#allocation2 + $0x80] ss:$12 sps:$4 sm:$0xff]   ;;  %v7772_v62 = vld [vmem:[#allocation2 + $0x48] ss:$12 sps:$4 sm:$0xff]   ;;  %v7773_v63 = vld [vmem:[#allocation2 + $0x50] ss:$12 sps:$4 sm:$0xff]  }
 0x30d   :  { %595 = vmatprep.subr.bf16.mxu1 %v7762_v57  ;;  %7679 = vmatprep.subr.bf16.mxu0 %v7998_v11  ;;  %v7768_v60 = vld [vmem:[#allocation2 + $0x60] ss:$12 sps:$4 sm:$0xff]   ;;  %v7776_v3 = vld [vmem:[#allocation2 + $0x30] ss:$12 sps:$4 sm:$0xff]   ;;  %v7777_v6 = vld [vmem:[#allocation2 + $0x38] ss:$12 sps:$4 sm:$0xff]  }
 0x30e   :  { %677 = vrot.lane.b32.xlu0 %v8089_v15, %s7990_s0  ;;  %v7766_v15 = vld [vmem:[#allocation2 + $0x64] ss:$12 sps:$4 sm:$0xff]   ;;  %v7770_v61 = vld [vmem:[#allocation2 + $0x4c] ss:$12 sps:$4 sm:$0xff]   ;;  %v7774_v0 = vld [vmem:[#allocation2 + $0x34] ss:$12 sps:$4 sm:$0xff]  }
 0x30f   :  { %681 = vrot.lane.b32.xlu1 %v8095_v17, %s7990_s0  ;;  %v7769_v17 = vld [vmem:[#allocation2 + $0x68] ss:$12 sps:$4 sm:$0xff]   ;;  %v7780_v8 = vld [vmem:[#allocation2 + $0x18] ss:$12 sps:$4 sm:$0xff]   ;;  %v7781_v9 = vld [vmem:[#allocation2 + $0x20] ss:$12 sps:$4 sm:$0xff]  }
 0x310   :  { %596 = vmatpush1.bf16.msra.mxu1 %v7764_v58  ;;  %7680 = vmatpush3.bf16.msra.mxu0 %v7765_v16  ;;  %v7778_v7 = vld [vmem:[#allocation2 + $0x1c] ss:$12 sps:$4 sm:$0xff]   ;;  %v7782_v10 = vld [vmem:[#allocation2 + $0x4] ss:$12 sps:$4 sm:$0xff]   ;;  %v7784_v12 = vld [vmem:[#allocation2] ss:$12 sps:$4 sm:$0xff]  }
 0x311   :  { %597 = vmatprep.subr.bf16.mxu1 %v7766_v15  ;;  %7681 = vmatprep.subr.bf16.mxu0 %v7998_v11  ;;  %v7785_v13 = vld [vmem:[#allocation2 + $0x8] ss:$12 sps:$4 sm:$0xff]   ;;  %vm577_vm11 = vcmask 900096   ;;  %vm683_vm12 = vcmask 80896   ;;  %v8007_v34 = vmov 43   ;;  %s8008_s5 = smov 124  }
 0x312   :  { %7756 = vset.pattern.permute.xlu1 %v8007_v34  ;;  %7757 = vset.pattern.permute.xlu0 %v8007_v34  ;;  %vm896_vm13 = vcmask 1039360   ;;  %vm949_vm14 = vcmask 1031168   ;;  %vm967_vm15 = vcmask 1014784  }
 0x314   :  { %598 = vmatpush1.bf16.msra.mxu1 %v7768_v60  ;;  %7682 = vmatpush3.bf16.msra.mxu0 %v7769_v17 }
 0x315   :  { %599 = vmatprep.subr.bf16.mxu1 %v7770_v61  ;;  %7683 = vmatprep.subr.bf16.mxu0 %v7998_v11 }
 0x318   :  { %600 = vmatpush1.bf16.msra.mxu1 %v7772_v62  ;;  %7684 = vmatpush3.bf16.msra.mxu0 %v7773_v63 }
 0x319   :  { %601 = vmatprep.subr.bf16.mxu1 %v7774_v0  ;;  %7685 = vmatprep.subr.bf16.mxu0 %v7998_v11 }
 0x31c   :  { %602 = vmatpush1.bf16.msra.mxu1 %v7776_v3  ;;  %7686 = vmatpush3.bf16.msra.mxu0 %v7777_v6 }
 0x31d   :  { %603 = vmatprep.subr.bf16.mxu1 %v7778_v7  ;;  %7687 = vmatprep.subr.bf16.mxu0 %v7998_v11 }
 0x320   :  { %604 = vmatpush1.bf16.msra.mxu1 %v7780_v8  ;;  %7688 = vmatpush3.bf16.msra.mxu0 %v7781_v9 }
 0x321   :  { %605 = vmatprep.subr.bf16.mxu1 %v7782_v10  ;;  %7689 = vmatprep.subr.bf16.mxu0 %v7998_v11 }
 0x324   :  { %606 = vmatpush1.bf16.msra.mxu1 %v7784_v12  ;;  %7690 = vmatpush3.bf16.msra.mxu0 %v7785_v13 }
 0x327   :  { %6910 = vmatmul.mubr.msk.bf16.vlgmr.msra.gmra.mxu1 %vm577_vm11, %v467_v14  ;;  %7692 = vmatmul.mubr.msk.bf16.vlgmr.msra.gmra.mxu0 %vm577_vm11, %v467_v14 }
 0x328   :  { %765 = vmatprep.mubr.f32.mxu1 %v7998_v11 }
 0x37c   :  { %v676_v18 = vpop.permute.xlu0 %675 }
 0x37d   :  { %7699 = vmatprep.mubr.msk.f32.mxu0 %vm683_vm12, %v676_v18  ;;  %v680_v29 = vpop.permute.xlu1 %679 }
 0x380   :  { %v678_v32 = vpop.permute.xlu0 %677 }
 0x381   :  { %v682_v33 = vpop.permute.xlu1 %681 }
 0x3e7   :  { %v625_v22 = vpop.f32.mrf.mxu1  ;;  %v668_v24 = vpop.f32.mrf.mxu0 }
 0x3e9   :  { %v627_v25 = vpop.f32.mrf.mxu1  ;;  %v7693_v26 = vpop.f32.mrf.mxu0 }
 0x3eb   :  { %v629_v27 = vpop.f32.mrf.mxu1  ;;  %v671_v28 = vpop.f32.mrf.mxu0 }
 0x3ec   :  { %7695 = vmatprep.subr.msk.mxu0 %vm232_vm0, %v671_v28 }
 0x3ed   :  { %v631_v30 = vpop.f32.mrf.mxu1  ;;  %7696 = vmatpush3.msk.msra.mxu0 %vm232_vm0, %v671_v28  ;;  %v7694_v31 = vpop.f32.mrf.mxu0 }
 0x3ee   :  { %6912 = vmatprep.subr.msk.mxu1 %vm232_vm0, %v631_v30  ;;  %7697 = vmatprep.subr.mxu0 %v668_v24 }
 0x3ef   :  { %6913 = vmatpush1.msk.msra.mxu1 %vm232_vm0, %v629_v27  ;;  %7698 = vmatpush3.msra.mxu0 %v668_v24 }
 0x3f0   :  { %731 = vmatprep.subr.mxu1 %v627_v25  ;;  %7700 = vmatmul.mubr.msk.f32.vlgmr.msra.gmra.mxu0 %vm683_vm12, %v678_v32 }
 0x3f1   :  { %732 = vmatpush1.msra.mxu1 %v625_v22  ;;  %7702 = vmatprep.mubr.msk.f32.mxu0 %vm683_vm12, %v680_v29 }
 0x3f2   :  { %6914 = vmatmul.mubr.msk.f32.vlgmr.msra.gmra.mxu1 %vm683_vm12, %v676_v18 }
 0x3f3   :  { %771 = vmatprep.mubr.f32.mxu1 %v7998_v11 }
 0x3f4   :  { %7703 = vmatmul.mubr.msk.f32.gmra.mxu0 %vm683_vm12, %v682_v33 }
 0x3f6   :  { %6915 = vmatmul.mubr.msk.f32.gmra.mxu1 %vm683_vm12, %v678_v32 }
 0x3f7   :  { %777 = vmatprep.mubr.f32.mxu1 %v7998_v11 }
 0x3fa   :  { %6916 = vmatmul.mubr.msk.f32.gmra.mxu1 %vm683_vm12, %v680_v29 }
 0x3fb   :  { %783 = vmatprep.mubr.f32.mxu1 %v7998_v11 }
 0x3fe   :  { %6917 = vmatmul.mubr.msk.f32.gmra.mxu1 %vm683_vm12, %v682_v33 }
 0x4b0   :  { %v7701_v36 = vpop.f32.mrf.mxu0 }
 0x4b1   :  { %v888_v52 = vrot.slane %v7701_v36, 6 }
 0x4b2   :  { %v8174_v35 = vpop.f32.mrf.mxu1  ;;  %v8178_v39 = vpop.f32.mrf.mxu0 }
 0x4b3   :  { %v881_v49 = vrot.slane %v8174_v35, 6  ;;  %v887_v53 = vrot.slane %v8178_v39, 6 }
 0x4b4   :  { %v8176_v37 = vpop.f32.mrf.mxu1  ;;  %v7704_v41 = vpop.f32.mrf.mxu0 }
 0x4b5   :  { %v884_v51 = vrot.slane %v8176_v37, 6  ;;  %v889_v56 = vsel %vm232_vm0, %v887_v53, %v888_v52 }
 0x4b6   :  { %v773_v38 = vpop.f32.mrf.mxu1  ;;  %v866_v45 = vpop.f32.mrf.mxu0 }
 0x4b7   :  { %v882_v47 = vrot.slane %v773_v38, 6  ;;  %v910_v48 = vrot.slane %v866_v45, 6 }
 0x4b8   :  { %v775_v40 = vpop.f32.mrf.mxu1 }
 0x4b9   :  { %v885_v50 = vrot.slane %v775_v40, 6  ;;  %v883_v54 = vsel %vm232_vm0, %v881_v49, %v882_v47 }
 0x4ba   :  { %v779_v42 = vpop.f32.mrf.mxu1 }
 0x4bb   :  { %v908_v43 = vrot.slane %v779_v42, 6  ;;  %v886_v55 = vsel %vm232_vm0, %v884_v51, %v885_v50 }
 0x4bc   :  { %v781_v44 = vpop.f32.mrf.mxu1 }
 0x4bd   :  { %911 = vrot.lane.b32.xlu0 %v908_v43, %s8002_s3  ;;  %v909_v46 = vrot.slane %v781_v44, 6 }
 0x4be   :  { %v785_v57 = vpop.f32.mrf.mxu1 }
 0x4bf   :  { %913 = vrot.lane.b32.xlu1 %v909_v46, %s8002_s3 }
 0x4c0   :  { %v787_v18 = vpop.f32.mrf.mxu1 }
 0x4c1   :  { %915 = vrot.lane.b32.xlu0 %v910_v48, %s8002_s3 }
 0x4c3   :  { %890 = vrot.lane.b32.xlu1 %v883_v54, %s8002_s3 }
 0x4c5   :  { %892 = vrot.lane.b32.xlu0 %v886_v55, %s8002_s3 }
 0x4c7   :  { %894 = vrot.lane.b32.xlu1 %v889_v56, %s8002_s3 }
 0x4c9   :  { %961 = vrot.lane.b32.xlu0 %v785_v57, %s8008_s5 }
 0x4cb   :  { %978 = vperm.xlu1 %7756, %v8069_v2  }
 0x52f   :  { %v912_v58 = vpop.permute.xlu0 %911 }
 0x531   :  { %v914_v59 = vpop.permute.xlu1 %913 }
 0x532   :  { %v917_v16 = vsel %vm896_vm13, %v912_v58, %v914_v59 }
 0x533   :  { %v922_v15 = vadd.f32 %v917_v16, %v773_v38  ;;  %v916_v60 = vpop.permute.xlu0 %915  ;;  %v925_v17 = vadd.f32 %v917_v16, %v779_v42 }
 0x534   :  { %v918_v61 = vsel %vm896_vm13, %v914_v59, %v916_v60  ;;  %v924_v62 = vadd.f32 %v7701_v36, %v916_v60  ;;  %v927_v63 = vadd.f32 %v916_v60, %v866_v45 }
 0x535   :  { %v923_v0 = vadd.f32 %v918_v61, %v775_v40  ;;  %v926_v3 = vadd.f32 %v918_v61, %v781_v44  ;;  %v934_v10 = vrot.slane %v922_v15, 4  ;;  %v935_v12 = vrot.slane %v925_v17, 4  ;;  %v891_v22 = vpop.permute.xlu1 %890 }
 0x536   :  { %v940_v6 = vrot.slane %v924_v62, 4  ;;  %v941_v7 = vrot.slane %v927_v63, 4 }
 0x537   :  { %v937_v8 = vrot.slane %v923_v0, 4  ;;  %v938_v9 = vrot.slane %v926_v3, 4  ;;  %v936_v14 = vsel %vm400_vm7, %v934_v10, %v935_v12  ;;  %v893_v24 = vpop.permute.xlu0 %892 }
 0x538   :  { %v942_v2 = vsel %vm400_vm7, %v940_v6, %v941_v7  ;;  %v897_v29 = vsel %vm896_vm13, %v891_v22, %v893_v24 }
 0x539   :  { %947 = vrot.lane.b32.xlu0 %v942_v2, %s8003_s23  ;;  %v939_v13 = vsel %vm400_vm7, %v937_v8, %v938_v9  ;;  %v895_v25 = vpop.permute.xlu1 %894  ;;  %v902_v32 = vadd.f32 %v897_v29, %v8174_v35 }
 0x53a   :  { %945 = vrot.lane.b32.xlu1 %v939_v13, %s8003_s23  ;;  %v898_v31 = vsel %vm896_vm13, %v893_v24, %v895_v25  ;;  %v904_v34 = vadd.f32 %v895_v25, %v8178_v39 }
 0x53b   :  { %v962_v27 = vpop.permute.xlu0 %961 }
 0x53d   :  { %943 = vrot.lane.b32.xlu0 %v936_v14, %s8003_s23 }
 0x53e   :  { %963 = vrot.lane.b32.xlu1 %v787_v18, %s8008_s5 }
 0x541   :  { %965 = vrot.lane.b32.xlu0 %v7704_v41, %s8008_s5  ;;  %v903_v41 = vadd.f32 %v898_v31, %v8176_v37 }
 0x546   :  { %v979_v26 = vpop.permute.xlu1 %978 }
 0x5ab   :  { %v948_v28 = vpop.permute.xlu0 %947 }
 0x5ac   :  { %v946_v30 = vpop.permute.xlu1 %945  ;;  %v957_v44 = vadd.f32 %v948_v28, %v904_v34 }
 0x5ad   :  { %v951_v36 = vsel %vm949_vm14, %v946_v30, %v948_v28 }
 0x5ae   :  { %v956_v45 = vadd.f32 %v951_v36, %v903_v41 }
 0x5af   :  { %v944_v33 = vpop.permute.xlu0 %943 }
 0x5b0   :  { %v950_v38 = vsel %vm949_vm14, %v944_v33, %v946_v30  ;;  %v964_v40 = vpop.permute.xlu1 %963 }
 0x5b1   :  { %v955_v42 = vadd.f32 %v950_v38, %v902_v32  ;;  %v968_v43 = vsel %vm967_vm15, %v962_v27, %v964_v40 }
 0x5b3   :  { %v973_v46 = vadd.f32 %v968_v43, %v955_v42  ;;  %v966_v47 = vpop.permute.xlu0 %965 }
 0x5b4   :  { %v969_v48 = vsel %vm967_vm15, %v964_v40, %v966_v47  ;;  %v975_v35 = vadd.f32 %v966_v47, %v957_v44 }
 0x5b5   :  { %v981_v49 = vadd.f32 %v979_v26, %v973_v46  ;;  %v974_v50 = vadd.f32 %v969_v48, %v956_v45 }
 0x5b6   :  { %v983_v39 = vadd.f32 %v979_v26, %v975_v35 }
 0x5b7   :  { %v987_v51 = vmin.f32 %v981_v49, 0.0  ;;  %v982_v52 = vadd.f32 %v979_v26, %v974_v50  ;;  %vm984_vm1 = vcmp.gt.f32.partialorder %v981_v49, 0.0 }
 0x5b8   :  { %v989_v53 = vmin.f32 %v983_v39, 0.0  ;;  %vm986_vm2 = vcmp.gt.f32.partialorder %v983_v39, 0.0 }
 0x5b9   :  { %v990_v54 = vmul.f32 1.442695, %v987_v51  ;;  %v988_v55 = vmin.f32 %v982_v52, 0.0  ;;  %vm985_vm3 = vcmp.gt.f32.partialorder %v982_v52, 0.0 }
 0x5ba   :  { %v994_v56 = vmul.f32 1.442695, %v989_v53 }
 0x5bb   :  { %7786 = vpow2.f32 %v990_v54  ;;  %v992_v37 = vmul.f32 1.442695, %v988_v55 }
 0x5bc   :  { %7788 = vpow2.f32 %v994_v56 }
 0x5bd   :  { %7790 = vpow2.f32 %v992_v37 }
 0x5c8   :  { %v7787_v57 = vpop.eup %7786 }
 0x5c9   :  { %v7789_v58 = vpop.eup %7788  ;;  %v6923_v59 = vadd.f32 -1.0, %v7787_v57 }
 0x5ca   :  { %v7791_v16 = vpop.eup %7790  ;;  %v6925_v15 = vadd.f32 -1.0, %v7789_v58 }
 0x5cb   :  { %v8213_v60 = vsel %vm984_vm1, %v981_v49, %v6923_v59  ;;  %v6924_v17 = vadd.f32 -1.0, %v7791_v16 }
 0x5cc   :  { %v8215_v61 = vsel %vm986_vm2, %v983_v39, %v6925_v15 }
 0x5cd   :  { %v1000_v62 = vsel %vm985_vm3, %v982_v52, %v6924_v17 }
 0x5ce   :  { %7978 = dma.done.wait [#allocation5 + $0x1], 21504 }
 0x5cf   :  { %7979 = vsyncadd [#allocation5 + $0x1], 4294945792  ;;  %2112 = vmatprep.mubr.bf16.mxu0 %v7993_v1  ;;  %v8218_v63 = vpack.c.bf16 %v1000_v62, %v1000_v62  ;;  %v8009_v0 = vmov 65535   ;;  %v1062_v6 = vld [vmem:[#allocation3 + $0x1c0] sm:$0xff]  ;;  %v1063_v58 = vld [vmem:[#allocation3 + $0x1c8] sm:$0xff]  ;;  %vm2009_vm4 = vcmask 629760  }
 0x5d0   :  { %v2013_v3 = vsel %vm297_vm6, 4294967295, %v8009_v0  ;;  %v1066_v7 = vld [vmem:[#allocation3 + $0x1e0] sm:$0xff]  ;;  %v1067_v59 = vld [vmem:[#allocation3 + $0x1e8] sm:$0xff]  ;;  %s8010_s6 = smov 48   ;;  %vm2371_vm5 = vcmask 48128  }
 0x5d1   :  { %2071 = vmatprep.mubr.bf16.mxu1 %v8218_v63  ;;  %v1166_v8 = vld [vmem:[#allocation3 + $0x500] sm:$0xff]  ;;  %v6983_v9 = vcombine.high %v1062_v6, %v1066_v7  ;;  %v6982_v2 = vcombine.low %v1062_v6, %v1066_v7  ;;  %v8224_v12 = vsel %vm581_vm10, %v2013_v3, 0  ;;  %v6985_v3 = vcombine.high %v1063_v58, %v1067_v59  ;;  %v1055_v7 = vld [vmem:[#allocation3 + $0x188] sm:$0xff]  ;;  %2367 = vrot.lane.b32.xlu0 %v8071_v4, %s8010_s6 }
 0x5d2   :  { %v1170_v10 = vld [vmem:[#allocation3 + $0x520] sm:$0x77] }
 0x5d3   :  { %v1054_v13 = vld [vmem:[#allocation3 + $0x180] sm:$0xff]  ;;  %v7087_v18 = vcombine.high %v1166_v8, %v1170_v10  ;;  %v7086_v22 = vcombine.low %v1166_v8, %v1170_v10  ;;  %2039 = vmatprep.subr.bf16.mxu1 %v6983_v9  ;;  %v1059_v8 = vld [vmem:[#allocation3 + $0x1a8] sm:$0xff]  ;;  %v8230_v9 = vpack.c.bf16 %v8215_v61, %v8215_v61 }
 0x5d4   :  { %v1058_v14 = vld [vmem:[#allocation3 + $0x1a0] sm:$0xff]  ;;  %2040 = vmatpush1.bf16.msra.mxu1 %v6982_v2  ;;  %v6976_v61 = vcombine.low %v1055_v7, %v1059_v8 }
 0x5d5   :  { %v6975_v24 = vcombine.high %v1054_v13, %v1058_v14  ;;  %v1158_v25 = vld [vmem:[#allocation3 + $0x4c0] sm:$0xff]  ;;  %v2019_v29 = vand.u32 %v7087_v18, %v8224_v12  ;;  %v2016_v30 = vand.u32 %v7086_v22, %v8224_v12  ;;  %v6974_v31 = vcombine.low %v1054_v13, %v1058_v14  ;;  %2369 = vrot.lane.b32.xlu0 %v8074_v5, %s8010_s6 }
 0x5d6   :  { %v1162_v26 = vld [vmem:[#allocation3 + $0x4e0] sm:$0xff]  ;;  %v6984_v13 = vcombine.low %v1063_v58, %v1067_v59  ;;  %v6977_v18 = vcombine.high %v1055_v7, %v1059_v8 }
 0x5d7   :  { %v1046_v27 = vld [vmem:[#allocation3 + $0x140] sm:$0xff]  ;;  %v7079_v32 = vcombine.high %v1158_v25, %v1162_v26  ;;  %2041 = vmatprep.subr.bf16.mxu1 %v6975_v24  ;;  %2086 = vmatprep.subr.bf16.mxu0 %v2019_v29  ;;  %v7078_v41 = vcombine.low %v1158_v25, %v1162_v26  ;;  %v1047_v24 = vld [vmem:[#allocation3 + $0x148] sm:$0xff] }
 0x5d8   :  { %v1050_v28 = vld [vmem:[#allocation3 + $0x160] sm:$0xff]  ;;  %2087 = vmatpush1.bf16.msra.mxu0 %v2016_v30  ;;  %2042 = vmatpush1.bf16.msra.mxu1 %v6974_v31  ;;  %v1051_v25 = vld [vmem:[#allocation3 + $0x168] sm:$0xff] }
 0x5d9   :  { %v6967_v33 = vcombine.high %v1046_v27, %v1050_v28  ;;  %v1150_v34 = vld [vmem:[#allocation3 + $0x480] sm:$0xff]  ;;  %2088 = vmatprep.subr.bf16.mxu0 %v7079_v32  ;;  %v6966_v42 = vcombine.low %v1046_v27, %v1050_v28  ;;  %v6969_v29 = vcombine.high %v1047_v24, %v1051_v25  ;;  %v1039_v31 = vld [vmem:[#allocation3 + $0x108] sm:$0xff] }
 0x5da   :  { %v1154_v36 = vld [vmem:[#allocation3 + $0x4a0] sm:$0xff]  ;;  %v1043_v32 = vld [vmem:[#allocation3 + $0x128] sm:$0xff] }
 0x5db   :  { %v1038_v38 = vld [vmem:[#allocation3 + $0x100] sm:$0xff]  ;;  %v7071_v43 = vcombine.high %v1150_v34, %v1154_v36  ;;  %2043 = vmatprep.subr.bf16.mxu1 %v6967_v33  ;;  %v7070_v35 = vcombine.low %v1150_v34, %v1154_v36  ;;  %v6968_v36 = vcombine.low %v1047_v24, %v1051_v25 }
 0x5dc   :  { %v1042_v40 = vld [vmem:[#allocation3 + $0x120] sm:$0xff]  ;;  %2089 = vmatpush1.bf16.msra.mxu0 %v7078_v41  ;;  %2044 = vmatpush1.bf16.msra.mxu1 %v6966_v42  ;;  %v1031_v42 = vld [vmem:[#allocation3 + $0xc8] sm:$0xff] }
 0x5dd   :  { %v6959_v44 = vcombine.high %v1038_v38, %v1042_v40  ;;  %v1142_v45 = vld [vmem:[#allocation3 + $0x440] sm:$0xff]  ;;  %2090 = vmatprep.subr.bf16.mxu0 %v7071_v43  ;;  %v6958_v49 = vcombine.low %v1038_v38, %v1042_v40  ;;  %v6961_v40 = vcombine.high %v1039_v31, %v1043_v32  ;;  %v1035_v43 = vld [vmem:[#allocation3 + $0xe8] sm:$0xff] }
 0x5de   :  { %v1146_v46 = vld [vmem:[#allocation3 + $0x460] sm:$0xff] }
 0x5df   :  { %v1030_v47 = vld [vmem:[#allocation3 + $0xc0] sm:$0xff]  ;;  %v7063_v50 = vcombine.high %v1142_v45, %v1146_v46  ;;  %2045 = vmatprep.subr.bf16.mxu1 %v6959_v44  ;;  %v7062_v55 = vcombine.low %v1142_v45, %v1146_v46  ;;  %v6960_v46 = vcombine.low %v1039_v31, %v1043_v32  ;;  %v1171_v31 = vld [vmem:[#allocation3 + $0x528] sm:$0x77] }
 0x5e0   :  { %v1034_v48 = vld [vmem:[#allocation3 + $0xe0] sm:$0xff]  ;;  %2091 = vmatpush1.bf16.msra.mxu0 %v7070_v35  ;;  %2046 = vmatpush1.bf16.msra.mxu1 %v6958_v49  ;;  %v1023_v35 = vld [vmem:[#allocation3 + $0x88] sm:$0xff] }
 0x5e1   :  { %v6951_v39 = vcombine.high %v1030_v47, %v1034_v48  ;;  %v1134_v51 = vld [vmem:[#allocation3 + $0x400] sm:$0xff]  ;;  %2092 = vmatprep.subr.bf16.mxu0 %v7063_v50  ;;  %v6950_v56 = vcombine.low %v1030_v47, %v1034_v48  ;;  %v6953_v47 = vcombine.high %v1031_v42, %v1035_v43  ;;  %v1027_v49 = vld [vmem:[#allocation3 + $0xa8] sm:$0xff] }
 0x5e2   :  { %v1138_v52 = vld [vmem:[#allocation3 + $0x420] sm:$0xff] }
 0x5e3   :  { %v1022_v53 = vld [vmem:[#allocation3 + $0x80] sm:$0xff]  ;;  %v7055_v37 = vcombine.high %v1134_v51, %v1138_v52  ;;  %2047 = vmatprep.subr.bf16.mxu1 %v6951_v39  ;;  %v7054_v17 = vcombine.low %v1134_v51, %v1138_v52  ;;  %v6952_v51 = vcombine.low %v1031_v42, %v1035_v43 }
 0x5e4   :  { %v1026_v54 = vld [vmem:[#allocation3 + $0xa0] sm:$0xff]  ;;  %2093 = vmatpush1.bf16.msra.mxu0 %v7062_v55  ;;  %2048 = vmatpush1.bf16.msra.mxu1 %v6950_v56  ;;  %v1019_v55 = vld [vmem:[#allocation3 + $0x68] sm:$0xff] }
 0x5e5   :  { %v6943_v57 = vcombine.high %v1022_v53, %v1026_v54  ;;  %v1014_v16 = vld [vmem:[#allocation3 + $0x40] sm:$0xff]  ;;  %2094 = vmatprep.subr.bf16.mxu0 %v7055_v37  ;;  %v6942_v62 = vcombine.low %v1022_v53, %v1026_v54  ;;  %v6945_v53 = vcombine.high %v1023_v35, %v1027_v49  ;;  %v1015_v54 = vld [vmem:[#allocation3 + $0x48] sm:$0xff] }
 0x5e6   :  { %v1018_v15 = vld [vmem:[#allocation3 + $0x60] sm:$0xff]  ;;  %v6937_v59 = vcombine.high %v1015_v54, %v1019_v55 }
 0x5e7   :  { %2049 = vmatprep.subr.bf16.mxu1 %v6943_v57  ;;  %v6935_v6 = vcombine.high %v1014_v16, %v1018_v15  ;;  %v1006_v2 = vld [vmem:[#allocation3] sm:$0xff]  ;;  %v6934_v14 = vcombine.low %v1014_v16, %v1018_v15  ;;  %v6944_v57 = vcombine.low %v1023_v35, %v1027_v49  ;;  %v1007_v15 = vld [vmem:[#allocation3 + $0x8] sm:$0xff] }
 0x5e8   :  { %v1010_v10 = vld [vmem:[#allocation3 + $0x20] sm:$0xff]  ;;  %2095 = vmatpush1.bf16.msra.mxu0 %v7054_v17  ;;  %2050 = vmatpush1.bf16.msra.mxu1 %v6942_v62  ;;  %v1011_v17 = vld [vmem:[#allocation3 + $0x28] sm:$0xff] }
 0x5e9   :  { %2121 = vmatprep.subr.bf16.mxu0 %v6985_v3  ;;  %2051 = vmatprep.subr.bf16.mxu1 %v6935_v6  ;;  %v6927_v22 = vcombine.high %v1006_v2, %v1010_v10  ;;  %v1126_v26 = vld [vmem:[#allocation3 + $0x3c0] sm:$0xff]  ;;  %v6926_v28 = vcombine.low %v1006_v2, %v1010_v10  ;;  %v6936_v6 = vcombine.low %v1015_v54, %v1019_v55  ;;  %v1127_v10 = vld [vmem:[#allocation3 + $0x3c8] sm:$0xff] }
 0x5ea   :  { %v1130_v27 = vld [vmem:[#allocation3 + $0x3e0] sm:$0xff]  ;;  %v6929_v8 = vcombine.high %v1007_v15, %v1011_v17  ;;  %v1163_v35 = vld [vmem:[#allocation3 + $0x4e8] sm:$0xff] }
 0x5eb   :  { %7094 = vmatmul.mubr.msk.bf16.vlgmr.msra.gmra.mxu0 %vm2009_vm4, %v8230_v9  ;;  %v7047_v30 = vcombine.high %v1126_v26, %v1130_v27  ;;  %v1118_v33 = vld [vmem:[#allocation3 + $0x380] sm:$0xff]  ;;  %v7046_v38 = vcombine.low %v1126_v26, %v1130_v27  ;;  %v1119_v27 = vld [vmem:[#allocation3 + $0x388] sm:$0xff] }
 0x5ec   :  { %2122 = vmatpush1.bf16.msra.mxu0 %v6984_v13  ;;  %2153 = vmatprep.mubr.bf16.mxu0 %v8218_v63  ;;  %v1122_v34 = vld [vmem:[#allocation3 + $0x3a0] sm:$0xff]  ;;  %v1131_v13 = vld [vmem:[#allocation3 + $0x3e8] sm:$0xff] }
 0x5ed   :  { %2052 = vmatpush1.bf16.msra.mxu1 %v6934_v14  ;;  %2123 = vmatprep.subr.bf16.mxu0 %v6977_v18  ;;  %v7039_v41 = vcombine.high %v1118_v33, %v1122_v34  ;;  %v1110_v44 = vld [vmem:[#allocation3 + $0x340] sm:$0xff]  ;;  %v7038_v4 = vcombine.low %v1118_v33, %v1122_v34  ;;  %v7049_v25 = vcombine.high %v1127_v10, %v1131_v13  ;;  %v1151_v54 = vld [vmem:[#allocation3 + $0x488] sm:$0xff] }
 0x5ee   :  { %2053 = vmatprep.subr.bf16.mxu1 %v6927_v22  ;;  %v1114_v45 = vld [vmem:[#allocation3 + $0x360] sm:$0xff]  ;;  %v6928_v22 = vcombine.low %v1007_v15, %v1011_v17  ;;  %v7048_v32 = vcombine.low %v1127_v10, %v1131_v13  ;;  %v1155_v55 = vld [vmem:[#allocation3 + $0x4a8] sm:$0xff] }
 0x5ef   :  { %v7031_v48 = vcombine.high %v1110_v44, %v1114_v45  ;;  %v1102_v50 = vld [vmem:[#allocation3 + $0x300] sm:$0xff]  ;;  %v7030_v52 = vcombine.low %v1110_v44, %v1114_v45  ;;  %v1147_v15 = vld [vmem:[#allocation3 + $0x468] sm:$0xff] }
 0x5f0   :  { %2124 = vmatpush1.bf16.msra.mxu0 %v6976_v61  ;;  %v1106_v39 = vld [vmem:[#allocation3 + $0x320] sm:$0xff]  ;;  %v1123_v61 = vld [vmem:[#allocation3 + $0x3a8] sm:$0xff] }
 0x5f1   :  { %2054 = vmatpush1.bf16.msra.mxu1 %v6926_v28  ;;  %2125 = vmatprep.subr.bf16.mxu0 %v6969_v29  ;;  %v7023_v5 = vcombine.high %v1102_v50, %v1106_v39  ;;  %v1094_v56 = vld [vmem:[#allocation3 + $0x2c0] sm:$0xff]  ;;  %v7022_v58 = vcombine.low %v1102_v50, %v1106_v39  ;;  %v7041_v34 = vcombine.high %v1119_v27, %v1123_v61  ;;  %v1139_v10 = vld [vmem:[#allocation3 + $0x428] sm:$0xff] }
 0x5f2   :  { %2055 = vmatprep.subr.bf16.mxu1 %v7047_v30  ;;  %v1098_v37 = vld [vmem:[#allocation3 + $0x2e0] sm:$0xff]  ;;  %v1167_v30 = vld [vmem:[#allocation3 + $0x508] sm:$0xff]  ;;  %v7040_v42 = vcombine.low %v1119_v27, %v1123_v61  ;;  %v8240_v50 = vpack.c.bf16 %v8213_v60, %v8213_v60  ;;  %v1172_v27 = vld [vmem:[#allocation3 + $0x530] sm:$0x77] }
 0x5f3   :  { %v7015_v16 = vcombine.high %v1094_v56, %v1098_v37  ;;  %v1086_v62 = vld [vmem:[#allocation3 + $0x280] sm:$0xff]  ;;  %v7014_v7 = vcombine.low %v1094_v56, %v1098_v37  ;;  %v7088_v45 = vcombine.low %v1167_v30, %v1171_v31  ;;  %v1064_v61 = vld [vmem:[#allocation3 + $0x1d0] sm:$0xff] }
 0x5f4   :  { %2126 = vmatpush1.bf16.msra.mxu0 %v6968_v36  ;;  %v1090_v3 = vld [vmem:[#allocation3 + $0x2a0] sm:$0xff] }
 0x5f5   :  { %2056 = vmatpush2.bf16.msra.mxu1 %v7046_v38  ;;  %2127 = vmatprep.subr.bf16.mxu0 %v6961_v40  ;;  %v7007_v2 = vcombine.high %v1086_v62, %v1090_v3  ;;  %v1078_v14 = vld [vmem:[#allocation3 + $0x240] sm:$0xff]  ;;  %v7006_v24 = vcombine.low %v1086_v62, %v1090_v3  ;;  %v1111_v38 = vld [vmem:[#allocation3 + $0x348] sm:$0xff]  ;;  %v2022_v39 = vand.u32 %v7088_v45, %v8224_v12  ;;  %v1164_v45 = vld [vmem:[#allocation3 + $0x4f0] sm:$0xff] }
 0x5f6   :  { %2057 = vmatprep.subr.bf16.mxu1 %v7039_v41  ;;  %v1082_v18 = vld [vmem:[#allocation3 + $0x260] sm:$0xff]  ;;  %v1115_v40 = vld [vmem:[#allocation3 + $0x368] sm:$0xff]  ;;  %v7089_v41 = vcombine.high %v1167_v30, %v1171_v31  ;;  %v7072_v62 = vcombine.low %v1151_v54, %v1155_v55 }
 0x5f7   :  { %v6999_v26 = vcombine.high %v1078_v14, %v1082_v18  ;;  %v1070_v28 = vld [vmem:[#allocation3 + $0x200] sm:$0xff]  ;;  %v6998_v33 = vcombine.low %v1078_v14, %v1082_v18  ;;  %v7033_v44 = vcombine.high %v1111_v38, %v1115_v40  ;;  %v7032_v49 = vcombine.low %v1111_v38, %v1115_v40 }
 0x5f8   :  { %2128 = vmatpush1.bf16.msra.mxu0 %v6960_v46  ;;  %v1074_v29 = vld [vmem:[#allocation3 + $0x220] sm:$0xff]  ;;  %v2025_v46 = vand.u32 %v7089_v41, %v8224_v12 }
 0x5f9   :  { %2058 = vmatpush2.bf16.msra.mxu1 %v7038_v4  ;;  %2129 = vmatprep.subr.bf16.mxu0 %v6953_v47  ;;  %v6991_v36 = vcombine.high %v1070_v28, %v1074_v29  ;;  %v6990_v43 = vcombine.low %v1070_v28, %v1074_v29  ;;  %v1103_v4 = vld [vmem:[#allocation3 + $0x308] sm:$0xff]  ;;  %v1068_v28 = vld [vmem:[#allocation3 + $0x1f0] sm:$0xff] }
 0x5fa   :  { %2059 = vmatprep.subr.bf16.mxu1 %v7031_v48  ;;  %v1107_v47 = vld [vmem:[#allocation3 + $0x328] sm:$0xff]  ;;  %v6986_v41 = vcombine.low %v1064_v61, %v1068_v28 }
 0x5fb   :  { %v1159_v48 = vld [vmem:[#allocation3 + $0x4c8] sm:$0xff]  ;;  %v7024_v56 = vcombine.low %v1103_v4, %v1107_v47 }
 0x5fc   :  { %2130 = vmatpush1.bf16.msra.mxu0 %v6952_v51  ;;  %v7025_v51 = vcombine.high %v1103_v4, %v1107_v47  ;;  %v7080_v37 = vcombine.low %v1159_v48, %v1163_v35  ;;  %v1052_v4 = vld [vmem:[#allocation3 + $0x170] sm:$0xff] }
 0x5fd   :  { %2060 = vmatpush2.bf16.msra.mxu1 %v7030_v52  ;;  %2131 = vmatprep.subr.bf16.mxu0 %v6945_v53  ;;  %v7081_v52 = vcombine.high %v1159_v48, %v1163_v35  ;;  %v1095_v53 = vld [vmem:[#allocation3 + $0x2c8] sm:$0xff] }
 0x5fe   :  { %2061 = vmatprep.subr.bf16.mxu1 %v7023_v5  ;;  %v1099_v5 = vld [vmem:[#allocation3 + $0x2e8] sm:$0xff] }
 0x5ff   :  { %v7017_v60 = vcombine.high %v1095_v53, %v1099_v5  ;;  %v7016_v17 = vcombine.low %v1095_v53, %v1099_v5  ;;  %v1044_v53 = vld [vmem:[#allocation3 + $0x130] sm:$0xff] }
 0x600   :  { %2132 = vmatpush1.bf16.msra.mxu0 %v6944_v57  ;;  %v7073_v57 = vcombine.high %v1151_v54, %v1155_v55 }
 0x601   :  { %2062 = vmatpush2.bf16.msra.mxu1 %v7022_v58  ;;  %2133 = vmatprep.subr.bf16.mxu0 %v6937_v59  ;;  %v1087_v58 = vld [vmem:[#allocation3 + $0x288] sm:$0xff] }
 0x602   :  { %2063 = vmatprep.subr.bf16.mxu1 %v7015_v16  ;;  %v1091_v59 = vld [vmem:[#allocation3 + $0x2a8] sm:$0xff] }
 0x603   :  { %v1143_v16 = vld [vmem:[#allocation3 + $0x448] sm:$0xff]  ;;  %v7009_v3 = vcombine.high %v1087_v58, %v1091_v59  ;;  %v7008_v13 = vcombine.low %v1087_v58, %v1091_v59  ;;  %v1036_v58 = vld [vmem:[#allocation3 + $0xf0] sm:$0xff] }
 0x604   :  { %2134 = vmatpush1.bf16.msra.mxu0 %v6936_v6  ;;  %v7065_v6 = vcombine.high %v1143_v16, %v1147_v15  ;;  %v7064_v14 = vcombine.low %v1143_v16, %v1147_v15 }
 0x605   :  { %2064 = vmatpush2.bf16.msra.mxu1 %v7014_v7  ;;  %2135 = vmatprep.subr.bf16.mxu0 %v6929_v8  ;;  %v1079_v7 = vld [vmem:[#allocation3 + $0x248] sm:$0xff] }
 0x606   :  { %2065 = vmatprep.subr.bf16.mxu1 %v7007_v2  ;;  %v1083_v8 = vld [vmem:[#allocation3 + $0x268] sm:$0xff] }
 0x607   :  { %v1135_v2 = vld [vmem:[#allocation3 + $0x408] sm:$0xff]  ;;  %v7001_v18 = vcombine.high %v1079_v7, %v1083_v8  ;;  %v7000_v29 = vcombine.low %v1079_v7, %v1083_v8  ;;  %v1028_v7 = vld [vmem:[#allocation3 + $0xb0] sm:$0xff] }
 0x608   :  { %2136 = vmatpush1.bf16.msra.mxu0 %v6928_v22  ;;  %v1071_v22 = vld [vmem:[#allocation3 + $0x208] sm:$0xff]  ;;  %v7056_v30 = vcombine.low %v1135_v2, %v1139_v10 }
 0x609   :  { %2066 = vmatpush2.bf16.msra.mxu1 %v7006_v24  ;;  %2137 = vmatprep.subr.bf16.mxu0 %v7049_v25  ;;  %v7057_v24 = vcombine.high %v1135_v2, %v1139_v10  ;;  %v1075_v25 = vld [vmem:[#allocation3 + $0x228] sm:$0xff] }
 0x60a   :  { %2067 = vmatprep.subr.bf16.mxu1 %v6999_v26  ;;  %v1168_v26 = vld [vmem:[#allocation3 + $0x510] sm:$0xff]  ;;  %v6993_v31 = vcombine.high %v1071_v22, %v1075_v25  ;;  %v6992_v38 = vcombine.low %v1071_v22, %v1075_v25 }
 0x60b   :  { %v7090_v40 = vcombine.low %v1168_v26, %v1172_v27  ;;  %v1016_v22 = vld [vmem:[#allocation3 + $0x50] sm:$0xff] }
 0x60c   :  { %2138 = vmatpush2.bf16.msra.mxu0 %v7048_v32  ;;  %v7091_v32 = vcombine.high %v1168_v26, %v1172_v27 }
 0x60d   :  { %2068 = vmatpush2.bf16.msra.mxu1 %v6998_v33  ;;  %2139 = vmatprep.subr.bf16.mxu0 %v7041_v34  ;;  %v6987_v33 = vcombine.high %v1064_v61, %v1068_v28  ;;  %v1056_v34 = vld [vmem:[#allocation3 + $0x190] sm:$0xff]  ;;  %v2028_v47 = vand.u32 %v7090_v40, %v8224_v12  ;;  %v1057_v28 = vld [vmem:[#allocation3 + $0x198] sm:$0xff] }
 0x60e   :  { %2069 = vmatprep.subr.bf16.mxu1 %v6991_v36  ;;  %v1060_v36 = vld [vmem:[#allocation3 + $0x1b0] sm:$0xff]  ;;  %v1053_v40 = vld [vmem:[#allocation3 + $0x178] sm:$0xff] }
 0x60f   :  { %v6978_v48 = vcombine.low %v1056_v34, %v1060_v36 }
 0x610   :  { %2140 = vmatpush2.bf16.msra.mxu0 %v7040_v42  ;;  %v2031_v42 = vand.u32 %v7091_v32, %v8224_v12 }
 0x611   :  { %2070 = vmatpush2.bf16.msra.mxu1 %v6990_v43  ;;  %2141 = vmatprep.subr.bf16.mxu0 %v7033_v44  ;;  %v6979_v43 = vcombine.high %v1056_v34, %v1060_v36  ;;  %v1160_v44 = vld [vmem:[#allocation3 + $0x4d0] sm:$0xff] }
 0x612   :  { %2168 = vmatprep.subr.bf16.mxu1 %v2025_v46  ;;  %v1048_v46 = vld [vmem:[#allocation3 + $0x150] sm:$0xff]  ;;  %v7083_v35 = vcombine.high %v1160_v44, %v1164_v45  ;;  %v7082_v5 = vcombine.low %v1160_v44, %v1164_v45 }
 0x613   :  { %v6970_v54 = vcombine.low %v1048_v46, %v1052_v4 }
 0x614   :  { %2142 = vmatpush2.bf16.msra.mxu0 %v7032_v49  ;;  %2072 = vmatmul.mubr.bf16.vlgmr.msra.gmra.mxu1 %v8240_v50  ;;  %v6971_v49 = vcombine.high %v1048_v46, %v1052_v4  ;;  %v1041_v4 = vld [vmem:[#allocation3 + $0x118] sm:$0xff] }
 0x615   :  { %2169 = vmatpush1.bf16.msra.mxu1 %v2022_v39  ;;  %2143 = vmatprep.subr.bf16.mxu0 %v7025_v51  ;;  %v1152_v39 = vld [vmem:[#allocation3 + $0x490] sm:$0xff] }
 0x616   :  { %2170 = vmatprep.subr.bf16.mxu1 %v7081_v52  ;;  %2194 = vmatprep.mubr.bf16.mxu1 %v7993_v1  ;;  %v1156_v51 = vld [vmem:[#allocation3 + $0x4b0] sm:$0xff] }
 0x617   :  { %v1040_v52 = vld [vmem:[#allocation3 + $0x110] sm:$0xff]  ;;  %v7075_v55 = vcombine.high %v1152_v39, %v1156_v51  ;;  %v7074_v59 = vcombine.low %v1152_v39, %v1156_v51 }
 0x618   :  { %2144 = vmatpush2.bf16.msra.mxu0 %v7024_v56  ;;  %v6963_v56 = vcombine.high %v1040_v52, %v1044_v53  ;;  %v6962_v16 = vcombine.low %v1040_v52, %v1044_v53  ;;  %v1033_v53 = vld [vmem:[#allocation3 + $0xd8] sm:$0xff] }
 0x619   :  { %2171 = vmatpush1.bf16.msra.mxu1 %v7080_v37  ;;  %2145 = vmatprep.subr.bf16.mxu0 %v7017_v60  ;;  %v1144_v37 = vld [vmem:[#allocation3 + $0x450] sm:$0xff] }
 0x61a   :  { %2172 = vmatprep.subr.bf16.mxu1 %v7073_v57  ;;  %v1148_v60 = vld [vmem:[#allocation3 + $0x470] sm:$0xff] }
 0x61b   :  { %v1032_v57 = vld [vmem:[#allocation3 + $0xd0] sm:$0xff]  ;;  %v7067_v15 = vcombine.high %v1144_v37, %v1148_v60  ;;  %v7066_v8 = vcombine.low %v1144_v37, %v1148_v60 }
 0x61c   :  { %2146 = vmatpush2.bf16.msra.mxu0 %v7016_v17  ;;  %v6955_v17 = vcombine.high %v1032_v57, %v1036_v58  ;;  %v6954_v2 = vcombine.low %v1032_v57, %v1036_v58  ;;  %v1025_v57 = vld [vmem:[#allocation3 + $0x98] sm:$0xff] }
 0x61d   :  { %2173 = vmatpush1.bf16.msra.mxu1 %v7072_v62  ;;  %2147 = vmatprep.subr.bf16.mxu0 %v7009_v3  ;;  %v1136_v62 = vld [vmem:[#allocation3 + $0x410] sm:$0xff]  ;;  %v1029_v58 = vld [vmem:[#allocation3 + $0xb8] sm:$0xff] }
 0x61e   :  { %2174 = vmatprep.subr.bf16.mxu1 %v7065_v6  ;;  %v1140_v3 = vld [vmem:[#allocation3 + $0x430] sm:$0xff] }
 0x61f   :  { %v1024_v6 = vld [vmem:[#allocation3 + $0x90] sm:$0xff]  ;;  %v7059_v10 = vcombine.high %v1136_v62, %v1140_v3  ;;  %v7058_v25 = vcombine.low %v1136_v62, %v1140_v3  ;;  %v6949_v62 = vcombine.high %v1025_v57, %v1029_v58 }
 0x620   :  { %2148 = vmatpush2.bf16.msra.mxu0 %v7008_v13  ;;  %v6947_v13 = vcombine.high %v1024_v6, %v1028_v7  ;;  %v6946_v26 = vcombine.low %v1024_v6, %v1028_v7  ;;  %v1017_v6 = vld [vmem:[#allocation3 + $0x58] sm:$0xff] }
 0x621   :  { %2175 = vmatpush1.bf16.msra.mxu1 %v7064_v14  ;;  %2149 = vmatprep.subr.bf16.mxu0 %v7001_v18  ;;  %v1065_v14 = vld [vmem:[#allocation3 + $0x1d8] sm:$0xff] }
 0x622   :  { %2176 = vmatprep.subr.bf16.mxu1 %v7057_v24  ;;  %v1069_v18 = vld [vmem:[#allocation3 + $0x1f8] sm:$0xff]  ;;  %v1020_v24 = vld [vmem:[#allocation3 + $0x70] sm:$0xff] }
 0x623   :  { %v6989_v27 = vcombine.high %v1065_v14, %v1069_v18  ;;  %v6939_v61 = vcombine.high %v1016_v22, %v1020_v24  ;;  %v6988_v32 = vcombine.low %v1065_v14, %v1069_v18  ;;  %v1021_v7 = vld [vmem:[#allocation3 + $0x78] sm:$0xff] }
 0x624   :  { %2150 = vmatpush2.bf16.msra.mxu0 %v7000_v29  ;;  %v1061_v29 = vld [vmem:[#allocation3 + $0x1b8] sm:$0xff]  ;;  %v6941_v14 = vcombine.high %v1017_v6, %v1021_v7 }
 0x625   :  { %2177 = vmatpush1.bf16.msra.mxu1 %v7056_v30  ;;  %2151 = vmatprep.subr.bf16.mxu0 %v6993_v31  ;;  %v1008_v30 = vld [vmem:[#allocation3 + $0x10] sm:$0xff]  ;;  %v6981_v34 = vcombine.high %v1057_v28, %v1061_v29 }
 0x626   :  { %2203 = vmatprep.subr.bf16.mxu1 %v6987_v33  ;;  %v1012_v31 = vld [vmem:[#allocation3 + $0x30] sm:$0xff]  ;;  %v6938_v33 = vcombine.low %v1016_v22, %v1020_v24  ;;  %v1009_v22 = vld [vmem:[#allocation3 + $0x18] sm:$0xff] }
 0x627   :  { %v6931_v36 = vcombine.high %v1008_v30, %v1012_v31  ;;  %v6930_v44 = vcombine.low %v1008_v30, %v1012_v31  ;;  %v1013_v24 = vld [vmem:[#allocation3 + $0x38] sm:$0xff] }
 0x628   :  { %2152 = vmatpush2.bf16.msra.mxu0 %v6992_v38  ;;  %7095 = vmatmul.mubr.msk.bf16.vlgmr.msra.gmra.mxu1 %vm2009_vm4, %v8230_v9  ;;  %v1049_v38 = vld [vmem:[#allocation3 + $0x158] sm:$0xff] }
 0x629   :  { %2204 = vmatpush1.bf16.msra.mxu1 %v6986_v41  ;;  %2250 = vmatprep.subr.bf16.mxu0 %v2031_v42  ;;  %v1128_v41 = vld [vmem:[#allocation3 + $0x3d0] sm:$0xff]  ;;  %v6973_v45 = vcombine.high %v1049_v38, %v1053_v40  ;;  %v1129_v30 = vld [vmem:[#allocation3 + $0x3d8] sm:$0xff] }
 0x62a   :  { %2205 = vmatprep.subr.bf16.mxu1 %v6979_v43  ;;  %2235 = vmatprep.mubr.bf16.mxu1 %v8218_v63  ;;  %v1132_v42 = vld [vmem:[#allocation3 + $0x3f0] sm:$0xff]  ;;  %v6980_v43 = vcombine.low %v1057_v28, %v1061_v29  ;;  %v6933_v28 = vcombine.high %v1009_v22, %v1013_v24  ;;  %v1133_v31 = vld [vmem:[#allocation3 + $0x3f8] sm:$0xff] }
 0x62b   :  { %2154 = vmatmul.mubr.bf16.vlgmr.msra.gmra.mxu0 %v8240_v50  ;;  %v7051_v46 = vcombine.high %v1128_v41, %v1132_v42  ;;  %v7050_v39 = vcombine.low %v1128_v41, %v1132_v42  ;;  %v1121_v41 = vld [vmem:[#allocation3 + $0x398] sm:$0xff] }
 0x62c   :  { %2251 = vmatpush1.bf16.msra.mxu0 %v2028_v47  ;;  %2276 = vmatprep.mubr.bf16.mxu0 %v7993_v1  ;;  %v1045_v47 = vld [vmem:[#allocation3 + $0x138] sm:$0xff] }
 0x62d   :  { %2206 = vmatpush1.bf16.msra.mxu1 %v6978_v48  ;;  %2252 = vmatprep.subr.bf16.mxu0 %v7083_v35  ;;  %v1120_v48 = vld [vmem:[#allocation3 + $0x390] sm:$0xff]  ;;  %v6965_v51 = vcombine.high %v1041_v4, %v1045_v47  ;;  %v1125_v42 = vld [vmem:[#allocation3 + $0x3b8] sm:$0xff] }
 0x62e   :  { %2207 = vmatprep.subr.bf16.mxu1 %v6971_v49  ;;  %v1124_v35 = vld [vmem:[#allocation3 + $0x3b0] sm:$0xff]  ;;  %v6972_v49 = vcombine.low %v1049_v38, %v1053_v40  ;;  %v7053_v38 = vcombine.high %v1129_v30, %v1133_v31 }
 0x62f   :  { %v7043_v52 = vcombine.high %v1120_v48, %v1124_v35 }
 0x630   :  { %2253 = vmatpush1.bf16.msra.mxu0 %v7082_v5  ;;  %v1112_v5 = vld [vmem:[#allocation3 + $0x350] sm:$0xff] }
 0x631   :  { %2208 = vmatpush1.bf16.msra.mxu1 %v6970_v54  ;;  %2254 = vmatprep.subr.bf16.mxu0 %v7075_v55  ;;  %v1116_v54 = vld [vmem:[#allocation3 + $0x370] sm:$0xff]  ;;  %v6964_v55 = vcombine.low %v1041_v4, %v1045_v47  ;;  %v7052_v4 = vcombine.low %v1129_v30, %v1133_v31 }
 0x632   :  { %2209 = vmatprep.subr.bf16.mxu1 %v6963_v56  ;;  %v7042_v56 = vcombine.low %v1120_v48, %v1124_v35  ;;  %v7035_v60 = vcombine.high %v1112_v5, %v1116_v54  ;;  %v7045_v48 = vcombine.high %v1121_v41, %v1125_v42 }
 0x634   :  { %2255 = vmatpush1.bf16.msra.mxu0 %v7074_v59  ;;  %v1104_v59 = vld [vmem:[#allocation3 + $0x310] sm:$0xff] }
 0x635   :  { %2210 = vmatpush1.bf16.msra.mxu1 %v6962_v16  ;;  %2256 = vmatprep.subr.bf16.mxu0 %v7067_v15  ;;  %v1108_v16 = vld [vmem:[#allocation3 + $0x330] sm:$0xff] }
 0x636   :  { %2211 = vmatprep.subr.bf16.mxu1 %v6955_v17  ;;  %v7034_v17 = vcombine.low %v1112_v5, %v1116_v54  ;;  %v7027_v3 = vcombine.high %v1104_v59, %v1108_v16 }
 0x638   :  { %2257 = vmatpush1.bf16.msra.mxu0 %v7066_v8  ;;  %v1096_v8 = vld [vmem:[#allocation3 + $0x2d0] sm:$0xff] }
 0x639   :  { %2212 = vmatpush1.bf16.msra.mxu1 %v6954_v2  ;;  %2258 = vmatprep.subr.bf16.mxu0 %v7059_v10  ;;  %v1100_v2 = vld [vmem:[#allocation3 + $0x2f0] sm:$0xff]  ;;  %v6948_v10 = vcombine.low %v1025_v57, %v1029_v58 }
 0x63a   :  { %2213 = vmatprep.subr.bf16.mxu1 %v6947_v13  ;;  %v7026_v13 = vcombine.low %v1104_v59, %v1108_v16  ;;  %v7019_v18 = vcombine.high %v1096_v8, %v1100_v2 }
 0x63c   :  { %2259 = vmatpush1.bf16.msra.mxu0 %v7058_v25  ;;  %v1088_v25 = vld [vmem:[#allocation3 + $0x290] sm:$0xff] }
 0x63d   :  { %2214 = vmatpush1.bf16.msra.mxu1 %v6946_v26  ;;  %2285 = vmatprep.subr.bf16.mxu0 %v6989_v27  ;;  %v1092_v26 = vld [vmem:[#allocation3 + $0x2b0] sm:$0xff]  ;;  %v6940_v27 = vcombine.low %v1017_v6, %v1021_v7 }
 0x63e   :  { %2215 = vmatprep.subr.bf16.mxu1 %v6939_v61  ;;  %v7018_v61 = vcombine.low %v1096_v8, %v1100_v2  ;;  %v7011_v29 = vcombine.high %v1088_v25, %v1092_v26 }
 0x63f   :  { %7096 = vmatmul.mubr.msk.bf16.vlgmr.msra.gmra.mxu0 %vm2009_vm4, %v8230_v9 }
 0x640   :  { %2286 = vmatpush1.bf16.msra.mxu0 %v6988_v32  ;;  %2317 = vmatprep.mubr.bf16.mxu0 %v8218_v63  ;;  %v1037_v63 = vld [vmem:[#allocation3 + $0xf8] sm:$0xff]  ;;  %v1080_v32 = vld [vmem:[#allocation3 + $0x250] sm:$0xff] }
 0x641   :  { %2216 = vmatpush1.bf16.msra.mxu1 %v6938_v33  ;;  %2287 = vmatprep.subr.bf16.mxu0 %v6981_v34  ;;  %v6957_v37 = vcombine.high %v1033_v53, %v1037_v63  ;;  %v6956_v15 = vcombine.low %v1033_v53, %v1037_v63  ;;  %v1084_v33 = vld [vmem:[#allocation3 + $0x270] sm:$0xff]  ;;  %v6932_v34 = vcombine.low %v1009_v22, %v1013_v24 }
 0x642   :  { %2217 = vmatprep.subr.bf16.mxu1 %v6931_v36  ;;  %v7010_v36 = vcombine.low %v1088_v25, %v1092_v26  ;;  %v7003_v40 = vcombine.high %v1080_v32, %v1084_v33  ;;  %v7002_v47 = vcombine.low %v1080_v32, %v1084_v33  ;;  %v1081_v26 = vld [vmem:[#allocation3 + $0x258] sm:$0xff] }
 0x643   :  { %v1073_v32 = vld [vmem:[#allocation3 + $0x218] sm:$0xff] }
 0x644   :  { %2288 = vmatpush1.bf16.msra.mxu0 %v6980_v43  ;;  %v1072_v43 = vld [vmem:[#allocation3 + $0x210] sm:$0xff]  ;;  %v1077_v33 = vld [vmem:[#allocation3 + $0x238] sm:$0xff] }
 0x645   :  { %2218 = vmatpush1.bf16.msra.mxu1 %v6930_v44  ;;  %2289 = vmatprep.subr.bf16.mxu0 %v6973_v45  ;;  %v1076_v44 = vld [vmem:[#allocation3 + $0x230] sm:$0xff]  ;;  %v1169_v45 = vld [vmem:[#allocation3 + $0x518] sm:$0xff] }
 0x646   :  { %2219 = vmatprep.subr.bf16.mxu1 %v7051_v46  ;;  %v1173_v46 = vld [vmem:[#allocation3 + $0x538] sm:$0x77]  ;;  %v6995_v35 = vcombine.high %v1072_v43, %v1076_v44  ;;  %v6994_v53 = vcombine.low %v1072_v43, %v1076_v44 }
 0x647   :  { %v7092_v5 = vcombine.low %v1169_v45, %v1173_v46 }
 0x648   :  { %2290 = vmatpush1.bf16.msra.mxu0 %v6972_v49  ;;  %v1113_v49 = vld [vmem:[#allocation3 + $0x358] sm:$0xff] }
 0x649   :  { %2220 = vmatpush2.bf16.msra.mxu1 %v7050_v39  ;;  %2291 = vmatprep.subr.bf16.mxu0 %v6965_v51  ;;  %v1117_v39 = vld [vmem:[#allocation3 + $0x378] sm:$0xff]  ;;  %v7093_v51 = vcombine.high %v1169_v45, %v1173_v46  ;;  %v2034_v58 = vand.u32 %v7092_v5, %v8224_v12 }
 0x64a   :  { %2221 = vmatprep.subr.bf16.mxu1 %v7043_v52  ;;  %v7044_v52 = vcombine.low %v1121_v41, %v1125_v42  ;;  %v7037_v63 = vcombine.high %v1113_v49, %v1117_v39  ;;  %v7036_v57 = vcombine.low %v1113_v49, %v1117_v39 }
 0x64b   :  { %v2037_v54 = vand.u32 %v7093_v51, %v8224_v12  ;;  %v1145_v12 = vld [vmem:[#allocation3 + $0x458] sm:$0xff] }
 0x64c   :  { %2292 = vmatpush1.bf16.msra.mxu0 %v6964_v55  ;;  %v1105_v55 = vld [vmem:[#allocation3 + $0x318] sm:$0xff] }
 0x64d   :  { %2222 = vmatpush2.bf16.msra.mxu1 %v7042_v56  ;;  %2293 = vmatprep.subr.bf16.mxu0 %v6957_v37  ;;  %v1109_v56 = vld [vmem:[#allocation3 + $0x338] sm:$0xff] }
 0x64e   :  { %2223 = vmatprep.subr.bf16.mxu1 %v7035_v60  ;;  %v1161_v37 = vld [vmem:[#allocation3 + $0x4d8] sm:$0xff]  ;;  %v7029_v59 = vcombine.high %v1105_v55, %v1109_v56  ;;  %v7028_v6 = vcombine.low %v1105_v55, %v1109_v56 }
 0x64f   :  { %v1165_v60 = vld [vmem:[#allocation3 + $0x4f8] sm:$0xff] }
 0x650   :  { %2294 = vmatpush1.bf16.msra.mxu0 %v6956_v15  ;;  %v7085_v16 = vcombine.high %v1161_v37, %v1165_v60  ;;  %v1097_v15 = vld [vmem:[#allocation3 + $0x2d8] sm:$0xff]  ;;  %v7084_v7 = vcombine.low %v1161_v37, %v1165_v60 }
 0x651   :  { %2224 = vmatpush2.bf16.msra.mxu1 %v7034_v17  ;;  %2295 = vmatprep.subr.bf16.mxu0 %v6949_v62  ;;  %v1101_v17 = vld [vmem:[#allocation3 + $0x2f8] sm:$0xff] }
 0x652   :  { %2225 = vmatprep.subr.bf16.mxu1 %v7027_v3  ;;  %v1153_v62 = vld [vmem:[#allocation3 + $0x498] sm:$0xff]  ;;  %v7021_v8 = vcombine.high %v1097_v15, %v1101_v17 }
 0x653   :  { %v1157_v3 = vld [vmem:[#allocation3 + $0x4b8] sm:$0xff] }
 0x654   :  { %2296 = vmatpush1.bf16.msra.mxu0 %v6948_v10  ;;  %v7077_v2 = vcombine.high %v1153_v62, %v1157_v3  ;;  %v1089_v10 = vld [vmem:[#allocation3 + $0x298] sm:$0xff]  ;;  %v7076_v22 = vcombine.low %v1153_v62, %v1157_v3 }
 0x655   :  { %2226 = vmatpush2.bf16.msra.mxu1 %v7026_v13  ;;  %2297 = vmatprep.subr.bf16.mxu0 %v6941_v14  ;;  %v1093_v13 = vld [vmem:[#allocation3 + $0x2b8] sm:$0xff] }
 0x656   :  { %2227 = vmatprep.subr.bf16.mxu1 %v7019_v18  ;;  %v1149_v14 = vld [vmem:[#allocation3 + $0x478] sm:$0xff]  ;;  %v7020_v18 = vcombine.low %v1097_v15, %v1101_v17  ;;  %v7013_v24 = vcombine.high %v1089_v10, %v1093_v13 }
 0x657   :  { %v7069_v25 = vcombine.high %v1145_v12, %v1149_v14  ;;  %v7068_v30 = vcombine.low %v1145_v12, %v1149_v14 }
 0x658   :  { %2298 = vmatpush1.bf16.msra.mxu0 %v6940_v27  ;;  %v1085_v27 = vld [vmem:[#allocation3 + $0x278] sm:$0xff] }
 0x659   :  { %2228 = vmatpush2.bf16.msra.mxu1 %v7018_v61  ;;  %2299 = vmatprep.subr.bf16.mxu0 %v6933_v28  ;;  %v1137_v61 = vld [vmem:[#allocation3 + $0x418] sm:$0xff] }
 0x65a   :  { %2229 = vmatprep.subr.bf16.mxu1 %v7011_v29  ;;  %v1141_v28 = vld [vmem:[#allocation3 + $0x438] sm:$0xff]  ;;  %v7012_v29 = vcombine.low %v1089_v10, %v1093_v13 }
 0x65b   :  { %v7061_v31 = vcombine.high %v1137_v61, %v1141_v28 }
 0x65c   :  { %2300 = vmatpush1.bf16.msra.mxu0 %v6932_v34  ;;  %v7004_v34 = vcombine.low %v1081_v26, %v1085_v27 }
 0x65d   :  { %2230 = vmatpush2.bf16.msra.mxu1 %v7010_v36  ;;  %2301 = vmatprep.subr.bf16.mxu0 %v7053_v38  ;;  %v7060_v36 = vcombine.low %v1137_v61, %v1141_v28  ;;  %v6997_v38 = vcombine.high %v1073_v32, %v1077_v33 }
 0x65e   :  { %2231 = vmatprep.subr.bf16.mxu1 %v7003_v40  ;;  %v6996_v40 = vcombine.low %v1073_v32, %v1077_v33 }
 0x660   :  { %2302 = vmatpush2.bf16.msra.mxu0 %v7052_v4 }
 0x661   :  { %2232 = vmatpush2.bf16.msra.mxu1 %v7002_v47  ;;  %2303 = vmatprep.subr.bf16.mxu0 %v7045_v48 }
 0x662   :  { %2233 = vmatprep.subr.bf16.mxu1 %v6995_v35  ;;  %v2368_v35 = vpop.permute.xlu0 %2367 }
 0x664   :  { %2304 = vmatpush2.bf16.msra.mxu0 %v7044_v52 }
 0x665   :  { %2234 = vmatpush2.bf16.msra.mxu1 %v6994_v53  ;;  %2305 = vmatprep.subr.bf16.mxu0 %v7037_v63 }
 0x666   :  { %2332 = vmatprep.subr.bf16.mxu1 %v2037_v54 }
 0x668   :  { %2306 = vmatpush2.bf16.msra.mxu0 %v7036_v57  ;;  %2236 = vmatmul.mubr.bf16.vlgmr.msra.gmra.mxu1 %v8240_v50 }
 0x669   :  { %2333 = vmatpush1.bf16.msra.mxu1 %v2034_v58  ;;  %2307 = vmatprep.subr.bf16.mxu0 %v7029_v59 }
 0x66a   :  { %2334 = vmatprep.subr.bf16.mxu1 %v7085_v16  ;;  %2358 = vmatprep.mubr.bf16.mxu1 %v7993_v1  ;;  %v7005_v1 = vcombine.high %v1081_v26, %v1085_v27 }
 0x66c   :  { %2308 = vmatpush2.bf16.msra.mxu0 %v7028_v6 }
 0x66d   :  { %2335 = vmatpush1.bf16.msra.mxu1 %v7084_v7  ;;  %2309 = vmatprep.subr.bf16.mxu0 %v7021_v8 }
 0x66e   :  { %2336 = vmatprep.subr.bf16.mxu1 %v7077_v2 }
 0x670   :  { %2310 = vmatpush2.bf16.msra.mxu0 %v7020_v18 }
 0x671   :  { %2337 = vmatpush1.bf16.msra.mxu1 %v7076_v22  ;;  %2311 = vmatprep.subr.bf16.mxu0 %v7013_v24  ;;  %v8011_v24 = vmov 44  }
 0x672   :  { %2338 = vmatprep.subr.bf16.mxu1 %v7069_v25  ;;  %7792 = vset.pattern.permute.xlu0 %v8011_v24 }
 0x674   :  { %2312 = vmatpush2.bf16.msra.mxu0 %v7012_v29 }
 0x675   :  { %2339 = vmatpush1.bf16.msra.mxu1 %v7068_v30  ;;  %2313 = vmatprep.subr.bf16.mxu0 %v7005_v1 }
 0x676   :  { %2340 = vmatprep.subr.bf16.mxu1 %v7061_v31 }
 0x678   :  { %2314 = vmatpush2.bf16.msra.mxu0 %v7004_v34 }
 0x679   :  { %2341 = vmatpush1.bf16.msra.mxu1 %v7060_v36  ;;  %2315 = vmatprep.subr.bf16.mxu0 %v6997_v38 }
 0x67c   :  { %2316 = vmatpush2.bf16.msra.mxu0 %v6996_v40  ;;  %7097 = vmatmul.mubr.msk.bf16.vlgmr.msra.gmra.mxu1 %vm2009_vm4, %v8230_v9 }
 0x67d   :  { %2464 = vmatprep.mubr.f32.mxu1 %v7998_v11 }
 0x67f   :  { %2318 = vmatmul.mubr.bf16.vlgmr.msra.gmra.mxu0 %v8240_v50  ;;  %v2370_v50 = vpop.permute.xlu0 %2369 }
 0x680   :  { %2541 = vmatprep.mubr.f32.mxu0 %v7998_v11 }
 0x6ab   :  { %v2114_v41 = vpop.f32.mrf.mxu0 }
 0x6ad   :  { %v2116_v42 = vpop.f32.mrf.mxu0 }
 0x6af   :  { %v2118_v43 = vpop.f32.mrf.mxu0 }
 0x6b1   :  { %v2119_v44 = vpop.f32.mrf.mxu0 }
 0x6d4   :  { %v2073_v45 = vpop.f32.mrf.mxu1 }
 0x6d5   :  { %v2115_v47 = vadd.f32 %v2114_v41, %v2073_v45 }
 0x6d6   :  { %v2075_v46 = vpop.f32.mrf.mxu1 }
 0x6d7   :  { %v2117_v4 = vadd.f32 %v2116_v42, %v2075_v46 }
 0x6d8   :  { %v2077_v48 = vpop.f32.mrf.mxu1 }
 0x6d9   :  { %7098 = vmatprep.subr.msk.mxu1 %vm297_vm6, %v2117_v4 }
 0x6da   :  { %v2078_v9 = vpop.f32.mrf.mxu1  ;;  %7099 = vmatpush1.msk.msra.mxu1 %vm297_vm6, %v2115_v47 }
 0x6db   :  { %7100 = vmatmul.mubr.msk.f32.vlgmr.msra.gmra.mxu1 %vm2371_vm5, %v2368_v35 }
 0x6dc   :  { %2470 = vmatprep.mubr.f32.mxu1 %v7998_v11 }
 0x6df   :  { %7101 = vmatmul.mubr.msk.f32.gmra.mxu1 %vm2371_vm5, %v2370_v50 }
 0x6e0   :  { %2618 = vmatprep.mubr.f32.mxu1 %v7998_v11 }
 0x6e8   :  { %v2196_v49 = vpop.f32.mrf.mxu1 }
 0x6ea   :  { %v2198_v39 = vpop.f32.mrf.mxu1 }
 0x6eb   :  { %v2155_v51 = vpop.f32.mrf.mxu0 }
 0x6ec   :  { %v2200_v52 = vpop.f32.mrf.mxu1  ;;  %v2197_v54 = vadd.f32 %v2196_v49, %v2155_v51 }
 0x6ed   :  { %v2157_v53 = vpop.f32.mrf.mxu0 }
 0x6ee   :  { %v2199_v63 = vadd.f32 %v2198_v39, %v2157_v53  ;;  %v2201_v5 = vpop.f32.mrf.mxu1 }
 0x6ef   :  { %v2159_v55 = vpop.f32.mrf.mxu0 }
 0x6f0   :  { %7102 = vmatprep.subr.msk.mxu0 %vm297_vm6, %v2199_v63 }
 0x6f1   :  { %v2160_v56 = vpop.f32.mrf.mxu0  ;;  %7103 = vmatpush1.msk.msra.mxu0 %vm297_vm6, %v2197_v54 }
 0x6f2   :  { %7104 = vmatmul.mubr.msk.f32.vlgmr.msra.gmra.mxu0 %vm2371_vm5, %v2368_v35 }
 0x6f3   :  { %2547 = vmatprep.mubr.f32.mxu0 %v7998_v11 }
 0x6f6   :  { %7105 = vmatmul.mubr.msk.f32.gmra.mxu0 %vm2371_vm5, %v2370_v50 }
 0x6f7   :  { %2695 = vmatprep.mubr.f32.mxu0 %v7998_v11 }
 0x6ff   :  { %v2278_v37 = vpop.f32.mrf.mxu0 }
 0x701   :  { %v2280_v60 = vpop.f32.mrf.mxu0 }
 0x703   :  { %v2282_v57 = vpop.f32.mrf.mxu0 }
 0x705   :  { %v2283_v58 = vpop.f32.mrf.mxu0 }
 0x728   :  { %v2237_v59 = vpop.f32.mrf.mxu1 }
 0x729   :  { %v2279_v17 = vadd.f32 %v2278_v37, %v2237_v59 }
 0x72a   :  { %v2239_v16 = vpop.f32.mrf.mxu1 }
 0x72b   :  { %v2281_v15 = vadd.f32 %v2280_v60, %v2239_v16 }
 0x72c   :  { %v2241_v62 = vpop.f32.mrf.mxu1 }
 0x72d   :  { %7106 = vmatprep.subr.msk.mxu1 %vm297_vm6, %v2281_v15 }
 0x72e   :  { %v2242_v3 = vpop.f32.mrf.mxu1  ;;  %7107 = vmatpush1.msk.msra.mxu1 %vm297_vm6, %v2279_v17 }
 0x72f   :  { %7108 = vmatmul.mubr.msk.f32.vlgmr.msra.gmra.mxu1 %vm2371_vm5, %v2368_v35 }
 0x730   :  { %2624 = vmatprep.mubr.f32.mxu1 %v7998_v11 }
 0x733   :  { %7109 = vmatmul.mubr.msk.f32.gmra.mxu1 %vm2371_vm5, %v2370_v50 }
 0x73c   :  { %v2360_v6 = vpop.f32.mrf.mxu1 }
 0x73e   :  { %v2362_v7 = vpop.f32.mrf.mxu1 }
 0x73f   :  { %v2319_v8 = vpop.f32.mrf.mxu0 }
 0x740   :  { %v2364_v2 = vpop.f32.mrf.mxu1  ;;  %v2361_v14 = vadd.f32 %v2360_v6, %v2319_v8 }
 0x741   :  { %v2321_v10 = vpop.f32.mrf.mxu0 }
 0x742   :  { %v2363_v13 = vadd.f32 %v2362_v7, %v2321_v10  ;;  %v2365_v12 = vpop.f32.mrf.mxu1 }
 0x743   :  { %v2323_v18 = vpop.f32.mrf.mxu0 }
 0x744   :  { %7110 = vmatprep.subr.msk.mxu0 %vm297_vm6, %v2363_v13 }
 0x745   :  { %v2324_v22 = vpop.f32.mrf.mxu0  ;;  %7111 = vmatpush1.msk.msra.mxu0 %vm297_vm6, %v2361_v14 }
 0x746   :  { %7112 = vmatmul.mubr.msk.f32.vlgmr.msra.gmra.mxu0 %vm2371_vm5, %v2368_v35 }
 0x747   :  { %2701 = vmatprep.mubr.f32.mxu0 %v7998_v11 }
 0x74a   :  { %7113 = vmatmul.mubr.msk.f32.gmra.mxu0 %vm2371_vm5, %v2370_v50 }
 0x79b   :  { %v8286_v25 = vpop.f32.mrf.mxu1 }
 0x79c   :  { %v2716_v26 = vrot.slane %v8286_v25, 2 }
 0x79d   :  { %v8289_v27 = vpop.f32.mrf.mxu1 }
 0x79e   :  { %2724 = vrot.lane.b32.xlu1 %v2716_v26, %s8002_s3  ;;  %v2717_v61 = vrot.slane %v8289_v27, 2 }
 0x79f   :  { %v8293_v28 = vpop.f32.mrf.mxu1 }
 0x7a0   :  { %v2771_v29 = vrot.slane %v8293_v28, 2  ;;  %v2873_v1 = vrot.slane %v8293_v28, 4 }
 0x7a1   :  { %v8296_v30 = vpop.f32.mrf.mxu1 }
 0x7a2   :  { %2726 = vrot.lane.b32.xlu1 %v2717_v61, %s8002_s3  ;;  %2779 = vrot.lane.b32.xlu0 %v2771_v29, %s8002_s3  ;;  %v2772_v11 = vrot.slane %v8296_v30, 2  ;;  %v2874_v31 = vrot.slane %v8296_v30, 4 }
 0x7a6   :  { %2781 = vrot.lane.b32.xlu1 %v2772_v11, %s8002_s3  ;;  %2881 = vrot.lane.b32.xlu0 %v2873_v1, %s8003_s23 }
 0x7aa   :  { %2883 = vrot.lane.b32.xlu1 %v2874_v31, %s8003_s23 }
 0x7b2   :  { %v8306_v32 = vpop.f32.mrf.mxu0 }
 0x7b3   :  { %v2718_v33 = vrot.slane %v8306_v32, 2 }
 0x7b4   :  { %v8309_v34 = vpop.f32.mrf.mxu0 }
 0x7b5   :  { %2728 = vrot.lane.b32.xlu0 %v2718_v33, %s8002_s3  ;;  %v2719_v36 = vrot.slane %v8309_v34, 2 }
 0x7b6   :  { %v8313_v38 = vpop.f32.mrf.mxu0 }
 0x7b7   :  { %2730 = vrot.lane.b32.xlu1 %v2719_v36, %s8002_s3  ;;  %v2773_v40 = vrot.slane %v8313_v38, 2  ;;  %v2875_v43 = vrot.slane %v8313_v38, 4 }
 0x7b8   :  { %v8317_v41 = vpop.f32.mrf.mxu0 }
 0x7b9   :  { %2783 = vrot.lane.b32.xlu0 %v2773_v40, %s8002_s3  ;;  %v2774_v42 = vrot.slane %v8317_v41, 2  ;;  %v2876_v44 = vrot.slane %v8317_v41, 4 }
 0x7bb   :  { %2785 = vrot.lane.b32.xlu1 %v2774_v42, %s8002_s3 }
 0x7bd   :  { %2885 = vrot.lane.b32.xlu0 %v2875_v43, %s8003_s23 }
 0x7bf   :  { %2887 = vrot.lane.b32.xlu1 %v2876_v44, %s8003_s23 }
 0x7ef   :  { %v8326_v45 = vpop.f32.mrf.mxu1 }
 0x7f0   :  { %v2720_v46 = vrot.slane %v8326_v45, 2 }
 0x7f1   :  { %v8329_v4 = vpop.f32.mrf.mxu1 }
 0x7f2   :  { %2732 = vrot.lane.b32.xlu0 %v2720_v46, %s8002_s3  ;;  %v2721_v47 = vrot.slane %v8329_v4, 2 }
 0x7f3   :  { %v8333_v48 = vpop.f32.mrf.mxu1 }
 0x7f4   :  { %2734 = vrot.lane.b32.xlu1 %v2721_v47, %s8002_s3  ;;  %v2775_v35 = vrot.slane %v8333_v48, 2  ;;  %v2877_v49 = vrot.slane %v8333_v48, 4 }
 0x7f5   :  { %v8337_v9 = vpop.f32.mrf.mxu1 }
 0x7f6   :  { %2787 = vrot.lane.b32.xlu0 %v2775_v35, %s8002_s3  ;;  %v2776_v50 = vrot.slane %v8337_v9, 2  ;;  %v2878_v39 = vrot.slane %v8337_v9, 4 }
 0x7f8   :  { %2789 = vrot.lane.b32.xlu1 %v2776_v50, %s8002_s3 }
 0x7fa   :  { %2889 = vrot.lane.b32.xlu0 %v2877_v49, %s8003_s23 }
 0x7fc   :  { %2891 = vrot.lane.b32.xlu1 %v2878_v39, %s8003_s23 }
 0x806   :  { %v8346_v51 = vpop.f32.mrf.mxu0 }
 0x807   :  { %v2722_v52 = vrot.slane %v8346_v51, 2 }
 0x808   :  { %v8349_v53 = vpop.f32.mrf.mxu0 }
 0x809   :  { %2736 = vrot.lane.b32.xlu0 %v2722_v52, %s8002_s3  ;;  %v2723_v63 = vrot.slane %v8349_v53, 2 }
 0x80a   :  { %v8353_v5 = vpop.f32.mrf.mxu0 }
 0x80b   :  { %2738 = vrot.lane.b32.xlu1 %v2723_v63, %s8002_s3  ;;  %v2777_v54 = vrot.slane %v8353_v5, 2  ;;  %v2879_v37 = vrot.slane %v8353_v5, 4 }
 0x80c   :  { %v8357_v55 = vpop.f32.mrf.mxu0 }
 0x80d   :  { %2791 = vrot.lane.b32.xlu0 %v2777_v54, %s8002_s3  ;;  %v2778_v56 = vrot.slane %v8357_v55, 2  ;;  %v2880_v57 = vrot.slane %v8357_v55, 4 }
 0x80f   :  { %2793 = vrot.lane.b32.xlu1 %v2778_v56, %s8002_s3 }
 0x810   :  { %v2725_v60 = vpop.permute.xlu1 %2724 }
 0x811   :  { %2893 = vrot.lane.b32.xlu0 %v2879_v37, %s8003_s23 }
 0x813   :  { %2895 = vrot.lane.b32.xlu1 %v2880_v57, %s8003_s23 }
 0x814   :  { %v2727_v58 = vpop.permute.xlu1 %2726  ;;  %v2780_v59 = vpop.permute.xlu0 %2779 }
 0x815   :  { %v2740_v16 = vsel %vm896_vm13, %v2725_v60, %v2727_v58  ;;  %2969 = vperm.xlu0 %7792, %v8104_v21  }
 0x816   :  { %v8369_v15 = vadd.f32 %v2740_v16, %v8286_v25 }
 0x818   :  { %v2782_v17 = vpop.permute.xlu1 %2781  ;;  %v2826_v62 = vrot.slane %v8369_v15, 4  ;;  %v2882_v6 = vpop.permute.xlu0 %2881 }
 0x819   :  { %v2795_v3 = vsel %vm896_vm13, %v2780_v59, %v2782_v17 }
 0x81a   :  { %2834 = vrot.lane.b32.xlu0 %v2826_v62, %s8003_s23  ;;  %v2810_v7 = vadd.f32 %v2795_v3, %v8293_v28 }
 0x81c   :  { %v2884_v8 = vpop.permute.xlu1 %2883 }
 0x81d   :  { %v2897_v2 = vsel %vm949_vm14, %v2882_v6, %v2884_v8 }
 0x81e   :  { %v2912_v10 = vadd.f32 %v2897_v2, %v2810_v7 }
 0x820   :  { %2928 = vrot.lane.b32.xlu1 %v2912_v10, %s8008_s5 }
 0x827   :  { %v2729_v21 = vpop.permute.xlu0 %2728 }
 0x828   :  { %v2741_v13 = vsel %vm896_vm13, %v2727_v58, %v2729_v21 }
 0x829   :  { %v8379_v12 = vadd.f32 %v2741_v13, %v8289_v27  ;;  %v2731_v14 = vpop.permute.xlu1 %2730 }
 0x82a   :  { %v2742_v18 = vsel %vm896_vm13, %v2729_v21, %v2731_v14 }
 0x82b   :  { %v8383_v22 = vadd.f32 %v2742_v18, %v8306_v32  ;;  %v2784_v24 = vpop.permute.xlu0 %2783  ;;  %v2827_v25 = vrot.slane %v8379_v12, 4 }
 0x82c   :  { %v2796_v26 = vsel %vm896_vm13, %v2782_v17, %v2784_v24 }
 0x82d   :  { %v2786_v61 = vpop.permute.xlu1 %2785  ;;  %2836 = vrot.lane.b32.xlu1 %v2827_v25, %s8003_s23  ;;  %v2828_v28 = vrot.slane %v8383_v22, 4  ;;  %v2811_v27 = vadd.f32 %v2796_v26, %v8296_v30 }
 0x82e   :  { %v2797_v29 = vsel %vm896_vm13, %v2784_v24, %v2786_v61 }
 0x82f   :  { %v2886_v11 = vpop.permute.xlu0 %2885  ;;  %2838 = vrot.lane.b32.xlu0 %v2828_v28, %s8003_s23  ;;  %v2812_v31 = vadd.f32 %v2797_v29, %v8313_v38 }
 0x830   :  { %v2898_v1 = vsel %vm949_vm14, %v2884_v8, %v2886_v11 }
 0x831   :  { %v2888_v32 = vpop.permute.xlu1 %2887  ;;  %v2913_v33 = vadd.f32 %v2898_v1, %v2811_v27 }
 0x832   :  { %v2899_v36 = vsel %vm949_vm14, %v2886_v11, %v2888_v32 }
 0x833   :  { %2930 = vrot.lane.b32.xlu1 %v2913_v33, %s8008_s5  ;;  %v2914_v40 = vadd.f32 %v2899_v36, %v2812_v31 }
 0x835   :  { %2932 = vrot.lane.b32.xlu0 %v2914_v40, %s8008_s5 }
 0x864   :  { %v2733_v42 = vpop.permute.xlu0 %2732 }
 0x865   :  { %v2743_v43 = vsel %vm896_vm13, %v2731_v14, %v2733_v42 }
 0x866   :  { %v8399_v30 = vadd.f32 %v2743_v43, %v8309_v34  ;;  %v2735_v44 = vpop.permute.xlu1 %2734 }
 0x867   :  { %v2744_v46 = vsel %vm896_vm13, %v2733_v42, %v2735_v44 }
 0x868   :  { %v8403_v38 = vadd.f32 %v2744_v46, %v8326_v45  ;;  %v2788_v47 = vpop.permute.xlu0 %2787  ;;  %v2829_v35 = vrot.slane %v8399_v30, 4 }
 0x869   :  { %v2798_v50 = vsel %vm896_vm13, %v2786_v61, %v2788_v47 }
 0x86a   :  { %v2790_v49 = vpop.permute.xlu1 %2789  ;;  %2840 = vrot.lane.b32.xlu1 %v2829_v35, %s8003_s23  ;;  %v2830_v39 = vrot.slane %v8403_v38, 4  ;;  %v2813_v34 = vadd.f32 %v2798_v50, %v8317_v41 }
 0x86b   :  { %v2799_v52 = vsel %vm896_vm13, %v2788_v47, %v2790_v49 }
 0x86c   :  { %v2890_v63 = vpop.permute.xlu0 %2889  ;;  %2842 = vrot.lane.b32.xlu0 %v2830_v39, %s8003_s23  ;;  %v2814_v54 = vadd.f32 %v2799_v52, %v8333_v48 }
 0x86d   :  { %v2900_v45 = vsel %vm949_vm14, %v2888_v32, %v2890_v63 }
 0x86e   :  { %v2892_v56 = vpop.permute.xlu1 %2891  ;;  %v2915_v37 = vadd.f32 %v2900_v45, %v2813_v34 }
 0x86f   :  { %v2901_v60 = vsel %vm949_vm14, %v2890_v63, %v2892_v56 }
 0x870   :  { %2934 = vrot.lane.b32.xlu1 %v2915_v37, %s8008_s5  ;;  %v2916_v57 = vadd.f32 %v2901_v60, %v2814_v54 }
 0x872   :  { %2936 = vrot.lane.b32.xlu0 %v2916_v57, %s8008_s5 }
 0x87b   :  { %v2737_v58 = vpop.permute.xlu0 %2736 }
 0x87c   :  { %v2745_v59 = vsel %vm896_vm13, %v2735_v44, %v2737_v58 }
 0x87d   :  { %v8419_v41 = vadd.f32 %v2745_v59, %v8329_v4  ;;  %v2739_v16 = vpop.permute.xlu1 %2738 }
 0x87e   :  { %v2746_v17 = vsel %vm896_vm13, %v2737_v58, %v2739_v16  ;;  %v8426_v62 = vadd.f32 %v2739_v16, %v8349_v53 }
 0x87f   :  { %v8423_v48 = vadd.f32 %v2746_v17, %v8346_v51  ;;  %v2792_v3 = vpop.permute.xlu0 %2791  ;;  %v2831_v6 = vrot.slane %v8419_v41, 4 }
 0x880   :  { %v2800_v4 = vsel %vm896_vm13, %v2790_v49, %v2792_v3  ;;  %v2833_v51 = vrot.slane %v8426_v62, 4 }
 0x881   :  { %2844 = vrot.lane.b32.xlu1 %v2831_v6, %s8003_s23  ;;  %v2794_v7 = vpop.permute.xlu1 %2793  ;;  %v2832_v8 = vrot.slane %v8423_v48, 4  ;;  %v2815_v21 = vadd.f32 %v2800_v4, %v8337_v9 }
 0x882   :  { %v2801_v2 = vsel %vm896_vm13, %v2792_v3, %v2794_v7  ;;  %v2817_v26 = vadd.f32 %v2794_v7, %v8357_v55 }
 0x883   :  { %2846 = vrot.lane.b32.xlu0 %v2832_v8, %s8003_s23  ;;  %v2894_v10 = vpop.permute.xlu0 %2893  ;;  %v2816_v13 = vadd.f32 %v2801_v2, %v8353_v5 }
 0x884   :  { %v2902_v53 = vsel %vm949_vm14, %v2892_v56, %v2894_v10 }
 0x885   :  { %2848 = vrot.lane.b32.xlu1 %v2833_v51, %s8003_s23  ;;  %v2896_v14 = vpop.permute.xlu1 %2895  ;;  %v2917_v24 = vadd.f32 %v2902_v53, %v2815_v21 }
 0x886   :  { %v2903_v18 = vsel %vm949_vm14, %v2894_v10, %v2896_v14  ;;  %v2919_v61 = vadd.f32 %v2896_v14, %v2817_v26 }
 0x887   :  { %v2918_v25 = vadd.f32 %v2903_v18, %v2816_v13 }
 0x889   :  { %2938 = vrot.lane.b32.xlu1 %v2917_v24, %s8008_s5  ;;  %2940 = vrot.lane.b32.xlu0 %v2918_v25, %s8008_s5 }
 0x88d   :  { %2942 = vrot.lane.b32.xlu1 %v2919_v61, %s8008_s5 }
 0x890   :  { %v8444_v28 = vpop.permute.xlu0 %2969 }
 0x892   :  { %v2929_v9 = vpop.permute.xlu1 %2928 }
 0x894   :  { %v2835_v5 = vpop.permute.xlu0 %2834 }
 0x89f   :  { %v2837_v29 = vpop.permute.xlu1 %2836 }
 0x8a0   :  { %v2850_v11 = vsel %vm949_vm14, %v2835_v5, %v2837_v29 }
 0x8a1   :  { %v2839_v27 = vpop.permute.xlu0 %2838  ;;  %v2865_v31 = vadd.f32 %v2850_v11, %v8369_v15 }
 0x8a2   :  { %v2851_v1 = vsel %vm949_vm14, %v2837_v29, %v2839_v27 }
 0x8a3   :  { %v2866_v33 = vadd.f32 %v2851_v1, %v8379_v12 }
 0x8a5   :  { %v2931_v55 = vpop.permute.xlu1 %2930 }
 0x8a6   :  { %v2944_v32 = vsel %vm967_vm15, %v2929_v9, %v2931_v55 }
 0x8a7   :  { %v2959_v36 = vadd.f32 %v2944_v32, %v2865_v31  ;;  %v2933_v40 = vpop.permute.xlu0 %2932 }
 0x8a8   :  { %v2945_v42 = vsel %vm967_vm15, %v2931_v55, %v2933_v40 }
 0x8a9   :  { %v2972_v43 = vadd.f32 %v8444_v28, %v2959_v36  ;;  %v2960_v44 = vadd.f32 %v2945_v42, %v2866_v33 }
 0x8ab   :  { %v2988_v46 = vmin.f32 %v2972_v43, 0.0  ;;  %v2973_v47 = vadd.f32 %v8444_v28, %v2960_v44  ;;  %vm2980_vm6 = vcmp.gt.f32.partialorder %v2972_v43, 0.0 }
 0x8ad   :  { %v2996_v35 = vmul.f32 1.442695, %v2988_v46  ;;  %v2989_v50 = vmin.f32 %v2973_v47, 0.0  ;;  %vm2981_vm8 = vcmp.gt.f32.partialorder %v2973_v47, 0.0 }
 0x8af   :  { %7793 = vpow2.f32 %v2996_v35  ;;  %v2998_v49 = vmul.f32 1.442695, %v2989_v50 }
 0x8b1   :  { %7795 = vpow2.f32 %v2998_v49 }
 0x8bc   :  { %v7794_v15 = vpop.eup %7793 }
 0x8bd   :  { %v7114_v39 = vadd.f32 -1.0, %v7794_v15 }
 0x8be   :  { %v7796_v52 = vpop.eup %7795 }
 0x8bf   :  { %v3020_v12 = vsel %vm2980_vm6, %v2972_v43, %v7114_v39  ;;  %v7115_v34 = vadd.f32 -1.0, %v7796_v52 }
 0x8c0   :  { %v8454_v63 = vpack.c.bf16 %v3020_v12, %v3020_v12 }
 0x8c1   :  { %v3021_v45 = vsel %vm2981_vm8, %v2973_v47, %v7115_v34 }
 0x8c2   :  { %v8456_v54 = vpack.c.bf16 %v3021_v45, %v3021_v45 }
 0x8dc   :  { %v2841_v56 = vpop.permute.xlu1 %2840 }
 0x8dd   :  { %v2852_v60 = vsel %vm949_vm14, %v2839_v27, %v2841_v56 }
 0x8de   :  { %v2843_v37 = vpop.permute.xlu0 %2842  ;;  %v2867_v58 = vadd.f32 %v2852_v60, %v8383_v22 }
 0x8df   :  { %v2853_v57 = vsel %vm949_vm14, %v2841_v56, %v2843_v37 }
 0x8e0   :  { %v2868_v17 = vadd.f32 %v2853_v57, %v8399_v30 }
 0x8e2   :  { %v2935_v59 = vpop.permute.xlu1 %2934 }
 0x8e3   :  { %v2946_v16 = vsel %vm967_vm15, %v2933_v40, %v2935_v59 }
 0x8e4   :  { %v2961_v3 = vadd.f32 %v2946_v16, %v2867_v58  ;;  %v2937_v6 = vpop.permute.xlu0 %2936 }
 0x8e5   :  { %v2947_v7 = vsel %vm967_vm15, %v2935_v59, %v2937_v6 }
 0x8e6   :  { %v2974_v8 = vadd.f32 %v8444_v28, %v2961_v3  ;;  %v2962_v4 = vadd.f32 %v2947_v7, %v2868_v17 }
 0x8e8   :  { %v2990_v2 = vmin.f32 %v2974_v8, 0.0  ;;  %v2975_v10 = vadd.f32 %v8444_v28, %v2962_v4  ;;  %vm2982_vm9 = vcmp.gt.f32.partialorder %v2974_v8, 0.0 }
 0x8ea   :  { %v3000_v51 = vmul.f32 1.442695, %v2990_v2  ;;  %v2991_v53 = vmin.f32 %v2975_v10, 0.0  ;;  %vm2983_vm10 = vcmp.gt.f32.partialorder %v2975_v10, 0.0 }
 0x8ec   :  { %7797 = vpow2.f32 %v3000_v51  ;;  %v3002_v21 = vmul.f32 1.442695, %v2991_v53 }
 0x8ee   :  { %7799 = vpow2.f32 %v3002_v21 }
 0x8f3   :  { %v2845_v22 = vpop.permute.xlu1 %2844 }
 0x8f4   :  { %v2854_v30 = vsel %vm949_vm14, %v2843_v37, %v2845_v22 }
 0x8f5   :  { %v2847_v13 = vpop.permute.xlu0 %2846  ;;  %v2869_v61 = vadd.f32 %v2854_v30, %v8403_v38 }
 0x8f6   :  { %v2855_v18 = vsel %vm949_vm14, %v2845_v22, %v2847_v13 }
 0x8f7   :  { %v2849_v14 = vpop.permute.xlu1 %2848  ;;  %v2870_v9 = vadd.f32 %v2855_v18, %v8419_v41 }
 0x8f8   :  { %v2856_v32 = vsel %vm949_vm14, %v2847_v13, %v2849_v14  ;;  %v2872_v42 = vadd.f32 %v2849_v14, %v8426_v62 }
 0x8f9   :  { %v7798_v24 = vpop.eup %7797  ;;  %v2871_v46 = vadd.f32 %v2856_v32, %v8423_v48 }
 0x8fa   :  { %v7116_v25 = vadd.f32 -1.0, %v7798_v24 }
 0x8fb   :  { %v7800_v26 = vpop.eup %7799  ;;  %v2941_v5 = vpop.permute.xlu0 %2940 }
 0x8fc   :  { %v2939_v29 = vpop.permute.xlu1 %2938  ;;  %v3022_v27 = vsel %vm2982_vm9, %v2974_v8, %v7116_v25  ;;  %v7117_v11 = vadd.f32 -1.0, %v7800_v26 }
 0x8fd   :  { %v2948_v1 = vsel %vm967_vm15, %v2937_v6, %v2939_v29  ;;  %v2949_v31 = vsel %vm967_vm15, %v2939_v29, %v2941_v5  ;;  %v8472_v55 = vpack.c.bf16 %v3022_v27, %v3022_v27 }
 0x8fe   :  { %v2963_v33 = vadd.f32 %v2948_v1, %v2869_v61  ;;  %v2964_v36 = vadd.f32 %v2949_v31, %v2870_v9  ;;  %v3023_v40 = vsel %vm2983_vm10, %v2975_v10, %v7117_v11 }
 0x8ff   :  { %v8476_v38 = vpack.c.bf16 %v3023_v40, %v3023_v40 }
 0x900   :  { %v2976_v41 = vadd.f32 %v8444_v28, %v2963_v33  ;;  %v2977_v43 = vadd.f32 %v8444_v28, %v2964_v36  ;;  %v2943_v44 = vpop.permute.xlu1 %2942 }
 0x901   :  { %v2950_v47 = vsel %vm967_vm15, %v2941_v5, %v2943_v44  ;;  %v2966_v35 = vadd.f32 %v2943_v44, %v2872_v42 }
 0x902   :  { %v2992_v50 = vmin.f32 %v2976_v41, 0.0  ;;  %v2993_v49 = vmin.f32 %v2977_v43, 0.0  ;;  %v2965_v15 = vadd.f32 %v2950_v47, %v2871_v46  ;;  %vm2984_vm11 = vcmp.gt.f32.partialorder %v2976_v41, 0.0 }
 0x903   :  { %v2979_v39 = vadd.f32 %v8444_v28, %v2966_v35  ;;  %vm2985_vm12 = vcmp.gt.f32.partialorder %v2977_v43, 0.0 }
 0x904   :  { %v3004_v52 = vmul.f32 1.442695, %v2992_v50  ;;  %v3006_v12 = vmul.f32 1.442695, %v2993_v49  ;;  %v2978_v62 = vadd.f32 %v8444_v28, %v2965_v15 }
 0x905   :  { %v2995_v34 = vmin.f32 %v2979_v39, 0.0  ;;  %vm2987_vm13 = vcmp.gt.f32.partialorder %v2979_v39, 0.0 }
 0x906   :  { %7801 = vpow2.f32 %v3004_v52  ;;  %v2994_v45 = vmin.f32 %v2978_v62, 0.0  ;;  %vm2986_vm14 = vcmp.gt.f32.partialorder %v2978_v62, 0.0 }
 0x907   :  { %7803 = vpow2.f32 %v3006_v12  ;;  %v3010_v56 = vmul.f32 1.442695, %v2995_v34 }
 0x908   :  { %v3008_v37 = vmul.f32 1.442695, %v2994_v45 }
 0x909   :  { %7805 = vpow2.f32 %v3010_v56 }
 0x90a   :  { %7807 = vpow2.f32 %v3008_v37 }
 0x913   :  { %v7802_v48 = vpop.eup %7801 }
 0x914   :  { %v7804_v60 = vpop.eup %7803  ;;  %v7118_v57 = vadd.f32 -1.0, %v7802_v48 }
 0x915   :  { %v7119_v58 = vadd.f32 -1.0, %v7804_v60 }
 0x916   :  { %v7806_v59 = vpop.eup %7805  ;;  %v3024_v16 = vsel %vm2984_vm11, %v2976_v41, %v7118_v57 }
 0x917   :  { %v3025_v17 = vsel %vm2985_vm12, %v2977_v43, %v7119_v58  ;;  %v8484_v3 = vpack.c.bf16 %v3024_v16, %v3024_v16  ;;  %v7121_v28 = vadd.f32 -1.0, %v7806_v59  ;;  %v7808_v6 = vpop.eup %7807 }
 0x918   :  { %v8486_v7 = vpack.c.bf16 %v3025_v17, %v3025_v17  ;;  %v7120_v8 = vadd.f32 -1.0, %v7808_v6 }
 0x919   :  { %v3027_v4 = vsel %vm2987_vm13, %v2979_v39, %v7121_v28 }
 0x91a   :  { %v8488_v2 = vpack.c.bf16 %v3027_v4, %v3027_v4  ;;  %v3026_v10 = vsel %vm2986_vm14, %v2978_v62, %v7120_v8 }
 0x91b   :  { %v8490_v51 = vpack.c.bf16 %v3026_v10, %v3026_v10 }
 0x91c   :  { %7980 = dma.done.wait [#allocation5 + $0x2], 64512 }
 0x91d   :  { %7981 = vsyncadd [#allocation5 + $0x2], 4294902784  ;;  %6161 = vmatprep.mubr.bf16.mxu1 %v8456_v54  ;;  %6202 = vmatprep.mubr.bf16.mxu0 %v8476_v38  ;;  %v3096_v53 = vld [vmem:[#allocation4 + $0x1c0] sm:$0xff]  ;;  %vm6098_vm15 = vcmask 859136   ;;  %vm6102_vm1 = vcmask 1044480   ;;  %vm6832_vm3 = vcmask 1045508  }
 0x91e   :  { %v3100_v21 = vld [vmem:[#allocation4 + $0x1e0] sm:$0xff]  ;;  %vm6834_vm5 = vcmask 859142   ;;  %s8013_s15 = smov [#allocation14]  }
 0x91f   :  { %v3224_v22 = vld [vmem:[#allocation4 + $0x5c0] sm:$0xff]  ;;  %v7179_v13 = vcombine.high %v3096_v53, %v3100_v21  ;;  %v7178_v30 = vcombine.low %v3096_v53, %v3100_v21  ;;  %s6843_s1 = sshll.u32 %s8013_s15, 4  ;;  %s6844_s1 = int_to_ptr.vmem [resolvable:$true] %s6843_s1 }
 0x920   :  { %v3228_v14 = vld [vmem:[#allocation4 + $0x5e0] sm:$0xff]  ;;  %s7950_s16 = scalar_lea.vmem %s6844_s1, 256  ;;  %p7955_p8 = scmp.lt.s32.totalorder %s6844_s1, %s6844_s1 }
 0x921   :  { %v3088_v18 = vld [vmem:[#allocation4 + $0x180] sm:$0xff]  ;;  %v7307_v25 = vcombine.high %v3224_v22, %v3228_v14  ;;  %v7306_v26 = vcombine.low %v3224_v22, %v3228_v14  ;;  %6129 = vmatprep.subr.bf16.mxu1 %v7179_v13  ;;  %p7951_p7 = scmp.ne.s32.totalorder %s6844_s1, %s7950_s16  ;;  %p7956_p9 = scmp.lt.s32.totalorder %s7950_s16, %s7950_s16 }
 0x922   :  { %v3092_v24 = vld [vmem:[#allocation4 + $0x1a0] sm:$0xff]  ;;  %6130 = vmatpush1.bf16.msra.mxu1 %v7178_v30 }
 0x923   :  { %v7171_v61 = vcombine.high %v3088_v18, %v3092_v24  ;;  %v3216_v9 = vld [vmem:[#allocation4 + $0x580] sm:$0xff]  ;;  %6170 = vmatprep.subr.bf16.mxu0 %v7307_v25  ;;  %v7170_v32 = vcombine.low %v3088_v18, %v3092_v24  ;;  %p7957_p10 = por %p7956_p9, %p7955_p8 }
 0x924   :  { %v3220_v5 = vld [vmem:[#allocation4 + $0x5a0] sm:$0xff]  ;;  %6171 = vmatpush1.bf16.msra.mxu0 %v7306_v26 }
 0x925   :  { %v3080_v29 = vld [vmem:[#allocation4 + $0x140] sm:$0xff]  ;;  %v7299_v27 = vcombine.high %v3216_v9, %v3220_v5  ;;  %6131 = vmatprep.subr.bf16.mxu1 %v7171_v61  ;;  %v7298_v33 = vcombine.low %v3216_v9, %v3220_v5  ;;  %p7958_p11 = pnand %p7957_p10, %p7951_p7 }
 0x926   :  { %v3084_v11 = vld [vmem:[#allocation4 + $0x160] sm:$0xff]  ;;  %6132 = vmatpush1.bf16.msra.mxu1 %v7170_v32 }
 0x927   :  { %v3208_v1 = vld [vmem:[#allocation4 + $0x540] sm:$0xff]  ;;  %v7163_v36 = vcombine.high %v3080_v29, %v3084_v11  ;;  %6172 = vmatprep.subr.bf16.mxu0 %v7299_v27  ;;  %v7162_v46 = vcombine.low %v3080_v29, %v3084_v11 }
 0x928   :  { %v3212_v31 = vld [vmem:[#allocation4 + $0x560] sm:$0xff]  ;;  %6173 = vmatpush1.bf16.msra.mxu0 %v7298_v33 }
 0x929   :  { %v7291_v40 = vcombine.high %v3208_v1, %v3212_v31  ;;  %v3072_v42 = vld [vmem:[#allocation4 + $0x100] sm:$0xff]  ;;  %6133 = vmatprep.subr.bf16.mxu1 %v7163_v36  ;;  %v7290_v47 = vcombine.low %v3208_v1, %v3212_v31 }
 0x92a   :  { %v3076_v41 = vld [vmem:[#allocation4 + $0x120] sm:$0xff]  ;;  %6134 = vmatpush1.bf16.msra.mxu1 %v7162_v46 }
 0x92b   :  { %v3200_v43 = vld [vmem:[#allocation4 + $0x500] sm:$0xff]  ;;  %v7155_v35 = vcombine.high %v3072_v42, %v3076_v41  ;;  %6174 = vmatprep.subr.bf16.mxu0 %v7291_v40  ;;  %v7154_v12 = vcombine.low %v3072_v42, %v3076_v41 }
 0x92c   :  { %v3204_v44 = vld [vmem:[#allocation4 + $0x520] sm:$0xff]  ;;  %6175 = vmatpush1.bf16.msra.mxu0 %v7290_v47 }
 0x92d   :  { %v7283_v50 = vcombine.high %v3200_v43, %v3204_v44  ;;  %v3064_v49 = vld [vmem:[#allocation4 + $0xc0] sm:$0xff]  ;;  %6135 = vmatprep.subr.bf16.mxu1 %v7155_v35  ;;  %v7282_v62 = vcombine.low %v3200_v43, %v3204_v44 }
 0x92e   :  { %v3068_v15 = vld [vmem:[#allocation4 + $0xe0] sm:$0xff]  ;;  %6136 = vmatpush1.bf16.msra.mxu1 %v7154_v12 }
 0x92f   :  { %v3192_v39 = vld [vmem:[#allocation4 + $0x4c0] sm:$0xff]  ;;  %v7147_v34 = vcombine.high %v3064_v49, %v3068_v15  ;;  %6176 = vmatprep.subr.bf16.mxu0 %v7283_v50  ;;  %v7146_v57 = vcombine.low %v3064_v49, %v3068_v15 }
 0x930   :  { %v3196_v52 = vld [vmem:[#allocation4 + $0x4e0] sm:$0xff]  ;;  %6177 = vmatpush1.bf16.msra.mxu0 %v7282_v62 }
 0x931   :  { %v7275_v45 = vcombine.high %v3192_v39, %v3196_v52  ;;  %v3056_v56 = vld [vmem:[#allocation4 + $0x80] sm:$0xff]  ;;  %6137 = vmatprep.subr.bf16.mxu1 %v7147_v34  ;;  %v7274_v58 = vcombine.low %v3192_v39, %v3196_v52 }
 0x932   :  { %v3060_v37 = vld [vmem:[#allocation4 + $0xa0] sm:$0xff]  ;;  %6138 = vmatpush1.bf16.msra.mxu1 %v7146_v57 }
 0x933   :  { %v3184_v48 = vld [vmem:[#allocation4 + $0x480] sm:$0xff]  ;;  %v7139_v59 = vcombine.high %v3056_v56, %v3060_v37  ;;  %6178 = vmatprep.subr.bf16.mxu0 %v7275_v45  ;;  %v7138_v4 = vcombine.low %v3056_v56, %v3060_v37 }
 0x934   :  { %v3188_v60 = vld [vmem:[#allocation4 + $0x4a0] sm:$0xff]  ;;  %6179 = vmatpush1.bf16.msra.mxu0 %v7274_v58 }
 0x935   :  { %v7267_v16 = vcombine.high %v3184_v48, %v3188_v60  ;;  %v3048_v17 = vld [vmem:[#allocation4 + $0x40] sm:$0xff]  ;;  %6139 = vmatprep.subr.bf16.mxu1 %v7139_v59  ;;  %v7266_v10 = vcombine.low %v3184_v48, %v3188_v60 }
 0x936   :  { %v3052_v28 = vld [vmem:[#allocation4 + $0x60] sm:$0xff]  ;;  %6140 = vmatpush1.bf16.msra.mxu1 %v7138_v4 }
 0x937   :  { %v3176_v6 = vld [vmem:[#allocation4 + $0x440] sm:$0xff]  ;;  %v7131_v53 = vcombine.high %v3048_v17, %v3052_v28  ;;  %6180 = vmatprep.subr.bf16.mxu0 %v7267_v16  ;;  %v7130_v18 = vcombine.low %v3048_v17, %v3052_v28 }
 0x938   :  { %v3180_v8 = vld [vmem:[#allocation4 + $0x460] sm:$0xff]  ;;  %6181 = vmatpush1.bf16.msra.mxu0 %v7266_v10 }
 0x939   :  { %v7259_v21 = vcombine.high %v3176_v6, %v3180_v8  ;;  %v3040_v22 = vld [vmem:[#allocation4] sm:$0xff]  ;;  %6141 = vmatprep.subr.bf16.mxu1 %v7131_v53  ;;  %v7258_v24 = vcombine.low %v3176_v6, %v3180_v8 }
 0x93a   :  { %v3044_v13 = vld [vmem:[#allocation4 + $0x20] sm:$0xff]  ;;  %6142 = vmatpush1.bf16.msra.mxu1 %v7130_v18 }
 0x93b   :  { %v3168_v14 = vld [vmem:[#allocation4 + $0x400] sm:$0xff]  ;;  %v7123_v25 = vcombine.high %v3040_v22, %v3044_v13  ;;  %6182 = vmatprep.subr.bf16.mxu0 %v7259_v21  ;;  %v7122_v27 = vcombine.low %v3040_v22, %v3044_v13 }
 0x93c   :  { %v3172_v30 = vld [vmem:[#allocation4 + $0x420] sm:$0xff]  ;;  %6183 = vmatpush1.bf16.msra.mxu0 %v7258_v24 }
 0x93d   :  { %v7251_v26 = vcombine.high %v3168_v14, %v3172_v30  ;;  %v3160_v61 = vld [vmem:[#allocation4 + $0x3c0] sm:$0xff]  ;;  %6143 = vmatprep.subr.bf16.mxu1 %v7123_v25  ;;  %v7250_v11 = vcombine.low %v3168_v14, %v3172_v30 }
 0x93e   :  { %v3164_v9 = vld [vmem:[#allocation4 + $0x3e0] sm:$0xff]  ;;  %6144 = vmatpush1.bf16.msra.mxu1 %v7122_v27 }
 0x93f   :  { %v3288_v5 = vld [vmem:[#allocation4 + $0x7c0] sm:$0xff]  ;;  %v7243_v1 = vcombine.high %v3160_v61, %v3164_v9  ;;  %6184 = vmatprep.subr.bf16.mxu0 %v7251_v26  ;;  %v7242_v42 = vcombine.low %v3160_v61, %v3164_v9 }
 0x940   :  { %v3292_v29 = vld [vmem:[#allocation4 + $0x7e0] sm:$0xff]  ;;  %6185 = vmatpush1.bf16.msra.mxu0 %v7250_v11 }
 0x941   :  { %v7371_v31 = vcombine.high %v3288_v5, %v3292_v29  ;;  %v3152_v32 = vld [vmem:[#allocation4 + $0x380] sm:$0xff]  ;;  %6145 = vmatprep.subr.bf16.mxu1 %v7243_v1  ;;  %v7370_v41 = vcombine.low %v3288_v5, %v3292_v29 }
 0x942   :  { %v3156_v33 = vld [vmem:[#allocation4 + $0x3a0] sm:$0xff]  ;;  %6146 = vmatpush2.bf16.msra.mxu1 %v7242_v42 }
 0x943   :  { %v3280_v36 = vld [vmem:[#allocation4 + $0x780] sm:$0xff]  ;;  %v7235_v43 = vcombine.high %v3152_v32, %v3156_v33  ;;  %6186 = vmatprep.subr.bf16.mxu0 %v7371_v31  ;;  %v7234_v49 = vcombine.low %v3152_v32, %v3156_v33 }
 0x944   :  { %v3284_v40 = vld [vmem:[#allocation4 + $0x7a0] sm:$0xff]  ;;  %6187 = vmatpush2.bf16.msra.mxu0 %v7370_v41 }
 0x945   :  { %v7363_v44 = vcombine.high %v3280_v36, %v3284_v40  ;;  %v3144_v46 = vld [vmem:[#allocation4 + $0x340] sm:$0xff]  ;;  %6147 = vmatprep.subr.bf16.mxu1 %v7235_v43  ;;  %v7362_v15 = vcombine.low %v3280_v36, %v3284_v40 }
 0x946   :  { %v3148_v47 = vld [vmem:[#allocation4 + $0x360] sm:$0xff]  ;;  %6148 = vmatpush2.bf16.msra.mxu1 %v7234_v49 }
 0x947   :  { %v3272_v35 = vld [vmem:[#allocation4 + $0x740] sm:$0xff]  ;;  %v7227_v39 = vcombine.high %v3144_v46, %v3148_v47  ;;  %6188 = vmatprep.subr.bf16.mxu0 %v7363_v44  ;;  %v7226_v56 = vcombine.low %v3144_v46, %v3148_v47 }
 0x948   :  { %v3276_v50 = vld [vmem:[#allocation4 + $0x760] sm:$0xff]  ;;  %6189 = vmatpush2.bf16.msra.mxu0 %v7362_v15 }
 0x949   :  { %v7355_v52 = vcombine.high %v3272_v35, %v3276_v50  ;;  %v3136_v12 = vld [vmem:[#allocation4 + $0x300] sm:$0xff]  ;;  %6149 = vmatprep.subr.bf16.mxu1 %v7227_v39  ;;  %v7354_v37 = vcombine.low %v3272_v35, %v3276_v50 }
 0x94a   :  { %v3140_v62 = vld [vmem:[#allocation4 + $0x320] sm:$0xff]  ;;  %6150 = vmatpush2.bf16.msra.mxu1 %v7226_v56 }
 0x94b   :  { %v3264_v34 = vld [vmem:[#allocation4 + $0x700] sm:$0xff]  ;;  %v7219_v48 = vcombine.high %v3136_v12, %v3140_v62  ;;  %6190 = vmatprep.subr.bf16.mxu0 %v7355_v52  ;;  %v7218_v17 = vcombine.low %v3136_v12, %v3140_v62 }
 0x94c   :  { %v3268_v45 = vld [vmem:[#allocation4 + $0x720] sm:$0xff]  ;;  %6191 = vmatpush2.bf16.msra.mxu0 %v7354_v37 }
 0x94d   :  { %v7347_v60 = vcombine.high %v3264_v34, %v3268_v45  ;;  %v3128_v57 = vld [vmem:[#allocation4 + $0x2c0] sm:$0xff]  ;;  %6151 = vmatprep.subr.bf16.mxu1 %v7219_v48  ;;  %v7346_v28 = vcombine.low %v3264_v34, %v3268_v45 }
 0x94e   :  { %v3132_v58 = vld [vmem:[#allocation4 + $0x2e0] sm:$0xff]  ;;  %6152 = vmatpush2.bf16.msra.mxu1 %v7218_v17 }
 0x94f   :  { %v3256_v59 = vld [vmem:[#allocation4 + $0x6c0] sm:$0xff]  ;;  %v7211_v6 = vcombine.high %v3128_v57, %v3132_v58  ;;  %6192 = vmatprep.subr.bf16.mxu0 %v7347_v60  ;;  %v7210_v22 = vcombine.low %v3128_v57, %v3132_v58 }
 0x950   :  { %v3260_v16 = vld [vmem:[#allocation4 + $0x6e0] sm:$0xff]  ;;  %6193 = vmatpush2.bf16.msra.mxu0 %v7346_v28 }
 0x951   :  { %v7339_v8 = vcombine.high %v3256_v59, %v3260_v16  ;;  %v3120_v4 = vld [vmem:[#allocation4 + $0x280] sm:$0xff]  ;;  %6153 = vmatprep.subr.bf16.mxu1 %v7211_v6  ;;  %v7338_v13 = vcombine.low %v3256_v59, %v3260_v16 }
 0x952   :  { %v3124_v10 = vld [vmem:[#allocation4 + $0x2a0] sm:$0xff]  ;;  %6154 = vmatpush2.bf16.msra.mxu1 %v7210_v22 }
 0x953   :  { %v3248_v53 = vld [vmem:[#allocation4 + $0x680] sm:$0xff]  ;;  %v7203_v14 = vcombine.high %v3120_v4, %v3124_v10  ;;  %6194 = vmatprep.subr.bf16.mxu0 %v7339_v8  ;;  %v7202_v61 = vcombine.low %v3120_v4, %v3124_v10 }
 0x954   :  { %v3252_v21 = vld [vmem:[#allocation4 + $0x6a0] sm:$0xff]  ;;  %6195 = vmatpush2.bf16.msra.mxu0 %v7338_v13 }
 0x955   :  { %v7331_v30 = vcombine.high %v3248_v53, %v3252_v21  ;;  %v3112_v18 = vld [vmem:[#allocation4 + $0x240] sm:$0xff]  ;;  %6155 = vmatprep.subr.bf16.mxu1 %v7203_v14  ;;  %v7330_v9 = vcombine.low %v3248_v53, %v3252_v21 }
 0x956   :  { %v3116_v24 = vld [vmem:[#allocation4 + $0x260] sm:$0xff]  ;;  %6156 = vmatpush2.bf16.msra.mxu1 %v7202_v61 }
 0x957   :  { %v3240_v25 = vld [vmem:[#allocation4 + $0x640] sm:$0xff]  ;;  %v7195_v5 = vcombine.high %v3112_v18, %v3116_v24  ;;  %6196 = vmatprep.subr.bf16.mxu0 %v7331_v30  ;;  %v7194_v32 = vcombine.low %v3112_v18, %v3116_v24 }
 0x958   :  { %v3244_v26 = vld [vmem:[#allocation4 + $0x660] sm:$0xff]  ;;  %6197 = vmatpush2.bf16.msra.mxu0 %v7330_v9 }
 0x959   :  { %v7323_v29 = vcombine.high %v3240_v25, %v3244_v26  ;;  %v3104_v27 = vld [vmem:[#allocation4 + $0x200] sm:$0xff]  ;;  %6157 = vmatprep.subr.bf16.mxu1 %v7195_v5  ;;  %v7322_v33 = vcombine.low %v3240_v25, %v3244_v26 }
 0x95a   :  { %v3108_v11 = vld [vmem:[#allocation4 + $0x220] sm:$0xff]  ;;  %6158 = vmatpush2.bf16.msra.mxu1 %v7194_v32 }
 0x95b   :  { %v3232_v1 = vld [vmem:[#allocation4 + $0x600] sm:$0xff]  ;;  %v7187_v36 = vcombine.high %v3104_v27, %v3108_v11  ;;  %6198 = vmatprep.subr.bf16.mxu0 %v7323_v29  ;;  %v7186_v46 = vcombine.low %v3104_v27, %v3108_v11 }
 0x95c   :  { %v3236_v31 = vld [vmem:[#allocation4 + $0x620] sm:$0xff]  ;;  %6199 = vmatpush2.bf16.msra.mxu0 %v7322_v33 }
 0x95d   :  { %v7315_v40 = vcombine.high %v3232_v1, %v3236_v31  ;;  %v3352_v42 = vld [vmem:[#allocation4 + $0x9c0] sm:$0xff]  ;;  %6159 = vmatprep.subr.bf16.mxu1 %v7187_v36  ;;  %v7314_v47 = vcombine.low %v3232_v1, %v3236_v31 }
 0x95e   :  { %v3356_v41 = vld [vmem:[#allocation4 + $0x9e0] sm:$0xff]  ;;  %6160 = vmatpush2.bf16.msra.mxu1 %v7186_v46 }
 0x95f   :  { %v3480_v43 = vld [vmem:[#allocation4 + $0xdc0] sm:$0xff]  ;;  %v7435_v35 = vcombine.high %v3352_v42, %v3356_v41  ;;  %6200 = vmatprep.subr.bf16.mxu0 %v7315_v40  ;;  %v7434_v12 = vcombine.low %v3352_v42, %v3356_v41 }
 0x960   :  { %v3484_v44 = vld [vmem:[#allocation4 + $0xde0] sm:$0xff]  ;;  %6201 = vmatpush2.bf16.msra.mxu0 %v7314_v47 }
 0x961   :  { %v7563_v50 = vcombine.high %v3480_v43, %v3484_v44  ;;  %v3344_v49 = vld [vmem:[#allocation4 + $0x980] sm:$0xff]  ;;  %6211 = vmatprep.subr.bf16.mxu1 %v7435_v35  ;;  %v7562_v62 = vcombine.low %v3480_v43, %v3484_v44  ;;  %6162 = vmatmul.mubr.bf16.vlgmr.msra.gmra.mxu1 %v8454_v63 }
 0x962   :  { %v3348_v15 = vld [vmem:[#allocation4 + $0x9a0] sm:$0xff]  ;;  %6212 = vmatpush1.bf16.msra.mxu1 %v7434_v12  ;;  %6243 = vmatprep.mubr.bf16.mxu1 %v8486_v7 }
 0x963   :  { %v3472_v39 = vld [vmem:[#allocation4 + $0xd80] sm:$0xff]  ;;  %v7427_v34 = vcombine.high %v3344_v49, %v3348_v15  ;;  %6252 = vmatprep.subr.bf16.mxu0 %v7563_v50  ;;  %6203 = vmatmul.mubr.bf16.vlgmr.msra.gmra.mxu0 %v8472_v55  ;;  %v7426_v57 = vcombine.low %v3344_v49, %v3348_v15 }
 0x964   :  { %v3476_v52 = vld [vmem:[#allocation4 + $0xda0] sm:$0xff]  ;;  %6253 = vmatpush1.bf16.msra.mxu0 %v7562_v62  ;;  %7626 = vmatprep.mubr.msk.bf16.mxu0 %vm6098_vm15, %v8488_v2 }
 0x965   :  { %v7555_v45 = vcombine.high %v3472_v39, %v3476_v52  ;;  %v3336_v56 = vld [vmem:[#allocation4 + $0x940] sm:$0xff]  ;;  %6213 = vmatprep.subr.bf16.mxu1 %v7427_v34  ;;  %v7554_v58 = vcombine.low %v3472_v39, %v3476_v52  ;;  %v6103_v52 = vsel %vm400_vm7, 4294967295, %v8009_v0  ;;  %vm6830_vm7 = vcmask 1043458  }
 0x966   :  { %v3340_v37 = vld [vmem:[#allocation4 + $0x960] sm:$0xff]  ;;  %6214 = vmatpush1.bf16.msra.mxu1 %v7426_v57  ;;  %vm6831_vm2 = vmor %vm6830_vm7, %vm232_vm0 }
 0x967   :  { %v3464_v48 = vld [vmem:[#allocation4 + $0xd40] sm:$0xff]  ;;  %v7419_v59 = vcombine.high %v3336_v56, %v3340_v37  ;;  %6254 = vmatprep.subr.bf16.mxu0 %v7555_v45  ;;  %v7418_v4 = vcombine.low %v3336_v56, %v3340_v37  ;;  %vm6833_vm4 = vmor %vm6832_vm3, %vm6831_vm2 }
 0x968   :  { %v3468_v60 = vld [vmem:[#allocation4 + $0xd60] sm:$0xff]  ;;  %6255 = vmatpush1.bf16.msra.mxu0 %v7554_v58  ;;  %vm6835_vm6 = vmor %vm6834_vm5, %vm6833_vm4 }
 0x969   :  { %v7547_v16 = vcombine.high %v3464_v48, %v3468_v60  ;;  %v3328_v17 = vld [vmem:[#allocation4 + $0x900] sm:$0xff]  ;;  %6215 = vmatprep.subr.bf16.mxu1 %v7419_v59  ;;  %v7546_v10 = vcombine.low %v3464_v48, %v3468_v60  ;;  %v8501_v48 = vsel %vm6102_vm1, %v6103_v52, 0 }
 0x96a   :  { %v3332_v28 = vld [vmem:[#allocation4 + $0x920] sm:$0xff]  ;;  %6216 = vmatpush1.bf16.msra.mxu1 %v7418_v4 }
 0x96b   :  { %v3456_v6 = vld [vmem:[#allocation4 + $0xd00] sm:$0xff]  ;;  %v7411_v53 = vcombine.high %v3328_v17, %v3332_v28  ;;  %6256 = vmatprep.subr.bf16.mxu0 %v7547_v16  ;;  %v7410_v18 = vcombine.low %v3328_v17, %v3332_v28 }
 0x96c   :  { %v3460_v8 = vld [vmem:[#allocation4 + $0xd20] sm:$0xff]  ;;  %6257 = vmatpush1.bf16.msra.mxu0 %v7546_v10 }
 0x96d   :  { %v7539_v21 = vcombine.high %v3456_v6, %v3460_v8  ;;  %v3320_v22 = vld [vmem:[#allocation4 + $0x8c0] sm:$0xff]  ;;  %6217 = vmatprep.subr.bf16.mxu1 %v7411_v53  ;;  %v7538_v24 = vcombine.low %v3456_v6, %v3460_v8 }
 0x96e   :  { %v3324_v13 = vld [vmem:[#allocation4 + $0x8e0] sm:$0xff]  ;;  %6218 = vmatpush1.bf16.msra.mxu1 %v7410_v18 }
 0x96f   :  { %v3448_v14 = vld [vmem:[#allocation4 + $0xcc0] sm:$0xff]  ;;  %v7403_v25 = vcombine.high %v3320_v22, %v3324_v13  ;;  %6258 = vmatprep.subr.bf16.mxu0 %v7539_v21  ;;  %v7402_v27 = vcombine.low %v3320_v22, %v3324_v13 }
 0x970   :  { %v3452_v30 = vld [vmem:[#allocation4 + $0xce0] sm:$0xff]  ;;  %6259 = vmatpush1.bf16.msra.mxu0 %v7538_v24 }
 0x971   :  { %v7531_v26 = vcombine.high %v3448_v14, %v3452_v30  ;;  %v3312_v61 = vld [vmem:[#allocation4 + $0x880] sm:$0xff]  ;;  %6219 = vmatprep.subr.bf16.mxu1 %v7403_v25  ;;  %v7530_v11 = vcombine.low %v3448_v14, %v3452_v30 }
 0x972   :  { %v3316_v9 = vld [vmem:[#allocation4 + $0x8a0] sm:$0xff]  ;;  %6220 = vmatpush1.bf16.msra.mxu1 %v7402_v27 }
 0x973   :  { %v3440_v5 = vld [vmem:[#allocation4 + $0xc80] sm:$0xff]  ;;  %v7395_v1 = vcombine.high %v3312_v61, %v3316_v9  ;;  %6260 = vmatprep.subr.bf16.mxu0 %v7531_v26  ;;  %v7394_v42 = vcombine.low %v3312_v61, %v3316_v9 }
 0x974   :  { %v3444_v29 = vld [vmem:[#allocation4 + $0xca0] sm:$0xff]  ;;  %6261 = vmatpush1.bf16.msra.mxu0 %v7530_v11 }
 0x975   :  { %v7523_v31 = vcombine.high %v3440_v5, %v3444_v29  ;;  %v3304_v32 = vld [vmem:[#allocation4 + $0x840] sm:$0xff]  ;;  %6221 = vmatprep.subr.bf16.mxu1 %v7395_v1  ;;  %v7522_v41 = vcombine.low %v3440_v5, %v3444_v29 }
 0x976   :  { %v3308_v33 = vld [vmem:[#allocation4 + $0x860] sm:$0xff]  ;;  %6222 = vmatpush1.bf16.msra.mxu1 %v7394_v42 }
 0x977   :  { %v3432_v36 = vld [vmem:[#allocation4 + $0xc40] sm:$0xff]  ;;  %v7387_v43 = vcombine.high %v3304_v32, %v3308_v33  ;;  %6262 = vmatprep.subr.bf16.mxu0 %v7523_v31  ;;  %v7386_v39 = vcombine.low %v3304_v32, %v3308_v33 }
 0x978   :  { %v3436_v40 = vld [vmem:[#allocation4 + $0xc60] sm:$0xff]  ;;  %6263 = vmatpush1.bf16.msra.mxu0 %v7522_v41 }
 0x979   :  { %v7515_v44 = vcombine.high %v3432_v36, %v3436_v40  ;;  %v3296_v46 = vld [vmem:[#allocation4 + $0x800] sm:$0xff]  ;;  %6223 = vmatprep.subr.bf16.mxu1 %v7387_v43  ;;  %v7514_v12 = vcombine.low %v3432_v36, %v3436_v40 }
 0x97a   :  { %v3300_v47 = vld [vmem:[#allocation4 + $0x820] sm:$0xff]  ;;  %6224 = vmatpush1.bf16.msra.mxu1 %v7386_v39 }
 0x97b   :  { %v3424_v35 = vld [vmem:[#allocation4 + $0xc00] sm:$0xff]  ;;  %v7379_v62 = vcombine.high %v3296_v46, %v3300_v47  ;;  %6264 = vmatprep.subr.bf16.mxu0 %v7515_v44  ;;  %v7378_v60 = vcombine.low %v3296_v46, %v3300_v47 }
 0x97c   :  { %v3428_v50 = vld [vmem:[#allocation4 + $0xc20] sm:$0xff]  ;;  %6265 = vmatpush1.bf16.msra.mxu0 %v7514_v12 }
 0x97d   :  { %v3536_v49 = vld [vmem:[#allocation4 + $0xf80] sm:$0xff]  ;;  %v7507_v34 = vcombine.high %v3424_v35, %v3428_v50  ;;  %6225 = vmatprep.subr.bf16.mxu1 %v7379_v62  ;;  %v7506_v57 = vcombine.low %v3424_v35, %v3428_v50 }
 0x97e   :  { %v3540_v15 = vld [vmem:[#allocation4 + $0xfa0] sm:$0x11]  ;;  %6226 = vmatpush1.bf16.msra.mxu1 %v7378_v60 }
 0x97f   :  { %v3416_v45 = vld [vmem:[#allocation4 + $0xbc0] sm:$0xff]  ;;  %v7619_v37 = vcombine.high %v3536_v49, %v3540_v15  ;;  %v7618_v59 = vcombine.low %v3536_v49, %v3540_v15  ;;  %6266 = vmatprep.subr.bf16.mxu0 %v7507_v34 }
 0x980   :  { %v3420_v56 = vld [vmem:[#allocation4 + $0xbe0] sm:$0xff]  ;;  %6267 = vmatpush1.bf16.msra.mxu0 %v7506_v57 }
 0x981   :  { %v7499_v58 = vcombine.high %v3416_v45, %v3420_v56  ;;  %v6109_v0 = vand.u32 %v7619_v37, %v8501_v48  ;;  %v3408_v16 = vld [vmem:[#allocation4 + $0xb80] sm:$0xff]  ;;  %v7498_v8 = vcombine.low %v3416_v45, %v3420_v56  ;;  %v6106_v4 = vand.u32 %v7618_v59, %v8501_v48  ;;  %v3225_v59 = vld [vmem:[#allocation4 + $0x5c8] sm:$0xff] }
 0x982   :  { %v3412_v17 = vld [vmem:[#allocation4 + $0xba0] sm:$0xff] }
 0x983   :  { %v3528_v28 = vld [vmem:[#allocation4 + $0xf40] sm:$0xff]  ;;  %6227 = vmatprep.subr.bf16.mxu1 %v7499_v58  ;;  %v7491_v10 = vcombine.high %v3408_v16, %v3412_v17  ;;  %6270 = vmatprep.subr.bf16.mxu0 %v6109_v0  ;;  %v7490_v30 = vcombine.low %v3408_v16, %v3412_v17  ;;  %v3229_v0 = vld [vmem:[#allocation4 + $0x5e8] sm:$0xff] }
 0x984   :  { %v3532_v6 = vld [vmem:[#allocation4 + $0xf60] sm:$0xff]  ;;  %6228 = vmatpush2.bf16.msra.mxu1 %v7498_v8  ;;  %6271 = vmatpush2.bf16.msra.mxu0 %v6106_v4  ;;  %v3097_v8 = vld [vmem:[#allocation4 + $0x1c8] sm:$0xff] }
 0x985   :  { %v7611_v53 = vcombine.high %v3528_v28, %v3532_v6  ;;  %v3400_v21 = vld [vmem:[#allocation4 + $0xb40] sm:$0xff]  ;;  %6229 = vmatprep.subr.bf16.mxu1 %v7491_v10  ;;  %v7610_v18 = vcombine.low %v3528_v28, %v3532_v6  ;;  %v7309_v6 = vcombine.high %v3225_v59, %v3229_v0  ;;  %v3101_v4 = vld [vmem:[#allocation4 + $0x1e8] sm:$0xff] }
 0x986   :  { %v3404_v22 = vld [vmem:[#allocation4 + $0xb60] sm:$0xff]  ;;  %v3217_v10 = vld [vmem:[#allocation4 + $0x588] sm:$0xff] }
 0x987   :  { %v3520_v13 = vld [vmem:[#allocation4 + $0xf00] sm:$0xff]  ;;  %v7483_v24 = vcombine.high %v3400_v21, %v3404_v22  ;;  %6272 = vmatprep.subr.bf16.mxu0 %v7611_v53  ;;  %v7482_v29 = vcombine.low %v3400_v21, %v3404_v22  ;;  %v3221_v53 = vld [vmem:[#allocation4 + $0x5a8] sm:$0xff]  ;;  %v7308_v22 = vcombine.low %v3225_v59, %v3229_v0 }
 0x988   :  { %v3524_v14 = vld [vmem:[#allocation4 + $0xf20] sm:$0xff]  ;;  %6230 = vmatpush2.bf16.msra.mxu1 %v7490_v30  ;;  %6273 = vmatpush2.bf16.msra.mxu0 %v7610_v18  ;;  %v3089_v30 = vld [vmem:[#allocation4 + $0x188] sm:$0xff] }
 0x989   :  { %v7603_v25 = vcombine.high %v3520_v13, %v3524_v14  ;;  %v3392_v26 = vld [vmem:[#allocation4 + $0xb00] sm:$0xff]  ;;  %6231 = vmatprep.subr.bf16.mxu1 %v7483_v24  ;;  %v7602_v27 = vcombine.low %v3520_v13, %v3524_v14  ;;  %v7181_v13 = vcombine.high %v3097_v8, %v3101_v4  ;;  %v7301_v14 = vcombine.high %v3217_v10, %v3221_v53  ;;  %v3093_v18 = vld [vmem:[#allocation4 + $0x1a8] sm:$0xff] }
 0x98a   :  { %v3396_v61 = vld [vmem:[#allocation4 + $0xb20] sm:$0xff]  ;;  %v3209_v24 = vld [vmem:[#allocation4 + $0x548] sm:$0xff] }
 0x98b   :  { %v3512_v9 = vld [vmem:[#allocation4 + $0xec0] sm:$0xff]  ;;  %v7475_v11 = vcombine.high %v3392_v26, %v3396_v61  ;;  %6274 = vmatprep.subr.bf16.mxu0 %v7603_v25  ;;  %v7474_v40 = vcombine.low %v3392_v26, %v3396_v61  ;;  %v3213_v25 = vld [vmem:[#allocation4 + $0x568] sm:$0xff]  ;;  %v7180_v26 = vcombine.low %v3097_v8, %v3101_v4  ;;  %v7300_v61 = vcombine.low %v3217_v10, %v3221_v53 }
 0x98c   :  { %v3516_v5 = vld [vmem:[#allocation4 + $0xee0] sm:$0xff]  ;;  %6232 = vmatpush2.bf16.msra.mxu1 %v7482_v29  ;;  %6275 = vmatpush2.bf16.msra.mxu0 %v7602_v27  ;;  %v3081_v29 = vld [vmem:[#allocation4 + $0x148] sm:$0xff] }
 0x98d   :  { %v7595_v1 = vcombine.high %v3512_v9, %v3516_v5  ;;  %v3384_v31 = vld [vmem:[#allocation4 + $0xac0] sm:$0xff]  ;;  %6233 = vmatprep.subr.bf16.mxu1 %v7475_v11  ;;  %v7594_v42 = vcombine.low %v3512_v9, %v3516_v5  ;;  %v7173_v9 = vcombine.high %v3089_v30, %v3093_v18  ;;  %v7293_v5 = vcombine.high %v3209_v24, %v3213_v25  ;;  %v3085_v27 = vld [vmem:[#allocation4 + $0x168] sm:$0xff] }
 0x98e   :  { %v3388_v32 = vld [vmem:[#allocation4 + $0xae0] sm:$0xff]  ;;  %v3201_v11 = vld [vmem:[#allocation4 + $0x508] sm:$0xff] }
 0x98f   :  { %v3504_v33 = vld [vmem:[#allocation4 + $0xe80] sm:$0xff]  ;;  %v7467_v41 = vcombine.high %v3384_v31, %v3388_v32  ;;  %6276 = vmatprep.subr.bf16.mxu0 %v7595_v1  ;;  %v7466_v50 = vcombine.low %v3384_v31, %v3388_v32  ;;  %v3205_v1 = vld [vmem:[#allocation4 + $0x528] sm:$0xff]  ;;  %v7172_v31 = vcombine.low %v3089_v30, %v3093_v18  ;;  %v7292_v32 = vcombine.low %v3209_v24, %v3213_v25 }
 0x990   :  { %v3508_v36 = vld [vmem:[#allocation4 + $0xea0] sm:$0xff]  ;;  %6234 = vmatpush2.bf16.msra.mxu1 %v7474_v40  ;;  %6277 = vmatpush2.bf16.msra.mxu0 %v7594_v42  ;;  %v3073_v40 = vld [vmem:[#allocation4 + $0x108] sm:$0xff] }
 0x991   :  { %v7587_v43 = vcombine.high %v3504_v33, %v3508_v36  ;;  %v3376_v44 = vld [vmem:[#allocation4 + $0xa80] sm:$0xff]  ;;  %6235 = vmatprep.subr.bf16.mxu1 %v7467_v41  ;;  %v7586_v49 = vcombine.low %v3504_v33, %v3508_v36  ;;  %v7165_v33 = vcombine.high %v3081_v29, %v3085_v27  ;;  %v7285_v36 = vcombine.high %v3201_v11, %v3205_v1  ;;  %v3077_v42 = vld [vmem:[#allocation4 + $0x128] sm:$0xff] }
 0x992   :  { %v3380_v46 = vld [vmem:[#allocation4 + $0xaa0] sm:$0xff]  ;;  %v3193_v41 = vld [vmem:[#allocation4 + $0x4c8] sm:$0xff] }
 0x993   :  { %v3496_v47 = vld [vmem:[#allocation4 + $0xe40] sm:$0xff]  ;;  %v7459_v15 = vcombine.high %v3376_v44, %v3380_v46  ;;  %6278 = vmatprep.subr.bf16.mxu0 %v7587_v43  ;;  %v7458_v45 = vcombine.low %v3376_v44, %v3380_v46  ;;  %v3197_v43 = vld [vmem:[#allocation4 + $0x4e8] sm:$0xff]  ;;  %v7164_v44 = vcombine.low %v3081_v29, %v3085_v27  ;;  %v7284_v46 = vcombine.low %v3201_v11, %v3205_v1 }
 0x994   :  { %v3500_v35 = vld [vmem:[#allocation4 + $0xe60] sm:$0xff]  ;;  %6236 = vmatpush2.bf16.msra.mxu1 %v7466_v50  ;;  %6279 = vmatpush2.bf16.msra.mxu0 %v7586_v49  ;;  %v3065_v50 = vld [vmem:[#allocation4 + $0xc8] sm:$0xff] }
 0x995   :  { %v7579_v39 = vcombine.high %v3496_v47, %v3500_v35  ;;  %v3368_v52 = vld [vmem:[#allocation4 + $0xa40] sm:$0xff]  ;;  %6237 = vmatprep.subr.bf16.mxu1 %v7459_v15  ;;  %v7578_v56 = vcombine.low %v3496_v47, %v3500_v35  ;;  %v7157_v47 = vcombine.high %v3073_v40, %v3077_v42  ;;  %v7277_v35 = vcombine.high %v3193_v41, %v3197_v43  ;;  %v3069_v49 = vld [vmem:[#allocation4 + $0xe8] sm:$0xff] }
 0x996   :  { %v3372_v12 = vld [vmem:[#allocation4 + $0xa60] sm:$0xff]  ;;  %v3185_v15 = vld [vmem:[#allocation4 + $0x488] sm:$0xff] }
 0x997   :  { %v3488_v62 = vld [vmem:[#allocation4 + $0xe00] sm:$0xff]  ;;  %v7451_v37 = vcombine.high %v3368_v52, %v3372_v12  ;;  %6280 = vmatprep.subr.bf16.mxu0 %v7579_v39  ;;  %v7450_v16 = vcombine.low %v3368_v52, %v3372_v12  ;;  %v3189_v39 = vld [vmem:[#allocation4 + $0x4a8] sm:$0xff]  ;;  %v7156_v52 = vcombine.low %v3073_v40, %v3077_v42  ;;  %v7276_v12 = vcombine.low %v3193_v41, %v3197_v43 }
 0x998   :  { %v3492_v34 = vld [vmem:[#allocation4 + $0xe20] sm:$0xff]  ;;  %6238 = vmatpush2.bf16.msra.mxu1 %v7458_v45  ;;  %6281 = vmatpush2.bf16.msra.mxu0 %v7578_v56  ;;  %v3057_v45 = vld [vmem:[#allocation4 + $0x88] sm:$0xff] }
 0x999   :  { %v7571_v60 = vcombine.high %v3488_v62, %v3492_v34  ;;  %v3360_v57 = vld [vmem:[#allocation4 + $0xa00] sm:$0xff]  ;;  %6239 = vmatprep.subr.bf16.mxu1 %v7451_v37  ;;  %v7570_v17 = vcombine.low %v3488_v62, %v3492_v34  ;;  %v7149_v62 = vcombine.high %v3065_v50, %v3069_v49  ;;  %v7269_v34 = vcombine.high %v3185_v15, %v3189_v39  ;;  %v3061_v56 = vld [vmem:[#allocation4 + $0xa8] sm:$0xff] }
 0x99a   :  { %v3364_v58 = vld [vmem:[#allocation4 + $0xa20] sm:$0xff]  ;;  %v3177_v37 = vld [vmem:[#allocation4 + $0x448] sm:$0xff]  ;;  %v7141_v59 = vcombine.high %v3057_v45, %v3061_v56  ;;  %v7140_v8 = vcombine.low %v3057_v45, %v3061_v56 }
 0x99b   :  { %v7443_v28 = vcombine.high %v3360_v57, %v3364_v58  ;;  %6282 = vmatprep.subr.bf16.mxu0 %v7571_v60  ;;  %v7442_v21 = vcombine.low %v3360_v57, %v3364_v58  ;;  %v3181_v60 = vld [vmem:[#allocation4 + $0x468] sm:$0xff]  ;;  %v7148_v57 = vcombine.low %v3065_v50, %v3069_v49  ;;  %v7268_v58 = vcombine.low %v3185_v15, %v3189_v39 }
 0x99c   :  { %6240 = vmatpush2.bf16.msra.mxu1 %v7450_v16  ;;  %6283 = vmatpush2.bf16.msra.mxu0 %v7570_v17  ;;  %v7261_v0 = vcombine.high %v3177_v37, %v3181_v60  ;;  %v3049_v16 = vld [vmem:[#allocation4 + $0x48] sm:$0xff]  ;;  %v7260_v4 = vcombine.low %v3177_v37, %v3181_v60 }
 0x99d   :  { %6241 = vmatprep.subr.bf16.mxu1 %v7443_v28  ;;  %6334 = vmatprep.subr.bf16.mxu0 %v7309_v6  ;;  %v3053_v17 = vld [vmem:[#allocation4 + $0x68] sm:$0xff] }
 0x99e   :  { %v3169_v28 = vld [vmem:[#allocation4 + $0x408] sm:$0xff]  ;;  %v7133_v10 = vcombine.high %v3049_v16, %v3053_v17  ;;  %v7132_v30 = vcombine.low %v3049_v16, %v3053_v17 }
 0x99f   :  { %6285 = vmatmul.mubr.bf16.vlgmr.msra.gmra.mxu0 %v8490_v51  ;;  %v3173_v6 = vld [vmem:[#allocation4 + $0x428] sm:$0xff] }
 0x9a0   :  { %6242 = vmatpush2.bf16.msra.mxu1 %v7442_v21  ;;  %6335 = vmatpush1.bf16.msra.mxu0 %v7308_v22  ;;  %v7253_v53 = vcombine.high %v3169_v28, %v3173_v6  ;;  %v3041_v21 = vld [vmem:[#allocation4 + $0x8] sm:$0xff]  ;;  %v7252_v18 = vcombine.low %v3169_v28, %v3173_v6 }
 0x9a1   :  { %6293 = vmatprep.subr.bf16.mxu1 %v7181_v13  ;;  %6336 = vmatprep.subr.bf16.mxu0 %v7301_v14  ;;  %v3045_v22 = vld [vmem:[#allocation4 + $0x28] sm:$0xff] }
 0x9a2   :  { %6366 = vmatprep.mubr.bf16.mxu0 %v8476_v38  ;;  %v3289_v13 = vld [vmem:[#allocation4 + $0x7c8] sm:$0xff]  ;;  %v7125_v24 = vcombine.high %v3041_v21, %v3045_v22  ;;  %v7124_v29 = vcombine.low %v3041_v21, %v3045_v22 }
 0x9a3   :  { %6244 = vmatmul.mubr.bf16.vlgmr.msra.gmra.mxu1 %v8484_v3  ;;  %v3293_v14 = vld [vmem:[#allocation4 + $0x7e8] sm:$0xff] }
 0x9a4   :  { %6294 = vmatpush1.bf16.msra.mxu1 %v7180_v26  ;;  %6325 = vmatprep.mubr.bf16.mxu1 %v8456_v54  ;;  %v7373_v25 = vcombine.high %v3289_v13, %v3293_v14  ;;  %v3161_v26 = vld [vmem:[#allocation4 + $0x3c8] sm:$0xff]  ;;  %v7372_v27 = vcombine.low %v3289_v13, %v3293_v14 }
 0x9a5   :  { %6337 = vmatpush1.bf16.msra.mxu0 %v7300_v61  ;;  %6295 = vmatprep.subr.bf16.mxu1 %v7173_v9  ;;  %v3165_v61 = vld [vmem:[#allocation4 + $0x3e8] sm:$0xff] }
 0x9a6   :  { %6338 = vmatprep.subr.bf16.mxu0 %v7293_v5  ;;  %v3281_v9 = vld [vmem:[#allocation4 + $0x788] sm:$0xff]  ;;  %v7245_v11 = vcombine.high %v3161_v26, %v3165_v61  ;;  %v7244_v40 = vcombine.low %v3161_v26, %v3165_v61 }
 0x9a7   :  { %v3285_v5 = vld [vmem:[#allocation4 + $0x7a8] sm:$0xff] }
 0x9a8   :  { %6296 = vmatpush1.bf16.msra.mxu1 %v7172_v31  ;;  %v7365_v1 = vcombine.high %v3281_v9, %v3285_v5  ;;  %v3153_v31 = vld [vmem:[#allocation4 + $0x388] sm:$0xff]  ;;  %v7364_v42 = vcombine.low %v3281_v9, %v3285_v5 }
 0x9a9   :  { %6339 = vmatpush1.bf16.msra.mxu0 %v7292_v32  ;;  %6297 = vmatprep.subr.bf16.mxu1 %v7165_v33  ;;  %v3157_v32 = vld [vmem:[#allocation4 + $0x3a8] sm:$0xff] }
 0x9aa   :  { %6340 = vmatprep.subr.bf16.mxu0 %v7285_v36  ;;  %v3273_v33 = vld [vmem:[#allocation4 + $0x748] sm:$0xff]  ;;  %v7237_v41 = vcombine.high %v3153_v31, %v3157_v32  ;;  %v7236_v50 = vcombine.low %v3153_v31, %v3157_v32 }
 0x9ab   :  { %v3277_v36 = vld [vmem:[#allocation4 + $0x768] sm:$0xff] }
 0x9ac   :  { %6298 = vmatpush1.bf16.msra.mxu1 %v7164_v44  ;;  %v7357_v43 = vcombine.high %v3273_v33, %v3277_v36  ;;  %v3145_v44 = vld [vmem:[#allocation4 + $0x348] sm:$0xff]  ;;  %v7356_v49 = vcombine.low %v3273_v33, %v3277_v36 }
 0x9ad   :  { %6341 = vmatpush1.bf16.msra.mxu0 %v7284_v46  ;;  %6299 = vmatprep.subr.bf16.mxu1 %v7157_v47  ;;  %v3149_v46 = vld [vmem:[#allocation4 + $0x368] sm:$0xff] }
 0x9ae   :  { %6342 = vmatprep.subr.bf16.mxu0 %v7277_v35  ;;  %v3265_v47 = vld [vmem:[#allocation4 + $0x708] sm:$0xff]  ;;  %v7229_v15 = vcombine.high %v3145_v44, %v3149_v46  ;;  %v7228_v45 = vcombine.low %v3145_v44, %v3149_v46 }
 0x9af   :  { %v3269_v35 = vld [vmem:[#allocation4 + $0x728] sm:$0xff] }
 0x9b0   :  { %6300 = vmatpush1.bf16.msra.mxu1 %v7156_v52  ;;  %v7349_v39 = vcombine.high %v3265_v47, %v3269_v35  ;;  %v3137_v52 = vld [vmem:[#allocation4 + $0x308] sm:$0xff]  ;;  %v7348_v56 = vcombine.low %v3265_v47, %v3269_v35 }
 0x9b1   :  { %6343 = vmatpush1.bf16.msra.mxu0 %v7276_v12  ;;  %6301 = vmatprep.subr.bf16.mxu1 %v7149_v62  ;;  %v3141_v12 = vld [vmem:[#allocation4 + $0x328] sm:$0xff] }
 0x9b2   :  { %6344 = vmatprep.subr.bf16.mxu0 %v7269_v34  ;;  %v3257_v62 = vld [vmem:[#allocation4 + $0x6c8] sm:$0xff]  ;;  %v7221_v37 = vcombine.high %v3137_v52, %v3141_v12  ;;  %v7220_v16 = vcombine.low %v3137_v52, %v3141_v12 }
 0x9b3   :  { %v3261_v34 = vld [vmem:[#allocation4 + $0x6e8] sm:$0xff] }
 0x9b4   :  { %6302 = vmatpush1.bf16.msra.mxu1 %v7148_v57  ;;  %v7341_v60 = vcombine.high %v3257_v62, %v3261_v34  ;;  %v3129_v57 = vld [vmem:[#allocation4 + $0x2c8] sm:$0xff]  ;;  %v7340_v17 = vcombine.low %v3257_v62, %v3261_v34 }
 0x9b5   :  { %6345 = vmatpush1.bf16.msra.mxu0 %v7268_v58  ;;  %6303 = vmatprep.subr.bf16.mxu1 %v7141_v59  ;;  %v3133_v58 = vld [vmem:[#allocation4 + $0x2e8] sm:$0xff] }
 0x9b6   :  { %6346 = vmatprep.subr.bf16.mxu0 %v7261_v0  ;;  %v3249_v59 = vld [vmem:[#allocation4 + $0x688] sm:$0xff]  ;;  %v7213_v28 = vcombine.high %v3129_v57, %v3133_v58  ;;  %v7212_v21 = vcombine.low %v3129_v57, %v3133_v58 }
 0x9b7   :  { %v3253_v0 = vld [vmem:[#allocation4 + $0x6a8] sm:$0xff] }
 0x9b8   :  { %6304 = vmatpush1.bf16.msra.mxu1 %v7140_v8  ;;  %v7333_v6 = vcombine.high %v3249_v59, %v3253_v0  ;;  %v3121_v8 = vld [vmem:[#allocation4 + $0x288] sm:$0xff]  ;;  %v7332_v22 = vcombine.low %v3249_v59, %v3253_v0 }
 0x9b9   :  { %6347 = vmatpush1.bf16.msra.mxu0 %v7260_v4  ;;  %6305 = vmatprep.subr.bf16.mxu1 %v7133_v10  ;;  %v3125_v4 = vld [vmem:[#allocation4 + $0x2a8] sm:$0xff] }
 0x9ba   :  { %6348 = vmatprep.subr.bf16.mxu0 %v7253_v53  ;;  %v3241_v10 = vld [vmem:[#allocation4 + $0x648] sm:$0xff]  ;;  %v7205_v13 = vcombine.high %v3121_v8, %v3125_v4  ;;  %v7204_v26 = vcombine.low %v3121_v8, %v3125_v4 }
 0x9bb   :  { %v3245_v53 = vld [vmem:[#allocation4 + $0x668] sm:$0xff] }
 0x9bc   :  { %6306 = vmatpush1.bf16.msra.mxu1 %v7132_v30  ;;  %v7325_v14 = vcombine.high %v3241_v10, %v3245_v53  ;;  %v3113_v30 = vld [vmem:[#allocation4 + $0x248] sm:$0xff]  ;;  %v7324_v61 = vcombine.low %v3241_v10, %v3245_v53 }
 0x9bd   :  { %6349 = vmatpush1.bf16.msra.mxu0 %v7252_v18  ;;  %6307 = vmatprep.subr.bf16.mxu1 %v7125_v24  ;;  %v3117_v18 = vld [vmem:[#allocation4 + $0x268] sm:$0xff] }
 0x9be   :  { %6350 = vmatprep.subr.bf16.mxu0 %v7373_v25  ;;  %v3233_v24 = vld [vmem:[#allocation4 + $0x608] sm:$0xff]  ;;  %v7197_v9 = vcombine.high %v3113_v30, %v3117_v18  ;;  %v7196_v31 = vcombine.low %v3113_v30, %v3117_v18 }
 0x9bf   :  { %v3237_v25 = vld [vmem:[#allocation4 + $0x628] sm:$0xff] }
 0x9c0   :  { %6308 = vmatpush1.bf16.msra.mxu1 %v7124_v29  ;;  %v7317_v5 = vcombine.high %v3233_v24, %v3237_v25  ;;  %v3105_v29 = vld [vmem:[#allocation4 + $0x208] sm:$0xff]  ;;  %v7316_v32 = vcombine.low %v3233_v24, %v3237_v25 }
 0x9c1   :  { %6351 = vmatpush2.bf16.msra.mxu0 %v7372_v27  ;;  %6309 = vmatprep.subr.bf16.mxu1 %v7245_v11  ;;  %v3109_v27 = vld [vmem:[#allocation4 + $0x228] sm:$0xff] }
 0x9c2   :  { %6352 = vmatprep.subr.bf16.mxu0 %v7365_v1  ;;  %v3481_v11 = vld [vmem:[#allocation4 + $0xdc8] sm:$0xff]  ;;  %v7189_v33 = vcombine.high %v3105_v29, %v3109_v27  ;;  %v7188_v44 = vcombine.low %v3105_v29, %v3109_v27 }
 0x9c3   :  { %v3485_v1 = vld [vmem:[#allocation4 + $0xde8] sm:$0xff] }
 0x9c4   :  { %6310 = vmatpush2.bf16.msra.mxu1 %v7244_v40  ;;  %v7565_v36 = vcombine.high %v3481_v11, %v3485_v1  ;;  %v3353_v40 = vld [vmem:[#allocation4 + $0x9c8] sm:$0xff]  ;;  %v7564_v46 = vcombine.low %v3481_v11, %v3485_v1 }
 0x9c5   :  { %6353 = vmatpush2.bf16.msra.mxu0 %v7364_v42  ;;  %6311 = vmatprep.subr.bf16.mxu1 %v7237_v41  ;;  %v3357_v42 = vld [vmem:[#allocation4 + $0x9e8] sm:$0xff] }
 0x9c6   :  { %6354 = vmatprep.subr.bf16.mxu0 %v7357_v43  ;;  %v3473_v41 = vld [vmem:[#allocation4 + $0xd88] sm:$0xff]  ;;  %v7437_v47 = vcombine.high %v3353_v40, %v3357_v42  ;;  %v7436_v52 = vcombine.low %v3353_v40, %v3357_v42 }
 0x9c7   :  { %v3477_v43 = vld [vmem:[#allocation4 + $0xda8] sm:$0xff] }
 0x9c8   :  { %6312 = vmatpush2.bf16.msra.mxu1 %v7236_v50  ;;  %v7557_v35 = vcombine.high %v3473_v41, %v3477_v43  ;;  %v3345_v50 = vld [vmem:[#allocation4 + $0x988] sm:$0xff]  ;;  %v7556_v12 = vcombine.low %v3473_v41, %v3477_v43 }
 0x9c9   :  { %6355 = vmatpush2.bf16.msra.mxu0 %v7356_v49  ;;  %6313 = vmatprep.subr.bf16.mxu1 %v7229_v15  ;;  %v3349_v49 = vld [vmem:[#allocation4 + $0x9a8] sm:$0xff] }
 0x9ca   :  { %6356 = vmatprep.subr.bf16.mxu0 %v7349_v39  ;;  %v3465_v15 = vld [vmem:[#allocation4 + $0xd48] sm:$0xff]  ;;  %v7429_v62 = vcombine.high %v3345_v50, %v3349_v49  ;;  %v7428_v57 = vcombine.low %v3345_v50, %v3349_v49 }
 0x9cb   :  { %v3469_v39 = vld [vmem:[#allocation4 + $0xd68] sm:$0xff] }
 0x9cc   :  { %6314 = vmatpush2.bf16.msra.mxu1 %v7228_v45  ;;  %v7549_v34 = vcombine.high %v3465_v15, %v3469_v39  ;;  %v3337_v45 = vld [vmem:[#allocation4 + $0x948] sm:$0xff]  ;;  %v7548_v58 = vcombine.low %v3465_v15, %v3469_v39 }
 0x9cd   :  { %6357 = vmatpush2.bf16.msra.mxu0 %v7348_v56  ;;  %6315 = vmatprep.subr.bf16.mxu1 %v7221_v37  ;;  %v3341_v56 = vld [vmem:[#allocation4 + $0x968] sm:$0xff] }
 0x9ce   :  { %6358 = vmatprep.subr.bf16.mxu0 %v7341_v60  ;;  %v3457_v37 = vld [vmem:[#allocation4 + $0xd08] sm:$0xff]  ;;  %v7421_v59 = vcombine.high %v3337_v45, %v3341_v56  ;;  %v7420_v8 = vcombine.low %v3337_v45, %v3341_v56 }
 0x9cf   :  { %v3461_v60 = vld [vmem:[#allocation4 + $0xd28] sm:$0xff] }
 0x9d0   :  { %6316 = vmatpush2.bf16.msra.mxu1 %v7220_v16  ;;  %v7541_v0 = vcombine.high %v3457_v37, %v3461_v60  ;;  %v3329_v16 = vld [vmem:[#allocation4 + $0x908] sm:$0xff]  ;;  %v7540_v4 = vcombine.low %v3457_v37, %v3461_v60 }
 0x9d1   :  { %6359 = vmatpush2.bf16.msra.mxu0 %v7340_v17  ;;  %6317 = vmatprep.subr.bf16.mxu1 %v7213_v28  ;;  %v3333_v17 = vld [vmem:[#allocation4 + $0x928] sm:$0xff] }
 0x9d2   :  { %6360 = vmatprep.subr.bf16.mxu0 %v7333_v6  ;;  %v3449_v28 = vld [vmem:[#allocation4 + $0xcc8] sm:$0xff]  ;;  %v7413_v10 = vcombine.high %v3329_v16, %v3333_v17  ;;  %v7412_v30 = vcombine.low %v3329_v16, %v3333_v17 }
 0x9d3   :  { %v3453_v6 = vld [vmem:[#allocation4 + $0xce8] sm:$0xff] }
 0x9d4   :  { %6318 = vmatpush2.bf16.msra.mxu1 %v7212_v21  ;;  %v7533_v53 = vcombine.high %v3449_v28, %v3453_v6  ;;  %v3321_v21 = vld [vmem:[#allocation4 + $0x8c8] sm:$0xff]  ;;  %v7532_v18 = vcombine.low %v3449_v28, %v3453_v6 }
 0x9d5   :  { %6361 = vmatpush2.bf16.msra.mxu0 %v7332_v22  ;;  %6319 = vmatprep.subr.bf16.mxu1 %v7205_v13  ;;  %v3325_v22 = vld [vmem:[#allocation4 + $0x8e8] sm:$0xff] }
 0x9d6   :  { %6362 = vmatprep.subr.bf16.mxu0 %v7325_v14  ;;  %v3441_v13 = vld [vmem:[#allocation4 + $0xc88] sm:$0xff]  ;;  %v7405_v24 = vcombine.high %v3321_v21, %v3325_v22  ;;  %v7404_v29 = vcombine.low %v3321_v21, %v3325_v22 }
 0x9d7   :  { %v3445_v14 = vld [vmem:[#allocation4 + $0xca8] sm:$0xff] }
 0x9d8   :  { %6320 = vmatpush2.bf16.msra.mxu1 %v7204_v26  ;;  %v7525_v25 = vcombine.high %v3441_v13, %v3445_v14  ;;  %v3313_v26 = vld [vmem:[#allocation4 + $0x888] sm:$0xff]  ;;  %v7524_v27 = vcombine.low %v3441_v13, %v3445_v14 }
 0x9d9   :  { %6363 = vmatpush2.bf16.msra.mxu0 %v7324_v61  ;;  %6321 = vmatprep.subr.bf16.mxu1 %v7197_v9  ;;  %v3317_v61 = vld [vmem:[#allocation4 + $0x8a8] sm:$0xff] }
 0x9da   :  { %6364 = vmatprep.subr.bf16.mxu0 %v7317_v5  ;;  %v3433_v9 = vld [vmem:[#allocation4 + $0xc48] sm:$0xff]  ;;  %v7397_v11 = vcombine.high %v3313_v26, %v3317_v61  ;;  %v7396_v41 = vcombine.low %v3313_v26, %v3317_v61 }
 0x9db   :  { %v3437_v5 = vld [vmem:[#allocation4 + $0xc68] sm:$0xff] }
 0x9dc   :  { %6322 = vmatpush2.bf16.msra.mxu1 %v7196_v31  ;;  %v7517_v1 = vcombine.high %v3433_v9, %v3437_v5  ;;  %v3305_v31 = vld [vmem:[#allocation4 + $0x848] sm:$0xff]  ;;  %v7516_v43 = vcombine.low %v3433_v9, %v3437_v5 }
 0x9dd   :  { %6365 = vmatpush2.bf16.msra.mxu0 %v7316_v32  ;;  %6323 = vmatprep.subr.bf16.mxu1 %v7189_v33  ;;  %v3309_v32 = vld [vmem:[#allocation4 + $0x868] sm:$0xff] }
 0x9de   :  { %6416 = vmatprep.subr.bf16.mxu0 %v7565_v36  ;;  %v3425_v33 = vld [vmem:[#allocation4 + $0xc08] sm:$0xff]  ;;  %v7388_v49 = vcombine.low %v3305_v31, %v3309_v32 }
 0x9df   :  { %v3429_v36 = vld [vmem:[#allocation4 + $0xc28] sm:$0xff] }
 0x9e0   :  { %6324 = vmatpush2.bf16.msra.mxu1 %v7188_v44  ;;  %6367 = vmatmul.mubr.bf16.vlgmr.msra.gmra.mxu0 %v8472_v55  ;;  %v3537_v40 = vld [vmem:[#allocation4 + $0xf88] sm:$0xff]  ;;  %v7389_v44 = vcombine.high %v3305_v31, %v3309_v32  ;;  %v7508_v15 = vcombine.low %v3425_v33, %v3429_v36 }
 0x9e1   :  { %6417 = vmatpush1.bf16.msra.mxu0 %v7564_v46  ;;  %6375 = vmatprep.subr.bf16.mxu1 %v7437_v47  ;;  %v3541_v42 = vld [vmem:[#allocation4 + $0xfa8] sm:$0x11]  ;;  %v7509_v46 = vcombine.high %v3425_v33, %v3429_v36 }
 0x9e2   :  { %6418 = vmatprep.subr.bf16.mxu0 %v7557_v35  ;;  %7627 = vmatprep.mubr.msk.bf16.mxu0 %vm6098_vm15, %v8488_v2  ;;  %v3297_v47 = vld [vmem:[#allocation4 + $0x808] sm:$0xff]  ;;  %v7621_v50 = vcombine.high %v3537_v40, %v3541_v42 }
 0x9e3   :  { %6326 = vmatmul.mubr.bf16.vlgmr.msra.gmra.mxu1 %v8454_v63  ;;  %v3301_v35 = vld [vmem:[#allocation4 + $0x828] sm:$0xff] }
 0x9e4   :  { %6376 = vmatpush1.bf16.msra.mxu1 %v7436_v52  ;;  %6407 = vmatprep.mubr.bf16.mxu1 %v8486_v7  ;;  %v7381_v39 = vcombine.high %v3297_v47, %v3301_v35  ;;  %v7620_v52 = vcombine.low %v3537_v40, %v3541_v42  ;;  %v3529_v45 = vld [vmem:[#allocation4 + $0xf48] sm:$0xff]  ;;  %v7380_v37 = vcombine.low %v3297_v47, %v3301_v35 }
 0x9e5   :  { %6419 = vmatpush1.bf16.msra.mxu0 %v7556_v12  ;;  %6377 = vmatprep.subr.bf16.mxu1 %v7429_v62  ;;  %v6115_v12 = vand.u32 %v7621_v50, %v8501_v48  ;;  %v3417_v62 = vld [vmem:[#allocation4 + $0xbc8] sm:$0xff] }
 0x9e6   :  { %6420 = vmatprep.subr.bf16.mxu0 %v7549_v34  ;;  %v3421_v34 = vld [vmem:[#allocation4 + $0xbe8] sm:$0xff]  ;;  %v6112_v60 = vand.u32 %v7620_v52, %v8501_v48  ;;  %v3098_v52 = vld [vmem:[#allocation4 + $0x1d0] sm:$0xff] }
 0x9e7   :  { %v3533_v56 = vld [vmem:[#allocation4 + $0xf68] sm:$0xff]  ;;  %v7500_v28 = vcombine.low %v3417_v62, %v3421_v34 }
 0x9e8   :  { %6378 = vmatpush1.bf16.msra.mxu1 %v7428_v57  ;;  %v7501_v57 = vcombine.high %v3417_v62, %v3421_v34  ;;  %v3521_v16 = vld [vmem:[#allocation4 + $0xf08] sm:$0xff]  ;;  %v7612_v6 = vcombine.low %v3529_v45, %v3533_v56 }
 0x9e9   :  { %6421 = vmatpush1.bf16.msra.mxu0 %v7548_v58  ;;  %6379 = vmatprep.subr.bf16.mxu1 %v7421_v59  ;;  %v7613_v58 = vcombine.high %v3529_v45, %v3533_v56  ;;  %v3409_v59 = vld [vmem:[#allocation4 + $0xb88] sm:$0xff] }
 0x9ea   :  { %6422 = vmatprep.subr.bf16.mxu0 %v7541_v0  ;;  %v3413_v0 = vld [vmem:[#allocation4 + $0xba8] sm:$0xff] }
 0x9eb   :  { %v3525_v17 = vld [vmem:[#allocation4 + $0xf28] sm:$0xff]  ;;  %v7492_v13 = vcombine.low %v3409_v59, %v3413_v0 }
 0x9ec   :  { %6380 = vmatpush1.bf16.msra.mxu1 %v7420_v8  ;;  %v7493_v8 = vcombine.high %v3409_v59, %v3413_v0  ;;  %v3513_v21 = vld [vmem:[#allocation4 + $0xec8] sm:$0xff]  ;;  %v7604_v14 = vcombine.low %v3521_v16, %v3525_v17 }
 0x9ed   :  { %6423 = vmatpush1.bf16.msra.mxu0 %v7540_v4  ;;  %6381 = vmatprep.subr.bf16.mxu1 %v7413_v10  ;;  %v7605_v4 = vcombine.high %v3521_v16, %v3525_v17  ;;  %v3401_v10 = vld [vmem:[#allocation4 + $0xb48] sm:$0xff] }
 0x9ee   :  { %6424 = vmatprep.subr.bf16.mxu0 %v7533_v53  ;;  %v3405_v53 = vld [vmem:[#allocation4 + $0xb68] sm:$0xff] }
 0x9ef   :  { %v3517_v22 = vld [vmem:[#allocation4 + $0xee8] sm:$0xff]  ;;  %v7484_v9 = vcombine.low %v3401_v10, %v3405_v53 }
 0x9f0   :  { %6382 = vmatpush1.bf16.msra.mxu1 %v7412_v30  ;;  %v7485_v30 = vcombine.high %v3401_v10, %v3405_v53  ;;  %v3505_v26 = vld [vmem:[#allocation4 + $0xe88] sm:$0xff]  ;;  %v7596_v5 = vcombine.low %v3513_v21, %v3517_v22 }
 0x9f1   :  { %6425 = vmatpush1.bf16.msra.mxu0 %v7532_v18  ;;  %6383 = vmatprep.subr.bf16.mxu1 %v7405_v24  ;;  %v7597_v18 = vcombine.high %v3513_v21, %v3517_v22  ;;  %v3393_v24 = vld [vmem:[#allocation4 + $0xb08] sm:$0xff] }
 0x9f2   :  { %6426 = vmatprep.subr.bf16.mxu0 %v7525_v25  ;;  %v3397_v25 = vld [vmem:[#allocation4 + $0xb28] sm:$0xff] }
 0x9f3   :  { %v3509_v61 = vld [vmem:[#allocation4 + $0xea8] sm:$0xff]  ;;  %v7476_v33 = vcombine.low %v3393_v24, %v3397_v25 }
 0x9f4   :  { %6384 = vmatpush1.bf16.msra.mxu1 %v7404_v29  ;;  %v7477_v29 = vcombine.high %v3393_v24, %v3397_v25  ;;  %v3497_v31 = vld [vmem:[#allocation4 + $0xe48] sm:$0xff]  ;;  %v7588_v36 = vcombine.low %v3505_v26, %v3509_v61  ;;  %v3078_v24 = vld [vmem:[#allocation4 + $0x130] sm:$0xff] }
 0x9f5   :  { %6427 = vmatpush1.bf16.msra.mxu0 %v7524_v27  ;;  %6385 = vmatprep.subr.bf16.mxu1 %v7397_v11  ;;  %v7589_v27 = vcombine.high %v3505_v26, %v3509_v61  ;;  %v3385_v11 = vld [vmem:[#allocation4 + $0xac8] sm:$0xff] }
 0x9f6   :  { %6428 = vmatprep.subr.bf16.mxu0 %v7517_v1  ;;  %v3389_v1 = vld [vmem:[#allocation4 + $0xae8] sm:$0xff] }
 0x9f7   :  { %v3501_v32 = vld [vmem:[#allocation4 + $0xe68] sm:$0xff]  ;;  %v7469_v40 = vcombine.high %v3385_v11, %v3389_v1  ;;  %v7468_v47 = vcombine.low %v3385_v11, %v3389_v1  ;;  %v3214_v11 = vld [vmem:[#allocation4 + $0x570] sm:$0xff] }
 0x9f8   :  { %6386 = vmatpush1.bf16.msra.mxu1 %v7396_v41  ;;  %v7581_v42 = vcombine.high %v3497_v31, %v3501_v32  ;;  %v3377_v41 = vld [vmem:[#allocation4 + $0xa88] sm:$0xff]  ;;  %v7580_v35 = vcombine.low %v3497_v31, %v3501_v32  ;;  %v3066_v31 = vld [vmem:[#allocation4 + $0xd0] sm:$0xff] }
 0x9f9   :  { %6429 = vmatpush1.bf16.msra.mxu0 %v7516_v43  ;;  %6387 = vmatprep.subr.bf16.mxu1 %v7389_v44  ;;  %v3381_v43 = vld [vmem:[#allocation4 + $0xaa8] sm:$0xff]  ;;  %v3070_v32 = vld [vmem:[#allocation4 + $0xf0] sm:$0xff] }
 0x9fa   :  { %6430 = vmatprep.subr.bf16.mxu0 %v7509_v46  ;;  %v3489_v44 = vld [vmem:[#allocation4 + $0xe08] sm:$0xff]  ;;  %v7461_v50 = vcombine.high %v3377_v41, %v3381_v43  ;;  %v7460_v62 = vcombine.low %v3377_v41, %v3381_v43 }
 0x9fb   :  { %v3493_v46 = vld [vmem:[#allocation4 + $0xe28] sm:$0xff] }
 0x9fc   :  { %6388 = vmatpush1.bf16.msra.mxu1 %v7388_v49  ;;  %v7573_v49 = vcombine.high %v3489_v44, %v3493_v46  ;;  %v7572_v34 = vcombine.low %v3489_v44, %v3493_v46  ;;  %v3544_v21 = vld [vmem:[#allocation11] sm:$0xff]  ;;  %v7151_v46 = vcombine.high %v3066_v31, %v3070_v32 }
 0x9fd   :  { %6431 = vmatpush1.bf16.msra.mxu0 %v7508_v15  ;;  %6389 = vmatprep.subr.bf16.mxu1 %v7381_v39  ;;  %v3369_v15 = vld [vmem:[#allocation4 + $0xa48] sm:$0xff]  ;;  %v3549_v25 = vrot.slane %v3544_v21, %v8102_v20 }
 0x9fe   :  { %6434 = vmatprep.subr.bf16.mxu0 %v6115_v12  ;;  %v3373_v39 = vld [vmem:[#allocation4 + $0xa68] sm:$0xff]  ;;  %v3102_v12 = vld [vmem:[#allocation4 + $0x1f0] sm:$0xff] }
 0x9ff   :  { %v7453_v45 = vcombine.high %v3369_v15, %v3373_v39  ;;  %v7183_v56 = vcombine.high %v3098_v52, %v3102_v12  ;;  %v7452_v59 = vcombine.low %v3369_v15, %v3373_v39  ;;  %v7182_v0 = vcombine.low %v3098_v52, %v3102_v12  ;;  %v3062_v15 = vld [vmem:[#allocation4 + $0xb0] sm:$0xff] }
 0xa00   :  { %6390 = vmatpush1.bf16.msra.mxu1 %v7380_v37  ;;  %v3361_v37 = vld [vmem:[#allocation4 + $0xa08] sm:$0xff] }
 0xa01   :  { %6435 = vmatpush2.bf16.msra.mxu0 %v6112_v60  ;;  %6391 = vmatprep.subr.bf16.mxu1 %v7501_v57  ;;  %v3365_v60 = vld [vmem:[#allocation4 + $0xa28] sm:$0xff]  ;;  %v3090_v57 = vld [vmem:[#allocation4 + $0x190] sm:$0xff] }
 0xa02   :  { %6436 = vmatprep.subr.bf16.mxu0 %v7613_v58  ;;  %v3094_v58 = vld [vmem:[#allocation4 + $0x1b0] sm:$0xff]  ;;  %v7445_v16 = vcombine.high %v3361_v37, %v3365_v60  ;;  %v7444_v10 = vcombine.low %v3361_v37, %v3365_v60 }
 0xa03   :  { %v7175_v17 = vcombine.high %v3090_v57, %v3094_v58  ;;  %v7174_v53 = vcombine.low %v3090_v57, %v3094_v58  ;;  %v3194_v60 = vld [vmem:[#allocation4 + $0x4d0] sm:$0xff] }
 0xa04   :  { %6392 = vmatpush2.bf16.msra.mxu1 %v7500_v28  ;;  %v3226_v28 = vld [vmem:[#allocation4 + $0x5d0] sm:$0xff] }
 0xa05   :  { %6437 = vmatpush2.bf16.msra.mxu0 %v7612_v6  ;;  %6393 = vmatprep.subr.bf16.mxu1 %v7493_v8  ;;  %v3230_v6 = vld [vmem:[#allocation4 + $0x5f0] sm:$0xff] }
 0xa06   :  { %6438 = vmatprep.subr.bf16.mxu0 %v7605_v4  ;;  %v3082_v8 = vld [vmem:[#allocation4 + $0x150] sm:$0xff]  ;;  %v7311_v22 = vcombine.high %v3226_v28, %v3230_v6  ;;  %v7310_v26 = vcombine.low %v3226_v28, %v3230_v6 }
 0xa07   :  { %v3086_v4 = vld [vmem:[#allocation4 + $0x170] sm:$0xff] }
 0xa08   :  { %6394 = vmatpush2.bf16.msra.mxu1 %v7492_v13  ;;  %v7167_v13 = vcombine.high %v3082_v8, %v3086_v4  ;;  %v7166_v61 = vcombine.low %v3082_v8, %v3086_v4  ;;  %v3198_v57 = vld [vmem:[#allocation4 + $0x4f0] sm:$0xff] }
 0xa09   :  { %6439 = vmatpush2.bf16.msra.mxu0 %v7604_v14  ;;  %6395 = vmatprep.subr.bf16.mxu1 %v7485_v30  ;;  %v3218_v14 = vld [vmem:[#allocation4 + $0x590] sm:$0xff] }
 0xa0a   :  { %6440 = vmatprep.subr.bf16.mxu0 %v7597_v18  ;;  %v3222_v30 = vld [vmem:[#allocation4 + $0x5b0] sm:$0xff] }
 0xa0b   :  { %v3074_v18 = vld [vmem:[#allocation4 + $0x110] sm:$0xff]  ;;  %v7302_v20 = vcombine.low %v3218_v14, %v3222_v30 }
 0xa0c   :  { %6396 = vmatpush2.bf16.msra.mxu1 %v7484_v9  ;;  %v7303_v9 = vcombine.high %v3218_v14, %v3222_v30  ;;  %v3050_v58 = vld [vmem:[#allocation4 + $0x50] sm:$0xff] }
 0xa0d   :  { %6441 = vmatpush2.bf16.msra.mxu0 %v7596_v5  ;;  %6397 = vmatprep.subr.bf16.mxu1 %v7477_v29  ;;  %v3553_v5 = vrot.slane %v3544_v21, %v8109_v23  ;;  %v7159_v29 = vcombine.high %v3074_v18, %v3078_v24  ;;  %v3186_v6 = vld [vmem:[#allocation4 + $0x490] sm:$0xff] }
 0xa0e   :  { %6442 = vmatprep.subr.bf16.mxu0 %v7589_v27  ;;  %v3210_v27 = vld [vmem:[#allocation4 + $0x550] sm:$0xff] }
 0xa0f   :  { %v7295_v41 = vcombine.high %v3210_v27, %v3214_v11  ;;  %v7294_v52 = vcombine.low %v3210_v27, %v3214_v11  ;;  %v3190_v8 = vld [vmem:[#allocation4 + $0x4b0] sm:$0xff] }
 0xa10   :  { %6398 = vmatpush2.bf16.msra.mxu1 %v7476_v33  ;;  %v3042_v4 = vld [vmem:[#allocation4 + $0x10] sm:$0xff] }
 0xa11   :  { %6443 = vmatpush2.bf16.msra.mxu0 %v7588_v36  ;;  %6399 = vmatprep.subr.bf16.mxu1 %v7469_v40  ;;  %v3178_v14 = vld [vmem:[#allocation4 + $0x450] sm:$0xff] }
 0xa12   :  { %6444 = vmatprep.subr.bf16.mxu0 %v7581_v42  ;;  %v7158_v42 = vcombine.low %v3074_v18, %v3078_v24  ;;  %v3182_v30 = vld [vmem:[#allocation4 + $0x470] sm:$0xff] }
 0xa13   :  { %v3162_v18 = vld [vmem:[#allocation4 + $0x3d0] sm:$0xff] }
 0xa14   :  { %6400 = vmatpush2.bf16.msra.mxu1 %v7468_v47  ;;  %v3202_v47 = vld [vmem:[#allocation4 + $0x510] sm:$0xff] }
 0xa15   :  { %6445 = vmatpush2.bf16.msra.mxu0 %v7580_v35  ;;  %6401 = vmatprep.subr.bf16.mxu1 %v7461_v50  ;;  %v3206_v35 = vld [vmem:[#allocation4 + $0x530] sm:$0xff] }
 0xa16   :  { %6446 = vmatprep.subr.bf16.mxu0 %v7573_v49  ;;  %v3058_v49 = vld [vmem:[#allocation4 + $0x90] sm:$0xff] }
 0xa17   :  { %v7143_v37 = vcombine.high %v3058_v49, %v3062_v15  ;;  %v3166_v24 = vld [vmem:[#allocation4 + $0x3f0] sm:$0xff] }
 0xa18   :  { %6402 = vmatpush2.bf16.msra.mxu1 %v7460_v62  ;;  %v3154_v27 = vld [vmem:[#allocation4 + $0x390] sm:$0xff] }
 0xa19   :  { %6447 = vmatpush2.bf16.msra.mxu0 %v7572_v34  ;;  %6403 = vmatprep.subr.bf16.mxu1 %v7453_v45  ;;  %v7150_v34 = vcombine.low %v3066_v31, %v3070_v32  ;;  %v7287_v45 = vcombine.high %v3202_v47, %v3206_v35  ;;  %v3158_v11 = vld [vmem:[#allocation4 + $0x3b0] sm:$0xff]  ;;  %v7246_v31 = vcombine.low %v3162_v18, %v3166_v24 }
 0xa1a   :  { %6457 = vmatprep.subr.bf16.mxu0 %v7183_v56 }
 0xa1c   :  { %6404 = vmatpush2.bf16.msra.mxu1 %v7452_v59  ;;  %6449 = vmatmul.mubr.bf16.vlgmr.msra.gmra.mxu0 %v8490_v51  ;;  %v3054_v59 = vld [vmem:[#allocation4 + $0x70] sm:$0xff] }
 0xa1d   :  { %6458 = vmatpush1.bf16.msra.mxu0 %v7182_v0  ;;  %6405 = vmatprep.subr.bf16.mxu1 %v7445_v16  ;;  %v7286_v0 = vcombine.low %v3202_v47, %v3206_v35  ;;  %v7142_v16 = vcombine.low %v3058_v49, %v3062_v15  ;;  %v7135_v28 = vcombine.high %v3050_v58, %v3054_v59  ;;  %v3282_v47 = vld [vmem:[#allocation4 + $0x790] sm:$0xff] }
 0xa1e   :  { %6459 = vmatprep.subr.bf16.mxu0 %v7175_v17  ;;  %6489 = vmatprep.mubr.bf16.mxu0 %v8456_v54  ;;  %v7279_v17 = vcombine.high %v3194_v60, %v3198_v57  ;;  %v7134_v21 = vcombine.low %v3050_v58, %v3054_v59  ;;  %v3286_v35 = vld [vmem:[#allocation4 + $0x7b0] sm:$0xff] }
 0xa1f   :  { %v3142_v49 = vld [vmem:[#allocation4 + $0x330] sm:$0xff] }
 0xa20   :  { %6406 = vmatpush2.bf16.msra.mxu1 %v7444_v10  ;;  %v3046_v10 = vld [vmem:[#allocation4 + $0x30] sm:$0xff] }
 0xa21   :  { %6460 = vmatpush1.bf16.msra.mxu0 %v7174_v53  ;;  %6498 = vmatprep.subr.bf16.mxu1 %v7311_v22  ;;  %v6163_v1 = vpop.f32.mrf.mxu1  ;;  %v7278_v53 = vcombine.low %v3194_v60, %v3198_v57  ;;  %v7271_v22 = vcombine.high %v3186_v6, %v3190_v8  ;;  %v7366_v60 = vcombine.low %v3282_v47, %v3286_v35 }
 0xa22   :  { %6461 = vmatprep.subr.bf16.mxu0 %v7167_v13  ;;  %v6164_v33 = vadd.f32 %v6163_v1, %v3549_v25  ;;  %v7127_v13 = vcombine.high %v3042_v4, %v3046_v10  ;;  %v7270_v25 = vcombine.low %v3186_v6, %v3190_v8  ;;  %v7262_v1 = vcombine.low %v3178_v14, %v3182_v30 }
 0xa23   :  { %6408 = vmatmul.mubr.bf16.vlgmr.msra.gmra.mxu1 %v8484_v3  ;;  %v6204_v36 = vpop.f32.mrf.mxu0  ;;  %v6165_v40 = vpop.f32.mrf.mxu1 }
 0xa24   :  { %6499 = vmatpush1.bf16.msra.mxu1 %v7310_v26  ;;  %6530 = vmatprep.mubr.bf16.mxu1 %v8476_v38  ;;  %v6166_v23 = vadd.f32 %v6165_v40, %v3553_v5  ;;  %v8522_v43 = vadd.f32 %v6204_v36, %v6164_v33  ;;  %v7126_v26 = vcombine.low %v3042_v4, %v3046_v10  ;;  %v3170_v5 = vld [vmem:[#allocation4 + $0x410] sm:$0xff] }
 0xa25   :  { %6462 = vmatpush1.bf16.msra.mxu0 %v7166_v61  ;;  %6500 = vmatprep.subr.bf16.mxu1 %v7303_v9  ;;  %v6206_v44 = vpop.f32.mrf.mxu0  ;;  %v6167_v50 = vpop.f32.mrf.mxu1  ;;  %v7263_v61 = vcombine.high %v3178_v14, %v3182_v30  ;;  %v7247_v9 = vcombine.high %v3162_v18, %v3166_v24  ;;  %v7239_v33 = vcombine.high %v3154_v27, %v3158_v11  ;;  %v3290_v36 = vld [vmem:[#allocation4 + $0x7d0] sm:$0xff] }
 0xa26   :  { %6463 = vmatprep.subr.bf16.mxu0 %v7159_v29  ;;  %v8524_v39 = vadd.f32 %v6206_v44, %v6166_v23  ;;  %v3174_v29 = vld [vmem:[#allocation4 + $0x430] sm:$0xff]  ;;  %v7238_v23 = vcombine.low %v3154_v27, %v3158_v11 }
 0xa27   :  { %v6208_v12 = vpop.f32.mrf.mxu0  ;;  %v6168_v62 = vpop.f32.mrf.mxu1  ;;  %v7255_v32 = vcombine.high %v3170_v5, %v3174_v29  ;;  %v3146_v40 = vld [vmem:[#allocation4 + $0x350] sm:$0xff] }
 0xa28   :  { %6501 = vmatpush1.bf16.msra.mxu1 %v7302_v20  ;;  %v3294_v20 = vld [vmem:[#allocation4 + $0x7f0] sm:$0xff]  ;;  %v7367_v12 = vcombine.high %v3282_v47, %v3286_v35 }
 0xa29   :  { %6464 = vmatpush1.bf16.msra.mxu0 %v7158_v42  ;;  %6502 = vmatprep.subr.bf16.mxu1 %v7295_v41  ;;  %v6209_v56 = vpop.f32.mrf.mxu0  ;;  %v3150_v42 = vld [vmem:[#allocation4 + $0x370] sm:$0xff]  ;;  %v7254_v41 = vcombine.low %v3170_v5, %v3174_v29  ;;  %v7375_v44 = vcombine.high %v3290_v36, %v3294_v20  ;;  %v7374_v15 = vcombine.low %v3290_v36, %v3294_v20 }
 0xa2a   :  { %6465 = vmatprep.subr.bf16.mxu0 %v7151_v46  ;;  %v7231_v46 = vcombine.high %v3146_v40, %v3150_v42  ;;  %v3138_v50 = vld [vmem:[#allocation4 + $0x310] sm:$0xff] }
 0xa2b   :  { %v7223_v62 = vcombine.high %v3138_v50, %v3142_v49  ;;  %v3130_v56 = vld [vmem:[#allocation4 + $0x2d0] sm:$0xff]  ;;  %v7222_v57 = vcombine.low %v3138_v50, %v3142_v49 }
 0xa2c   :  { %6503 = vmatpush1.bf16.msra.mxu1 %v7294_v52  ;;  %v7230_v52 = vcombine.low %v3146_v40, %v3150_v42 }
 0xa2d   :  { %6466 = vmatpush1.bf16.msra.mxu0 %v7150_v34  ;;  %6504 = vmatprep.subr.bf16.mxu1 %v7287_v45  ;;  %v3274_v34 = vld [vmem:[#allocation4 + $0x750] sm:$0xff] }
 0xa2e   :  { %6467 = vmatprep.subr.bf16.mxu0 %v7143_v37  ;;  %v3278_v45 = vld [vmem:[#allocation4 + $0x770] sm:$0xff] }
 0xa2f   :  { %v3134_v37 = vld [vmem:[#allocation4 + $0x2f0] sm:$0xff]  ;;  %v7359_v58 = vcombine.high %v3274_v34, %v3278_v45  ;;  %v7358_v6 = vcombine.low %v3274_v34, %v3278_v45 }
 0xa30   :  { %6505 = vmatpush1.bf16.msra.mxu1 %v7286_v0  ;;  %v7215_v59 = vcombine.high %v3130_v56, %v3134_v37  ;;  %v3266_v0 = vld [vmem:[#allocation4 + $0x710] sm:$0xff]  ;;  %v7214_v8 = vcombine.low %v3130_v56, %v3134_v37 }
 0xa31   :  { %6468 = vmatpush1.bf16.msra.mxu0 %v7142_v16  ;;  %6506 = vmatprep.subr.bf16.mxu1 %v7279_v17  ;;  %v3270_v16 = vld [vmem:[#allocation4 + $0x730] sm:$0xff] }
 0xa32   :  { %6469 = vmatprep.subr.bf16.mxu0 %v7135_v28  ;;  %v3122_v17 = vld [vmem:[#allocation4 + $0x290] sm:$0xff]  ;;  %v7351_v4 = vcombine.high %v3266_v0, %v3270_v16  ;;  %v7350_v14 = vcombine.low %v3266_v0, %v3270_v16 }
 0xa33   :  { %v3126_v28 = vld [vmem:[#allocation4 + $0x2b0] sm:$0xff] }
 0xa34   :  { %6507 = vmatpush1.bf16.msra.mxu1 %v7278_v53  ;;  %v7207_v10 = vcombine.high %v3122_v17, %v3126_v28  ;;  %v3258_v53 = vld [vmem:[#allocation4 + $0x6d0] sm:$0xff]  ;;  %v7206_v30 = vcombine.low %v3122_v17, %v3126_v28 }
 0xa35   :  { %6470 = vmatpush1.bf16.msra.mxu0 %v7134_v21  ;;  %6508 = vmatprep.subr.bf16.mxu1 %v7271_v22  ;;  %v3262_v21 = vld [vmem:[#allocation4 + $0x6f0] sm:$0xff] }
 0xa36   :  { %6471 = vmatprep.subr.bf16.mxu0 %v7127_v13  ;;  %v3114_v22 = vld [vmem:[#allocation4 + $0x250] sm:$0xff]  ;;  %v7343_v18 = vcombine.high %v3258_v53, %v3262_v21  ;;  %v7342_v5 = vcombine.low %v3258_v53, %v3262_v21 }
 0xa37   :  { %v3118_v13 = vld [vmem:[#allocation4 + $0x270] sm:$0xff] }
 0xa38   :  { %6509 = vmatpush1.bf16.msra.mxu1 %v7270_v25  ;;  %v7199_v24 = vcombine.high %v3114_v22, %v3118_v13  ;;  %v3250_v25 = vld [vmem:[#allocation4 + $0x690] sm:$0xff]  ;;  %v7198_v29 = vcombine.low %v3114_v22, %v3118_v13 }
 0xa39   :  { %6472 = vmatpush1.bf16.msra.mxu0 %v7126_v26  ;;  %6510 = vmatprep.subr.bf16.mxu1 %v7263_v61  ;;  %v3254_v26 = vld [vmem:[#allocation4 + $0x6b0] sm:$0xff] }
 0xa3a   :  { %6473 = vmatprep.subr.bf16.mxu0 %v7247_v9  ;;  %v3106_v61 = vld [vmem:[#allocation4 + $0x210] sm:$0xff]  ;;  %v7335_v27 = vcombine.high %v3250_v25, %v3254_v26  ;;  %v7334_v36 = vcombine.low %v3250_v25, %v3254_v26 }
 0xa3b   :  { %v3110_v9 = vld [vmem:[#allocation4 + $0x230] sm:$0xff] }
 0xa3c   :  { %6511 = vmatpush1.bf16.msra.mxu1 %v7262_v1  ;;  %v7191_v11 = vcombine.high %v3106_v61, %v3110_v9  ;;  %v3242_v1 = vld [vmem:[#allocation4 + $0x650] sm:$0xff]  ;;  %v7190_v20 = vcombine.low %v3106_v61, %v3110_v9 }
 0xa3d   :  { %6474 = vmatpush2.bf16.msra.mxu0 %v7246_v31  ;;  %6512 = vmatprep.subr.bf16.mxu1 %v7255_v32  ;;  %v3246_v31 = vld [vmem:[#allocation4 + $0x670] sm:$0xff] }
 0xa3e   :  { %6475 = vmatprep.subr.bf16.mxu0 %v7239_v33  ;;  %v3354_v32 = vld [vmem:[#allocation4 + $0x9d0] sm:$0xff]  ;;  %v7327_v40 = vcombine.high %v3242_v1, %v3246_v31  ;;  %v7326_v47 = vcombine.low %v3242_v1, %v3246_v31 }
 0xa3f   :  { %v3358_v33 = vld [vmem:[#allocation4 + $0x9f0] sm:$0xff] }
 0xa40   :  { %6513 = vmatpush1.bf16.msra.mxu1 %v7254_v41  ;;  %v7439_v42 = vcombine.high %v3354_v32, %v3358_v33  ;;  %v3234_v41 = vld [vmem:[#allocation4 + $0x610] sm:$0xff]  ;;  %v7438_v35 = vcombine.low %v3354_v32, %v3358_v33 }
 0xa41   :  { %6476 = vmatpush2.bf16.msra.mxu0 %v7238_v23  ;;  %6514 = vmatprep.subr.bf16.mxu1 %v7375_v44  ;;  %v3238_v23 = vld [vmem:[#allocation4 + $0x630] sm:$0xff] }
 0xa42   :  { %6477 = vmatprep.subr.bf16.mxu0 %v7231_v46  ;;  %v3346_v44 = vld [vmem:[#allocation4 + $0x990] sm:$0xff]  ;;  %v7319_v50 = vcombine.high %v3234_v41, %v3238_v23  ;;  %v7318_v34 = vcombine.low %v3234_v41, %v3238_v23 }
 0xa43   :  { %v3350_v46 = vld [vmem:[#allocation4 + $0x9b0] sm:$0xff] }
 0xa44   :  { %6515 = vmatpush2.bf16.msra.mxu1 %v7374_v15  ;;  %v7431_v49 = vcombine.high %v3346_v44, %v3350_v46  ;;  %v3482_v15 = vld [vmem:[#allocation4 + $0xdd0] sm:$0xff]  ;;  %v7430_v45 = vcombine.low %v3346_v44, %v3350_v46 }
 0xa45   :  { %6478 = vmatpush2.bf16.msra.mxu0 %v7230_v52  ;;  %6516 = vmatprep.subr.bf16.mxu1 %v7367_v12  ;;  %v3486_v52 = vld [vmem:[#allocation4 + $0xdf0] sm:$0xff] }
 0xa46   :  { %6479 = vmatprep.subr.bf16.mxu0 %v7223_v62  ;;  %v3338_v12 = vld [vmem:[#allocation4 + $0x950] sm:$0xff]  ;;  %v7567_v56 = vcombine.high %v3482_v15, %v3486_v52  ;;  %v7566_v0 = vcombine.low %v3482_v15, %v3486_v52 }
 0xa47   :  { %v3342_v62 = vld [vmem:[#allocation4 + $0x970] sm:$0xff] }
 0xa48   :  { %6517 = vmatpush2.bf16.msra.mxu1 %v7366_v60  ;;  %v7423_v37 = vcombine.high %v3338_v12, %v3342_v62  ;;  %v3474_v60 = vld [vmem:[#allocation4 + $0xd90] sm:$0xff]  ;;  %v7422_v17 = vcombine.low %v3338_v12, %v3342_v62 }
 0xa49   :  { %6480 = vmatpush2.bf16.msra.mxu0 %v7222_v57  ;;  %6518 = vmatprep.subr.bf16.mxu1 %v7359_v58  ;;  %v3478_v57 = vld [vmem:[#allocation4 + $0xdb0] sm:$0xff] }
 0xa4a   :  { %6481 = vmatprep.subr.bf16.mxu0 %v7215_v59  ;;  %v3330_v58 = vld [vmem:[#allocation4 + $0x910] sm:$0xff]  ;;  %v7559_v28 = vcombine.high %v3474_v60, %v3478_v57 }
 0xa4b   :  { %v3334_v59 = vld [vmem:[#allocation4 + $0x930] sm:$0xff] }
 0xa4c   :  { %6519 = vmatpush2.bf16.msra.mxu1 %v7358_v6  ;;  %v3322_v21 = vld [vmem:[#allocation4 + $0x8d0] sm:$0xff] }
 0xa4d   :  { %6482 = vmatpush2.bf16.msra.mxu0 %v7214_v8  ;;  %6520 = vmatprep.subr.bf16.mxu1 %v7351_v4  ;;  %v7415_v8 = vcombine.high %v3330_v58, %v3334_v59  ;;  %v3466_v4 = vld [vmem:[#allocation4 + $0xd50] sm:$0xff] }
 0xa4e   :  { %6483 = vmatprep.subr.bf16.mxu0 %v7207_v10  ;;  %v3470_v10 = vld [vmem:[#allocation4 + $0xd70] sm:$0xff] }
 0xa4f   :  { %v3326_v22 = vld [vmem:[#allocation4 + $0x8f0] sm:$0xff]  ;;  %v7551_v25 = vcombine.high %v3466_v4, %v3470_v10  ;;  %v7550_v32 = vcombine.low %v3466_v4, %v3470_v10 }
 0xa50   :  { %6521 = vmatpush2.bf16.msra.mxu1 %v7350_v14  ;;  %v7558_v14 = vcombine.low %v3474_v60, %v3478_v57  ;;  %v3318_v1 = vld [vmem:[#allocation4 + $0x8b0] sm:$0xff] }
 0xa51   :  { %6484 = vmatpush2.bf16.msra.mxu0 %v7206_v30  ;;  %6522 = vmatprep.subr.bf16.mxu1 %v7343_v18  ;;  %v3454_v41 = vld [vmem:[#allocation4 + $0xcf0] sm:$0xff] }
 0xa52   :  { %6485 = vmatprep.subr.bf16.mxu0 %v7199_v24  ;;  %v7414_v24 = vcombine.low %v3330_v58, %v3334_v59  ;;  %v3306_v23 = vld [vmem:[#allocation4 + $0x850] sm:$0xff] }
 0xa53   :  { %v3310_v44 = vld [vmem:[#allocation4 + $0x870] sm:$0xff] }
 0xa54   :  { %6523 = vmatpush2.bf16.msra.mxu1 %v7342_v5  ;;  %v7407_v5 = vcombine.high %v3322_v21, %v3326_v22  ;;  %v3446_v15 = vld [vmem:[#allocation4 + $0xcb0] sm:$0xff] }
 0xa55   :  { %6486 = vmatpush2.bf16.msra.mxu0 %v7198_v29  ;;  %6524 = vmatprep.subr.bf16.mxu1 %v7335_v27  ;;  %v3458_v29 = vld [vmem:[#allocation4 + $0xd10] sm:$0xff] }
 0xa56   :  { %6487 = vmatprep.subr.bf16.mxu0 %v7191_v11  ;;  %v3314_v11 = vld [vmem:[#allocation4 + $0x890] sm:$0xff] }
 0xa57   :  { %v3298_v52 = vld [vmem:[#allocation4 + $0x810] sm:$0xff] }
 0xa58   :  { %6525 = vmatpush2.bf16.msra.mxu1 %v7334_v36  ;;  %v7406_v36 = vcombine.low %v3322_v21, %v3326_v22  ;;  %v3302_v12 = vld [vmem:[#allocation4 + $0x830] sm:$0xff] }
 0xa59   :  { %6488 = vmatpush2.bf16.msra.mxu0 %v7190_v20  ;;  %6526 = vmatprep.subr.bf16.mxu1 %v7327_v40  ;;  %v7399_v40 = vcombine.high %v3314_v11, %v3318_v1  ;;  %v3438_v60 = vld [vmem:[#allocation4 + $0xc70] sm:$0xff] }
 0xa5a   :  { %6539 = vmatprep.subr.bf16.mxu0 %v7439_v42  ;;  %v3450_v42 = vld [vmem:[#allocation4 + $0xcd0] sm:$0xff] }
 0xa5b   :  { %v7534_v62 = vcombine.low %v3450_v42, %v3454_v41  ;;  %v3418_v57 = vld [vmem:[#allocation4 + $0xbd0] sm:$0xff] }
 0xa5c   :  { %6490 = vmatmul.mubr.bf16.vlgmr.msra.gmra.mxu0 %v8454_v63  ;;  %6527 = vmatpush2.bf16.msra.mxu1 %v7326_v47  ;;  %v7398_v47 = vcombine.low %v3314_v11, %v3318_v1  ;;  %v3422_v58 = vld [vmem:[#allocation4 + $0xbf0] sm:$0xff] }
 0xa5d   :  { %6540 = vmatpush1.bf16.msra.mxu0 %v7438_v35  ;;  %6528 = vmatprep.subr.bf16.mxu1 %v7319_v50  ;;  %v7535_v35 = vcombine.high %v3450_v42, %v3454_v41  ;;  %v7391_v50 = vcombine.high %v3306_v23, %v3310_v44  ;;  %v3542_v4 = vld [vmem:[#allocation4 + $0xfb0] sm:$0x11]  ;;  %v7502_v22 = vcombine.low %v3418_v57, %v3422_v58 }
 0xa5e   :  { %6541 = vmatprep.subr.bf16.mxu0 %v7431_v49  ;;  %6571 = vmatprep.mubr.bf16.mxu0 %v8486_v7  ;;  %v3442_v49 = vld [vmem:[#allocation4 + $0xc90] sm:$0xff] }
 0xa5f   :  { %v6286_v16 = vpop.f32.mrf.mxu0  ;;  %v7526_v59 = vcombine.low %v3442_v49, %v3446_v15  ;;  %v3410_v10 = vld [vmem:[#allocation4 + $0xb90] sm:$0xff] }
 0xa60   :  { %6529 = vmatpush2.bf16.msra.mxu1 %v7318_v34  ;;  %v7390_v34 = vcombine.low %v3306_v23, %v3310_v44  ;;  %v3394_v11 = vld [vmem:[#allocation4 + $0xb10] sm:$0xff] }
 0xa61   :  { %6542 = vmatpush1.bf16.msra.mxu0 %v7430_v45  ;;  %6580 = vmatprep.subr.bf16.mxu1 %v7567_v56  ;;  %v6288_v6 = vpop.f32.mrf.mxu0  ;;  %v7527_v45 = vcombine.high %v3442_v49, %v3446_v15  ;;  %v7383_v56 = vcombine.high %v3298_v52, %v3302_v12  ;;  %v3398_v1 = vld [vmem:[#allocation4 + $0xb30] sm:$0xff] }
 0xa62   :  { %6543 = vmatprep.subr.bf16.mxu0 %v7423_v37  ;;  %v3434_v37 = vld [vmem:[#allocation4 + $0xc50] sm:$0xff] }
 0xa63   :  { %v6245_v53 = vpop.f32.mrf.mxu1  ;;  %6531 = vmatmul.mubr.bf16.vlgmr.msra.gmra.mxu1 %v8472_v55  ;;  %v6290_v30 = vpop.f32.mrf.mxu0  ;;  %v7518_v21 = vcombine.low %v3434_v37, %v3438_v60  ;;  %v3526_v42 = vld [vmem:[#allocation4 + $0xf30] sm:$0xff] }
 0xa64   :  { %v6246_v13 = vadd.f32 %v6245_v53, %v8522_v43  ;;  %6581 = vmatpush1.bf16.msra.mxu1 %v7566_v0  ;;  %7628 = vmatprep.mubr.msk.bf16.mxu1 %vm6098_vm15, %v8488_v2  ;;  %v3462_v43 = vld [vmem:[#allocation4 + $0xd30] sm:$0xff]  ;;  %v7382_v0 = vcombine.low %v3298_v52, %v3302_v12 }
 0xa65   :  { %6544 = vmatpush1.bf16.msra.mxu0 %v7422_v17  ;;  %v6247_v18 = vpop.f32.mrf.mxu1  ;;  %6582 = vmatprep.subr.bf16.mxu1 %v7559_v28  ;;  %v6291_v9 = vpop.f32.mrf.mxu0  ;;  %v7543_v20 = vcombine.high %v3458_v29, %v3462_v43  ;;  %v7542_v46 = vcombine.low %v3458_v29, %v3462_v43  ;;  %v3426_v17 = vld [vmem:[#allocation4 + $0xc10] sm:$0xff]  ;;  %v7503_v28 = vcombine.high %v3418_v57, %v3422_v58 }
 0xa66   :  { %v8532_v26 = vadd.f32 %v6286_v16, %v6246_v13  ;;  %v6248_v61 = vadd.f32 %v6247_v18, %v8524_v39  ;;  %6545 = vmatprep.subr.bf16.mxu0 %v7415_v8  ;;  %v7519_v16 = vcombine.high %v3434_v37, %v3438_v60  ;;  %v3538_v8 = vld [vmem:[#allocation4 + $0xf90] sm:$0xff] }
 0xa67   :  { %v6249_v27 = vpop.f32.mrf.mxu1  ;;  %v3414_v53 = vld [vmem:[#allocation4 + $0xbb0] sm:$0xff] }
 0xa68   :  { %v8535_v31 = vadd.f32 %v6288_v6, %v6248_v61  ;;  %6583 = vmatpush1.bf16.msra.mxu1 %v7558_v14  ;;  %v3430_v6 = vld [vmem:[#allocation4 + $0xc30] sm:$0xff]  ;;  %v7623_v14 = vcombine.high %v3538_v8, %v3542_v4  ;;  %v7495_v30 = vcombine.high %v3410_v10, %v3414_v53  ;;  %v7622_v61 = vcombine.low %v3538_v8, %v3542_v4 }
 0xa69   :  { %6546 = vmatpush1.bf16.msra.mxu0 %v7414_v24  ;;  %v6250_v33 = vpop.f32.mrf.mxu1  ;;  %6584 = vmatprep.subr.bf16.mxu1 %v7551_v25  ;;  %v7511_v13 = vcombine.high %v3426_v17, %v3430_v6  ;;  %v3402_v18 = vld [vmem:[#allocation4 + $0xb50] sm:$0xff]  ;;  %v7510_v25 = vcombine.low %v3426_v17, %v3430_v6  ;;  %v7494_v9 = vcombine.low %v3410_v10, %v3414_v53 }
 0xa6a   :  { %v6793_v39 = vcombine.low %v8532_v26, %v8535_v31  ;;  %6547 = vmatprep.subr.bf16.mxu0 %v7407_v5  ;;  %v3406_v24 = vld [vmem:[#allocation4 + $0xb70] sm:$0xff]  ;;  %v6121_v5 = vand.u32 %v7623_v14, %v8501_v48  ;;  %v3227_v14 = vld [vmem:[#allocation4 + $0x5d8] sm:$0xff] }
 0xa6b   :  { %v7487_v29 = vcombine.high %v3402_v18, %v3406_v24  ;;  %v3530_v43 = vld [vmem:[#allocation4 + $0xf50] sm:$0xff]  ;;  %v7486_v33 = vcombine.low %v3402_v18, %v3406_v24 }
 0xa6c   :  { %6585 = vmatpush1.bf16.msra.mxu1 %v7550_v32  ;;  %v3534_v27 = vld [vmem:[#allocation4 + $0xf70] sm:$0xff]  ;;  %v6118_v32 = vand.u32 %v7622_v61, %v8501_v48  ;;  %v3099_v61 = vld [vmem:[#allocation4 + $0x1d8] sm:$0xff] }
 0xa6d   :  { %6548 = vmatpush1.bf16.msra.mxu0 %v7406_v36  ;;  %6586 = vmatprep.subr.bf16.mxu1 %v7543_v20  ;;  %v7615_v36 = vcombine.high %v3530_v43, %v3534_v27  ;;  %v7479_v20 = vcombine.high %v3394_v11, %v3398_v1  ;;  %v3386_v41 = vld [vmem:[#allocation4 + $0xad0] sm:$0xff]  ;;  %v7614_v44 = vcombine.low %v3530_v43, %v3534_v27  ;;  %v3223_v43 = vld [vmem:[#allocation4 + $0x5b8] sm:$0xff] }
 0xa6e   :  { %6549 = vmatprep.subr.bf16.mxu0 %v7399_v40  ;;  %v3522_v40 = vld [vmem:[#allocation4 + $0xf10] sm:$0xff] }
 0xa6f   :  { %v3390_v23 = vld [vmem:[#allocation4 + $0xaf0] sm:$0xff]  ;;  %v7606_v12 = vcombine.low %v3522_v40, %v3526_v42 }
 0xa70   :  { %6587 = vmatpush1.bf16.msra.mxu1 %v7542_v46  ;;  %v7478_v46 = vcombine.low %v3394_v11, %v3398_v1  ;;  %v3518_v49 = vld [vmem:[#allocation4 + $0xef0] sm:$0xff] }
 0xa71   :  { %6550 = vmatpush1.bf16.msra.mxu0 %v7398_v47  ;;  %6588 = vmatprep.subr.bf16.mxu1 %v7535_v35  ;;  %v7607_v47 = vcombine.high %v3522_v40, %v3526_v42  ;;  %v7471_v35 = vcombine.high %v3386_v41, %v3390_v23  ;;  %v3378_v15 = vld [vmem:[#allocation4 + $0xa90] sm:$0xff]  ;;  %v3215_v40 = vld [vmem:[#allocation4 + $0x578] sm:$0xff] }
 0xa72   :  { %6551 = vmatprep.subr.bf16.mxu0 %v7391_v50  ;;  %v3514_v50 = vld [vmem:[#allocation4 + $0xed0] sm:$0xff] }
 0xa73   :  { %v3382_v52 = vld [vmem:[#allocation4 + $0xab0] sm:$0xff]  ;;  %v7598_v58 = vcombine.low %v3514_v50, %v3518_v49 }
 0xa74   :  { %6589 = vmatpush1.bf16.msra.mxu1 %v7534_v62  ;;  %v7470_v62 = vcombine.low %v3386_v41, %v3390_v23  ;;  %v3510_v37 = vld [vmem:[#allocation4 + $0xeb0] sm:$0xff] }
 0xa75   :  { %6552 = vmatpush1.bf16.msra.mxu0 %v7390_v34  ;;  %6590 = vmatprep.subr.bf16.mxu1 %v7527_v45  ;;  %v7599_v34 = vcombine.high %v3514_v50, %v3518_v49  ;;  %v7463_v45 = vcombine.high %v3378_v15, %v3382_v52  ;;  %v3370_v60 = vld [vmem:[#allocation4 + $0xa50] sm:$0xff]  ;;  %v3207_v50 = vld [vmem:[#allocation4 + $0x538] sm:$0xff] }
 0xa76   :  { %6553 = vmatprep.subr.bf16.mxu0 %v7383_v56  ;;  %v3506_v56 = vld [vmem:[#allocation4 + $0xe90] sm:$0xff] }
 0xa77   :  { %v3374_v57 = vld [vmem:[#allocation4 + $0xa70] sm:$0xff]  ;;  %v7590_v4 = vcombine.low %v3506_v56, %v3510_v37 }
 0xa78   :  { %6591 = vmatpush1.bf16.msra.mxu1 %v7526_v59  ;;  %v7462_v59 = vcombine.low %v3378_v15, %v3382_v52  ;;  %v3498_v17 = vld [vmem:[#allocation4 + $0xe50] sm:$0xff]  ;;  %v7454_v10 = vcombine.low %v3370_v60, %v3374_v57 }
 0xa79   :  { %6554 = vmatpush1.bf16.msra.mxu0 %v7382_v0  ;;  %6592 = vmatprep.subr.bf16.mxu1 %v7519_v16  ;;  %v7591_v0 = vcombine.high %v3506_v56, %v3510_v37  ;;  %v7455_v16 = vcombine.high %v3370_v60, %v3374_v57  ;;  %v3362_v6 = vld [vmem:[#allocation4 + $0xa10] sm:$0xff]  ;;  %v3195_v37 = vld [vmem:[#allocation4 + $0x4d8] sm:$0xff] }
 0xa7a   :  { %6555 = vmatprep.subr.bf16.mxu0 %v7503_v28  ;;  %v3502_v28 = vld [vmem:[#allocation4 + $0xe70] sm:$0xff]  ;;  %v3199_v60 = vld [vmem:[#allocation4 + $0x4f8] sm:$0xff] }
 0xa7b   :  { %v3366_v8 = vld [vmem:[#allocation4 + $0xa30] sm:$0xff]  ;;  %v7583_v53 = vcombine.high %v3498_v17, %v3502_v28  ;;  %v7582_v18 = vcombine.low %v3498_v17, %v3502_v28  ;;  %v3067_v17 = vld [vmem:[#allocation4 + $0xd8] sm:$0xff] }
 0xa7c   :  { %6593 = vmatpush1.bf16.msra.mxu1 %v7518_v21  ;;  %v7447_v21 = vcombine.high %v3362_v6, %v3366_v8  ;;  %v7446_v24 = vcombine.low %v3362_v6, %v3366_v8  ;;  %v3071_v28 = vld [vmem:[#allocation4 + $0xf8] sm:$0xff]  ;;  %v7281_v6 = vcombine.high %v3195_v37, %v3199_v60 }
 0xa7d   :  { %6556 = vmatpush2.bf16.msra.mxu0 %v7502_v22  ;;  %6594 = vmatprep.subr.bf16.mxu1 %v7511_v13  ;;  %v3490_v22 = vld [vmem:[#allocation4 + $0xe10] sm:$0xff] }
 0xa7e   :  { %6557 = vmatprep.subr.bf16.mxu0 %v7495_v30  ;;  %v3494_v13 = vld [vmem:[#allocation4 + $0xe30] sm:$0xff]  ;;  %v3231_v30 = vld [vmem:[#allocation4 + $0x5f8] sm:$0xff] }
 0xa7f   :  { %v7574_v27 = vcombine.low %v3490_v22, %v3494_v13  ;;  %v7312_v1 = vcombine.low %v3227_v14, %v3231_v30 }
 0xa80   :  { %6595 = vmatpush1.bf16.msra.mxu1 %v7510_v25  ;;  %v7575_v25 = vcombine.high %v3490_v22, %v3494_v13  ;;  %v7153_v22 = vcombine.high %v3067_v17, %v3071_v28  ;;  %v7280_v13 = vcombine.low %v3195_v37, %v3199_v60  ;;  %v3155_v37 = vld [vmem:[#allocation4 + $0x398] sm:$0xff] }
 0xa81   :  { %6558 = vmatpush2.bf16.msra.mxu0 %v7494_v9  ;;  %6598 = vmatprep.subr.bf16.mxu1 %v6121_v5  ;;  %v3103_v9 = vld [vmem:[#allocation4 + $0x1f8] sm:$0xff]  ;;  %v7313_v5 = vcombine.high %v3227_v14, %v3231_v30 }
 0xa82   :  { %6559 = vmatprep.subr.bf16.mxu0 %v7487_v29  ;;  %v3219_v29 = vld [vmem:[#allocation4 + $0x598] sm:$0xff]  ;;  %v7185_v11 = vcombine.high %v3099_v61, %v3103_v9  ;;  %v7184_v42 = vcombine.low %v3099_v61, %v3103_v9  ;;  %v7152_v61 = vcombine.low %v3067_v17, %v3071_v28 }
 0xa83   :  { %v7304_v23 = vcombine.low %v3219_v29, %v3223_v43  ;;  %v3059_v14 = vld [vmem:[#allocation4 + $0x98] sm:$0xff] }
 0xa84   :  { %6599 = vmatpush2.bf16.msra.mxu1 %v6118_v32  ;;  %v3091_v32 = vld [vmem:[#allocation4 + $0x198] sm:$0xff] }
 0xa85   :  { %6560 = vmatpush2.bf16.msra.mxu0 %v7486_v33  ;;  %6600 = vmatprep.subr.bf16.mxu1 %v7615_v36  ;;  %v3095_v33 = vld [vmem:[#allocation4 + $0x1b8] sm:$0xff]  ;;  %v7305_v36 = vcombine.high %v3219_v29, %v3223_v43 }
 0xa86   :  { %6561 = vmatprep.subr.bf16.mxu0 %v7479_v20  ;;  %v3211_v20 = vld [vmem:[#allocation4 + $0x558] sm:$0xff]  ;;  %v7177_v41 = vcombine.high %v3091_v32, %v3095_v33  ;;  %v7176_v49 = vcombine.low %v3091_v32, %v3095_v33 }
 0xa87   :  { %v3063_v30 = vld [vmem:[#allocation4 + $0xb8] sm:$0xff] }
 0xa88   :  { %6601 = vmatpush2.bf16.msra.mxu1 %v7614_v44  ;;  %v3083_v44 = vld [vmem:[#allocation4 + $0x158] sm:$0xff]  ;;  %v7145_v9 = vcombine.high %v3059_v14, %v3063_v30  ;;  %v7144_v32 = vcombine.low %v3059_v14, %v3063_v30 }
 0xa89   :  { %6562 = vmatpush2.bf16.msra.mxu0 %v7478_v46  ;;  %6602 = vmatprep.subr.bf16.mxu1 %v7607_v47  ;;  %v3087_v46 = vld [vmem:[#allocation4 + $0x178] sm:$0xff]  ;;  %v7297_v47 = vcombine.high %v3211_v20, %v3215_v40 }
 0xa8a   :  { %6563 = vmatprep.subr.bf16.mxu0 %v7471_v35  ;;  %v3203_v35 = vld [vmem:[#allocation4 + $0x518] sm:$0xff]  ;;  %v7169_v52 = vcombine.high %v3083_v44, %v3087_v46  ;;  %v7168_v57 = vcombine.low %v3083_v44, %v3087_v46 }
 0xa8b   :  { %v3051_v29 = vld [vmem:[#allocation4 + $0x58] sm:$0xff] }
 0xa8c   :  { %6603 = vmatpush2.bf16.msra.mxu1 %v7606_v12  ;;  %v7296_v12 = vcombine.low %v3211_v20, %v3215_v40  ;;  %v3055_v43 = vld [vmem:[#allocation4 + $0x78] sm:$0xff] }
 0xa8d   :  { %6564 = vmatpush2.bf16.msra.mxu0 %v7470_v62  ;;  %6604 = vmatprep.subr.bf16.mxu1 %v7599_v34  ;;  %v3075_v34 = vld [vmem:[#allocation4 + $0x118] sm:$0xff]  ;;  %v7137_v33 = vcombine.high %v3051_v29, %v3055_v43  ;;  %v7136_v44 = vcombine.low %v3051_v29, %v3055_v43 }
 0xa8e   :  { %6565 = vmatprep.subr.bf16.mxu0 %v7463_v45  ;;  %v3079_v45 = vld [vmem:[#allocation4 + $0x138] sm:$0xff] }
 0xa8f   :  { %v3043_v20 = vld [vmem:[#allocation4 + $0x18] sm:$0xff] }
 0xa90   :  { %6605 = vmatpush2.bf16.msra.mxu1 %v7598_v58  ;;  %v3047_v40 = vld [vmem:[#allocation4 + $0x38] sm:$0xff] }
 0xa91   :  { %6566 = vmatpush2.bf16.msra.mxu0 %v7462_v59  ;;  %6606 = vmatprep.subr.bf16.mxu1 %v7591_v0  ;;  %v7288_v0 = vcombine.low %v3203_v35, %v3207_v50  ;;  %v7129_v46 = vcombine.high %v3043_v20, %v3047_v40  ;;  %v3159_v60 = vld [vmem:[#allocation4 + $0x3b8] sm:$0xff] }
 0xa92   :  { %6567 = vmatprep.subr.bf16.mxu0 %v7455_v16  ;;  %v3147_v28 = vld [vmem:[#allocation4 + $0x358] sm:$0xff] }
 0xa93   :  { %v3143_v14 = vld [vmem:[#allocation4 + $0x338] sm:$0xff] }
 0xa94   :  { %6607 = vmatpush2.bf16.msra.mxu1 %v7590_v4  ;;  %v3187_v4 = vld [vmem:[#allocation4 + $0x498] sm:$0xff] }
 0xa95   :  { %6568 = vmatpush2.bf16.msra.mxu0 %v7454_v10  ;;  %6608 = vmatprep.subr.bf16.mxu1 %v7583_v53  ;;  %v3191_v10 = vld [vmem:[#allocation4 + $0x4b8] sm:$0xff]  ;;  %v7160_v53 = vcombine.low %v3075_v34, %v3079_v45 }
 0xa96   :  { %6569 = vmatprep.subr.bf16.mxu0 %v7447_v21  ;;  %v3135_v29 = vld [vmem:[#allocation4 + $0x2f8] sm:$0xff] }
 0xa98   :  { %6609 = vmatpush2.bf16.msra.mxu1 %v7582_v18  ;;  %v7273_v18 = vcombine.high %v3187_v4, %v3191_v10 }
 0xa99   :  { %6570 = vmatpush2.bf16.msra.mxu0 %v7446_v24  ;;  %6610 = vmatprep.subr.bf16.mxu1 %v7575_v25  ;;  %v3179_v24 = vld [vmem:[#allocation4 + $0x458] sm:$0xff] }
 0xa9a   :  { %6662 = vmatprep.subr.bf16.mxu0 %v7313_v5  ;;  %v3183_v25 = vld [vmem:[#allocation4 + $0x478] sm:$0xff]  ;;  %v7272_v5 = vcombine.low %v3187_v4, %v3191_v10 }
 0xa9b   :  { %v3267_v4 = vld [vmem:[#allocation4 + $0x718] sm:$0xff] }
 0xa9c   :  { %6572 = vmatmul.mubr.bf16.vlgmr.msra.gmra.mxu0 %v8484_v3  ;;  %6611 = vmatpush2.bf16.msra.mxu1 %v7574_v27  ;;  %v7265_v27 = vcombine.high %v3179_v24, %v3183_v25  ;;  %v3271_v10 = vld [vmem:[#allocation4 + $0x738] sm:$0xff] }
 0xa9d   :  { %6621 = vmatprep.subr.bf16.mxu1 %v7185_v11  ;;  %6663 = vmatpush1.bf16.msra.mxu0 %v7312_v1  ;;  %v3171_v11 = vld [vmem:[#allocation4 + $0x418] sm:$0xff]  ;;  %v7353_v30 = vcombine.high %v3267_v4, %v3271_v10 }
 0xa9e   :  { %6664 = vmatprep.subr.bf16.mxu0 %v7305_v36  ;;  %6694 = vmatprep.mubr.bf16.mxu0 %v8476_v38  ;;  %v7289_v38 = vcombine.high %v3203_v35, %v3207_v50  ;;  %v3175_v1 = vld [vmem:[#allocation4 + $0x438] sm:$0xff]  ;;  %v7264_v36 = vcombine.low %v3179_v24, %v3183_v25 }
 0xa9f   :  { %6613 = vmatmul.mubr.bf16.vlgmr.msra.gmra.mxu1 %v8490_v51  ;;  %v3163_v35 = vld [vmem:[#allocation4 + $0x3d8] sm:$0xff] }
 0xaa0   :  { %6622 = vmatpush1.bf16.msra.mxu1 %v7184_v42  ;;  %v8544_v15 = vpop.f32.mrf.mxu0  ;;  %6653 = vmatprep.mubr.bf16.mxu1 %v8456_v54  ;;  %v7161_v54 = vcombine.high %v3075_v34, %v3079_v45  ;;  %v7257_v42 = vcombine.high %v3171_v11, %v3175_v1  ;;  %v3167_v50 = vld [vmem:[#allocation4 + $0x3f8] sm:$0xff]  ;;  %v7128_v34 = vcombine.low %v3043_v20, %v3047_v40 }
 0xaa1   :  { %6623 = vmatprep.subr.bf16.mxu1 %v7177_v41  ;;  %6665 = vmatpush1.bf16.msra.mxu0 %v7304_v23  ;;  %v3291_v41 = vld [vmem:[#allocation4 + $0x7d8] sm:$0xff]  ;;  %v7249_v45 = vcombine.high %v3163_v35, %v3167_v50 }
 0xaa2   :  { %v8547_v62 = vpop.f32.mrf.mxu0  ;;  %6666 = vmatprep.subr.bf16.mxu0 %v7297_v47  ;;  %v3295_v23 = vld [vmem:[#allocation4 + $0x7f8] sm:$0xff]  ;;  %v7256_v47 = vcombine.low %v3171_v11, %v3175_v1 }
 0xaa3   :  { %v8549_v56 = vpop.f32.mrf.mxu1  ;;  %v3263_v24 = vld [vmem:[#allocation4 + $0x6f8] sm:$0xff] }
 0xaa4   :  { %6624 = vmatpush1.bf16.msra.mxu1 %v7176_v49  ;;  %v6372_v58 = vpop.f32.mrf.mxu0  ;;  %v7377_v49 = vcombine.high %v3291_v41, %v3295_v23  ;;  %v3255_v11 = vld [vmem:[#allocation4 + $0x6b8] sm:$0xff] }
 0xaa5   :  { %v8551_v59 = vpop.f32.mrf.mxu1  ;;  %6625 = vmatprep.subr.bf16.mxu1 %v7169_v52  ;;  %6667 = vmatpush1.bf16.msra.mxu0 %v7296_v12  ;;  %v3283_v52 = vld [vmem:[#allocation4 + $0x798] sm:$0xff] }
 0xaa6   :  { %v6373_v16 = vpop.f32.mrf.mxu0  ;;  %6668 = vmatprep.subr.bf16.mxu0 %v7289_v38  ;;  %v3287_v12 = vld [vmem:[#allocation4 + $0x7b8] sm:$0xff]  ;;  %v7376_v38 = vcombine.low %v3291_v41, %v3295_v23 }
 0xaa7   :  { %v6331_v8 = vpop.f32.mrf.mxu1  ;;  %v3275_v58 = vld [vmem:[#allocation4 + $0x758] sm:$0xff]  ;;  %v7241_v16 = vcombine.high %v3155_v37, %v3159_v60  ;;  %v7368_v17 = vcombine.low %v3283_v52, %v3287_v12 }
 0xaa8   :  { %6626 = vmatpush1.bf16.msra.mxu1 %v7168_v57  ;;  %v7369_v57 = vcombine.high %v3283_v52, %v3287_v12  ;;  %v3127_v20 = vld [vmem:[#allocation4 + $0x2b8] sm:$0xff] }
 0xaa9   :  { %v6332_v21 = vpop.f32.mrf.mxu1  ;;  %6627 = vmatprep.subr.bf16.mxu1 %v7161_v54  ;;  %6669 = vmatpush1.bf16.msra.mxu0 %v7288_v0  ;;  %v3279_v54 = vld [vmem:[#allocation4 + $0x778] sm:$0xff]  ;;  %v7248_v0 = vcombine.low %v3163_v35, %v3167_v50 }
 0xaaa   :  { %6670 = vmatprep.subr.bf16.mxu0 %v7281_v6  ;;  %v3151_v6 = vld [vmem:[#allocation4 + $0x378] sm:$0xff]  ;;  %v7361_v8 = vcombine.high %v3275_v58, %v3279_v54 }
 0xaab   :  { %v7233_v21 = vcombine.high %v3147_v28, %v3151_v6  ;;  %v7232_v25 = vcombine.low %v3147_v28, %v3151_v6  ;;  %v3247_v41 = vld [vmem:[#allocation4 + $0x678] sm:$0xff] }
 0xaac   :  { %6628 = vmatpush1.bf16.msra.mxu1 %v7160_v53  ;;  %v7240_v53 = vcombine.low %v3155_v37, %v3159_v60  ;;  %v3119_v35 = vld [vmem:[#allocation4 + $0x278] sm:$0xff] }
 0xaad   :  { %6629 = vmatprep.subr.bf16.mxu1 %v7153_v22  ;;  %6671 = vmatpush1.bf16.msra.mxu0 %v7280_v13  ;;  %v7360_v22 = vcombine.low %v3275_v58, %v3279_v54  ;;  %v3139_v13 = vld [vmem:[#allocation4 + $0x318] sm:$0xff] }
 0xaae   :  { %6672 = vmatprep.subr.bf16.mxu0 %v7273_v18  ;;  %v3259_v18 = vld [vmem:[#allocation4 + $0x6d8] sm:$0xff]  ;;  %v7224_v1 = vcombine.low %v3139_v13, %v3143_v14 }
 0xaaf   :  { %v7345_v43 = vcombine.high %v3259_v18, %v3263_v24  ;;  %v3239_v52 = vld [vmem:[#allocation4 + $0x638] sm:$0xff] }
 0xab0   :  { %6630 = vmatpush1.bf16.msra.mxu1 %v7152_v61  ;;  %v7225_v61 = vcombine.high %v3139_v13, %v3143_v14  ;;  %v3111_v37 = vld [vmem:[#allocation4 + $0x238] sm:$0xff]  ;;  %v8555_v14 = vld [vmem:[#allocation11] sm:$0xff] }
 0xab1   :  { %6631 = vmatprep.subr.bf16.mxu1 %v7145_v9  ;;  %6673 = vmatpush1.bf16.msra.mxu0 %v7272_v5  ;;  %v7352_v9 = vcombine.low %v3267_v4, %v3271_v10  ;;  %v3131_v5 = vld [vmem:[#allocation4 + $0x2d8] sm:$0xff] }
 0xab2   :  { %6674 = vmatprep.subr.bf16.mxu0 %v7265_v27  ;;  %v3251_v27 = vld [vmem:[#allocation4 + $0x698] sm:$0xff]  ;;  %v7216_v23 = vcombine.low %v3131_v5, %v3135_v29 }
 0xab3   :  { %v7337_v40 = vcombine.high %v3251_v27, %v3255_v11  ;;  %v3487_v58 = vld [vmem:[#allocation4 + $0xdf8] sm:$0xff] }
 0xab4   :  { %6632 = vmatpush1.bf16.msra.mxu1 %v7144_v32  ;;  %v7217_v32 = vcombine.high %v3131_v5, %v3135_v29  ;;  %v3355_v28 = vld [vmem:[#allocation4 + $0x9d8] sm:$0xff] }
 0xab5   :  { %6633 = vmatprep.subr.bf16.mxu1 %v7137_v33  ;;  %6675 = vmatpush1.bf16.msra.mxu0 %v7264_v36  ;;  %v7344_v33 = vcombine.low %v3259_v18, %v3263_v24  ;;  %v3123_v36 = vld [vmem:[#allocation4 + $0x298] sm:$0xff] }
 0xab6   :  { %6676 = vmatprep.subr.bf16.mxu0 %v7257_v42  ;;  %v3243_v42 = vld [vmem:[#allocation4 + $0x658] sm:$0xff]  ;;  %v7208_v12 = vcombine.low %v3123_v36, %v3127_v20 }
 0xab7   :  { %v7329_v50 = vcombine.high %v3243_v42, %v3247_v41  ;;  %v3359_v6 = vld [vmem:[#allocation4 + $0x9f8] sm:$0xff] }
 0xab8   :  { %6634 = vmatpush1.bf16.msra.mxu1 %v7136_v44  ;;  %v7209_v44 = vcombine.high %v3123_v36, %v3127_v20  ;;  %v3475_v4 = vld [vmem:[#allocation4 + $0xd98] sm:$0xff]  ;;  %v7440_v29 = vcombine.low %v3355_v28, %v3359_v6 }
 0xab9   :  { %6635 = vmatprep.subr.bf16.mxu1 %v7129_v46  ;;  %6677 = vmatpush1.bf16.msra.mxu0 %v7256_v47  ;;  %v7336_v46 = vcombine.low %v3251_v27, %v3255_v11  ;;  %v3115_v47 = vld [vmem:[#allocation4 + $0x258] sm:$0xff] }
 0xaba   :  { %6678 = vmatprep.subr.bf16.mxu0 %v7377_v49  ;;  %v3235_v49 = vld [vmem:[#allocation4 + $0x618] sm:$0xff]  ;;  %v7200_v54 = vcombine.low %v3115_v47, %v3119_v35 }
 0xabb   :  { %v7321_v60 = vcombine.high %v3235_v49, %v3239_v52  ;;  %v3479_v10 = vld [vmem:[#allocation4 + $0xdb8] sm:$0xff] }
 0xabc   :  { %6636 = vmatpush1.bf16.msra.mxu1 %v7128_v34  ;;  %v7201_v34 = vcombine.high %v3115_v47, %v3119_v35  ;;  %v3347_v18 = vld [vmem:[#allocation4 + $0x998] sm:$0xff]  ;;  %v7560_v11 = vcombine.low %v3475_v4, %v3479_v10 }
 0xabd   :  { %6637 = vmatprep.subr.bf16.mxu1 %v7249_v45  ;;  %6679 = vmatpush2.bf16.msra.mxu0 %v7376_v38  ;;  %v7328_v45 = vcombine.low %v3243_v42, %v3247_v41  ;;  %v3107_v38 = vld [vmem:[#allocation4 + $0x218] sm:$0xff]  ;;  %v8012_v41 = vmov 1983009808  }
 0xabe   :  { %6680 = vmatprep.subr.bf16.mxu0 %v7369_v57  ;;  %v3483_v57 = vld [vmem:[#allocation4 + $0xdd8] sm:$0xff] }
 0xabf   :  { %v7568_v13 = vcombine.low %v3483_v57, %v3487_v58  ;;  %v3351_v24 = vld [vmem:[#allocation4 + $0x9b8] sm:$0xff] }
 0xac0   :  { %6638 = vmatpush2.bf16.msra.mxu1 %v7248_v0  ;;  %v7193_v0 = vcombine.high %v3107_v38, %v3111_v37  ;;  %v7433_v27 = vcombine.high %v3347_v18, %v3351_v24  ;;  %v3343_v36 = vld [vmem:[#allocation4 + $0x978] sm:$0xff] }
 0xac1   :  { %6639 = vmatprep.subr.bf16.mxu1 %v7241_v16  ;;  %6681 = vmatpush2.bf16.msra.mxu0 %v7368_v17  ;;  %v7320_v16 = vcombine.low %v3235_v49, %v3239_v52  ;;  %v3556_v17 = vsub.s32 2, %v8099_v19  ;;  %v3463_v42 = vld [vmem:[#allocation4 + $0xd38] sm:$0xff] }
 0xac2   :  { %6682 = vmatprep.subr.bf16.mxu0 %v7361_v8  ;;  %v7569_v8 = vcombine.high %v3483_v57, %v3487_v58  ;;  %v3323_v58 = vld [vmem:[#allocation4 + $0x8d8] sm:$0xff] }
 0xac4   :  { %6640 = vmatpush2.bf16.msra.mxu1 %v7240_v53  ;;  %v3560_v53 = vsub.s32 3, %v8099_v19 }
 0xac5   :  { %6641 = vmatprep.subr.bf16.mxu1 %v7233_v21  ;;  %6683 = vmatpush2.bf16.msra.mxu0 %v7360_v22  ;;  %v7192_v21 = vcombine.low %v3107_v38, %v3111_v37  ;;  %v7441_v22 = vcombine.high %v3355_v28, %v3359_v6  ;;  %v3447_v28 = vld [vmem:[#allocation4 + $0xcb8] sm:$0xff] }
 0xac6   :  { %6684 = vmatprep.subr.bf16.mxu0 %v7353_v30  ;;  %v3557_v30 = vrot.slane %v8555_v14, %v3556_v17  ;;  %v3561_v5 = vrot.slane %v8555_v14, %v3560_v53  ;;  %v3443_v17 = vld [vmem:[#allocation4 + $0xc98] sm:$0xff] }
 0xac8   :  { %6642 = vmatpush2.bf16.msra.mxu1 %v7232_v25  ;;  %v7561_v25 = vcombine.high %v3475_v4, %v3479_v10 }
 0xac9   :  { %6643 = vmatprep.subr.bf16.mxu1 %v7225_v61  ;;  %6685 = vmatpush2.bf16.msra.mxu0 %v7352_v9  ;;  %v3467_v61 = vld [vmem:[#allocation4 + $0xd58] sm:$0xff] }
 0xaca   :  { %6686 = vmatprep.subr.bf16.mxu0 %v7345_v43  ;;  %v3471_v9 = vld [vmem:[#allocation4 + $0xd78] sm:$0xff] }
 0xacb   :  { %v7553_v20 = vcombine.high %v3467_v61, %v3471_v9  ;;  %v7552_v47 = vcombine.low %v3467_v61, %v3471_v9 }
 0xacc   :  { %6644 = vmatpush2.bf16.msra.mxu1 %v7224_v1  ;;  %v6328_v1 = vadd.f32 %v8549_v56, %v3557_v30  ;;  %v3319_v30 = vld [vmem:[#allocation4 + $0x8b8] sm:$0xff] }
 0xacd   :  { %6645 = vmatprep.subr.bf16.mxu1 %v7217_v32  ;;  %6687 = vmatpush2.bf16.msra.mxu0 %v7344_v33  ;;  %v3339_v33 = vld [vmem:[#allocation4 + $0x958] sm:$0xff] }
 0xace   :  { %6688 = vmatprep.subr.bf16.mxu0 %v7337_v40  ;;  %v3459_v40 = vld [vmem:[#allocation4 + $0xd18] sm:$0xff]  ;;  %v7425_v56 = vcombine.high %v3339_v33, %v3343_v36  ;;  %v6369_v35 = vadd.f32 %v8544_v15, %v6328_v1 }
 0xacf   :  { %v7545_v49 = vcombine.high %v3459_v40, %v3463_v42  ;;  %v7544_v57 = vcombine.low %v3459_v40, %v3463_v42  ;;  %v3543_v40 = vld [vmem:[#allocation4 + $0xfb8] sm:$0x11] }
 0xad0   :  { %6646 = vmatpush2.bf16.msra.mxu1 %v7216_v23  ;;  %v6330_v23 = vadd.f32 %v8551_v59, %v3561_v5  ;;  %v3299_v42 = vld [vmem:[#allocation4 + $0x818] sm:$0xff] }
 0xad1   :  { %6647 = vmatprep.subr.bf16.mxu1 %v7209_v44  ;;  %6689 = vmatpush2.bf16.msra.mxu0 %v7336_v46  ;;  %v7432_v44 = vcombine.low %v3347_v18, %v3351_v24  ;;  %v7529_v18 = vcombine.high %v3443_v17, %v3447_v28  ;;  %v3435_v24 = vld [vmem:[#allocation4 + $0xc58] sm:$0xff] }
 0xad2   :  { %6690 = vmatprep.subr.bf16.mxu0 %v7329_v50  ;;  %v3335_v50 = vld [vmem:[#allocation4 + $0x938] sm:$0xff] }
 0xad4   :  { %6648 = vmatpush2.bf16.msra.mxu1 %v7208_v12  ;;  %v3451_v12 = vld [vmem:[#allocation4 + $0xcd8] sm:$0xff] }
 0xad5   :  { %6649 = vmatprep.subr.bf16.mxu1 %v7201_v34  ;;  %6691 = vmatpush2.bf16.msra.mxu0 %v7328_v45  ;;  %v3455_v34 = vld [vmem:[#allocation4 + $0xcf8] sm:$0xff]  ;;  %v6371_v45 = vadd.f32 %v8547_v62, %v6330_v23 }
 0xad6   :  { %6692 = vmatprep.subr.bf16.mxu0 %v7321_v60 }
 0xad8   :  { %6650 = vmatpush2.bf16.msra.mxu1 %v7200_v54  ;;  %v3327_v54 = vld [vmem:[#allocation4 + $0x8f8] sm:$0xff] }
 0xad9   :  { %6651 = vmatprep.subr.bf16.mxu1 %v7193_v0  ;;  %6693 = vmatpush2.bf16.msra.mxu0 %v7320_v16  ;;  %v7537_v0 = vcombine.high %v3451_v12, %v3455_v34  ;;  %v7409_v53 = vcombine.high %v3323_v58, %v3327_v54  ;;  %v7408_v5 = vcombine.low %v3323_v58, %v3327_v54  ;;  %v3403_v58 = vld [vmem:[#allocation4 + $0xb58] sm:$0xff] }
 0xada   :  { %6744 = vmatprep.subr.bf16.mxu0 %v7569_v8  ;;  %v3407_v54 = vld [vmem:[#allocation4 + $0xb78] sm:$0xff] }
 0xadc   :  { %6652 = vmatpush2.bf16.msra.mxu1 %v7192_v21  ;;  %v6450_v43 = vpop.f32.mrf.mxu0  ;;  %6695 = vmatmul.mubr.bf16.vlgmr.msra.gmra.mxu0 %v8472_v55  ;;  %v6796_v55 = vunpack.c.l.s4 %v8012_v41  ;;  %v7536_v21 = vcombine.low %v3451_v12, %v3455_v34  ;;  %v3303_v41 = vld [vmem:[#allocation4 + $0x838] sm:$0xff] }
 0xadd   :  { %6703 = vmatprep.subr.bf16.mxu1 %v7441_v22  ;;  %6745 = vmatpush1.bf16.msra.mxu0 %v7568_v13  ;;  %v3315_v13 = vld [vmem:[#allocation4 + $0x898] sm:$0xff] }
 0xade   :  { %v6452_v32 = vpop.f32.mrf.mxu0  ;;  %6746 = vmatprep.subr.bf16.mxu0 %v7561_v25  ;;  %7629 = vmatprep.mubr.msk.bf16.mxu0 %vm6098_vm15, %v8488_v2  ;;  %v6797_v59 = vunpack.c.0.s8 %v6796_v55  ;;  %v3439_v25 = vld [vmem:[#allocation4 + $0xc78] sm:$0xff]  ;;  %v7400_v26 = vcombine.low %v3315_v13, %v3319_v30 }
 0xadf   :  { %6654 = vmatmul.mubr.bf16.vlgmr.msra.gmra.mxu1 %v8454_v63  ;;  %v3331_v63 = vld [vmem:[#allocation4 + $0x918] sm:$0xff]  ;;  %v7521_v1 = vcombine.high %v3435_v24, %v3439_v25 }
 0xae0   :  { %6704 = vmatpush1.bf16.msra.mxu1 %v7440_v29  ;;  %v6454_v46 = vpop.f32.mrf.mxu0  ;;  %6735 = vmatprep.mubr.bf16.mxu1 %v8486_v7  ;;  %v7424_v7 = vcombine.low %v3339_v33, %v3343_v36  ;;  %v7417_v60 = vcombine.high %v3331_v63, %v3335_v50  ;;  %v8569_v6 = vsub.s32 %v6797_v59, %v8099_v19  ;;  %v3431_v36 = vld [vmem:[#allocation4 + $0xc38] sm:$0xff] }
 0xae1   :  { %6705 = vmatprep.subr.bf16.mxu1 %v7433_v27  ;;  %6747 = vmatpush1.bf16.msra.mxu0 %v7560_v11  ;;  %v7416_v4 = vcombine.low %v3331_v63, %v3335_v50  ;;  %v7401_v29 = vcombine.high %v3315_v13, %v3319_v30  ;;  %v3307_v27 = vld [vmem:[#allocation4 + $0x858] sm:$0xff]  ;;  %v7385_v46 = vcombine.high %v3299_v42, %v3303_v41 }
 0xae2   :  { %v6455_v2 = vpop.f32.mrf.mxu0  ;;  %6748 = vmatprep.subr.bf16.mxu0 %v7553_v20  ;;  %v6801_v61 = vrot.slane %v6793_v39, %v8569_v6  ;;  %v3311_v11 = vld [vmem:[#allocation4 + $0x878] sm:$0xff]  ;;  %v7520_v39 = vcombine.low %v3435_v24, %v3439_v25 }
 0xae3   :  { %v6409_v52 = vpop.f32.mrf.mxu1  ;;  %v3539_v20 = vld [vmem:[#allocation4 + $0xf98] sm:$0xff]  ;;  %v7393_v31 = vcombine.high %v3307_v27, %v3311_v11 }
 0xae4   :  { %v6410_v38 = vadd.f32 %v6409_v52, %v6369_v35  ;;  %6706 = vmatpush1.bf16.msra.mxu1 %v7432_v44  ;;  %v7625_v23 = vcombine.high %v3539_v20, %v3543_v40  ;;  %v7392_v44 = vcombine.low %v3307_v27, %v3311_v11  ;;  %v3419_v35 = vld [vmem:[#allocation4 + $0xbd8] sm:$0xff]  ;;  %v7384_v52 = vcombine.low %v3299_v42, %v3303_v41 }
 0xae5   :  { %v6411_v37 = vpop.f32.mrf.mxu1  ;;  %6707 = vmatprep.subr.bf16.mxu1 %v7425_v56  ;;  %6749 = vmatpush1.bf16.msra.mxu0 %v7552_v47  ;;  %v7624_v47 = vcombine.low %v3539_v20, %v3543_v40  ;;  %v3423_v2 = vld [vmem:[#allocation4 + $0xbf8] sm:$0xff] }
 0xae6   :  { %v6412_v15 = vadd.f32 %v6411_v37, %v6371_v45  ;;  %6750 = vmatprep.subr.bf16.mxu0 %v7545_v49  ;;  %v6451_v62 = vadd.f32 %v6450_v43, %v6410_v38  ;;  %v7528_v43 = vcombine.low %v3443_v17, %v3447_v28  ;;  %v6127_v63 = vand.u32 %v7625_v23, %v8501_v48  ;;  %v3531_v50 = vld [vmem:[#allocation4 + $0xf58] sm:$0xff] }
 0xae7   :  { %v6413_v16 = vpop.f32.mrf.mxu1  ;;  %v3535_v49 = vld [vmem:[#allocation4 + $0xf78] sm:$0xff]  ;;  %v7505_v12 = vcombine.high %v3419_v35, %v3423_v2  ;;  %v6124_v34 = vand.u32 %v7624_v47, %v8501_v48  ;;  %v7489_v28 = vcombine.high %v3403_v58, %v3407_v54 }
 0xae8   :  { %v6453_v8 = vadd.f32 %v6452_v32, %v6412_v15  ;;  %6708 = vmatpush1.bf16.msra.mxu1 %v7424_v7  ;;  %v3427_v32 = vld [vmem:[#allocation4 + $0xc18] sm:$0xff]  ;;  %v7617_v38 = vcombine.high %v3531_v50, %v3535_v49  ;;  %v7616_v15 = vcombine.low %v3531_v50, %v3535_v49 }
 0xae9   :  { %v6414_v10 = vpop.f32.mrf.mxu1  ;;  %6709 = vmatprep.subr.bf16.mxu1 %v7417_v60  ;;  %6751 = vmatpush1.bf16.msra.mxu0 %v7544_v57  ;;  %v7513_v55 = vcombine.high %v3427_v32, %v3431_v36  ;;  %v7512_v56 = vcombine.low %v3427_v32, %v3431_v36  ;;  %v3411_v59 = vld [vmem:[#allocation4 + $0xb98] sm:$0xff]  ;;  %v7504_v60 = vcombine.low %v3419_v35, %v3423_v2  ;;  %v3564_v35 = vsub.s32 4, %v8099_v19 }
 0xaea   :  { %v6794_v22 = vcombine.low %v6451_v62, %v6453_v8  ;;  %6752 = vmatprep.subr.bf16.mxu0 %v7537_v0  ;;  %v3415_v45 = vld [vmem:[#allocation4 + $0xbb8] sm:$0xff]  ;;  %v3568_v2 = vsub.s32 5, %v8099_v19 }
 0xaeb   :  { %v3523_v7 = vld [vmem:[#allocation4 + $0xf18] sm:$0xff]  ;;  %v7497_v57 = vcombine.high %v3411_v59, %v3415_v45  ;;  %v7496_v48 = vcombine.low %v3411_v59, %v3415_v45 }
 0xaec   :  { %v6808_v9 = vrot.slane %v6794_v22, %v8569_v6  ;;  %6710 = vmatpush1.bf16.msra.mxu1 %v7416_v4  ;;  %v3527_v37 = vld [vmem:[#allocation4 + $0xf38] sm:$0xff]  ;;  %v7488_v22 = vcombine.low %v3403_v58, %v3407_v54  ;;  %v3569_v49 = vrot.slane %v8555_v14, %v3568_v2 }
 0xaed   :  { %6711 = vmatprep.subr.bf16.mxu1 %v7409_v53  ;;  %6753 = vmatpush1.bf16.msra.mxu0 %v7536_v21  ;;  %v7609_v0 = vcombine.high %v3523_v7, %v3527_v37  ;;  %v3515_v16 = vld [vmem:[#allocation4 + $0xed8] sm:$0xff]  ;;  %v7608_v62 = vcombine.low %v3523_v7, %v3527_v37 }
 0xaee   :  { %6754 = vmatprep.subr.bf16.mxu0 %v7529_v18  ;;  %v6809_v33 = vcombine.low %v6801_v61, %v6808_v9  ;;  %v3519_v17 = vld [vmem:[#allocation4 + $0xef8] sm:$0xff] }
 0xaef   :  { %v3395_v8 = vld [vmem:[#allocation4 + $0xb18] sm:$0xff]  ;;  %v7601_v10 = vcombine.high %v3515_v16, %v3519_v17  ;;  %v7600_v30 = vcombine.low %v3515_v16, %v3519_v17 }
 0xaf0   :  { %6712 = vmatpush1.bf16.msra.mxu1 %v7408_v5  ;;  %6829 = vst [vmem:[#allocation14] sm:$0xff] %v6809_v33  ;;  %v3399_v4 = vld [vmem:[#allocation4 + $0xb38] sm:$0xff] }
 0xaf1   :  { %6713 = vmatprep.subr.bf16.mxu1 %v7401_v29  ;;  %6755 = vmatpush1.bf16.msra.mxu0 %v7528_v43  ;;  %v3507_v53 = vld [vmem:[#allocation4 + $0xe98] sm:$0xff]  ;;  %v7481_v13 = vcombine.high %v3395_v8, %v3399_v4  ;;  %v7480_v5 = vcombine.low %v3395_v8, %v3399_v4 }
 0xaf2   :  { %6756 = vmatprep.subr.bf16.mxu0 %v7521_v1  ;;  %v3511_v21 = vld [vmem:[#allocation4 + $0xeb8] sm:$0xff] }
 0xaf3   :  { %v3387_v18 = vld [vmem:[#allocation4 + $0xad8] sm:$0xff]  ;;  %v7593_v25 = vcombine.high %v3507_v53, %v3511_v21  ;;  %v7592_v43 = vcombine.low %v3507_v53, %v3511_v21 }
 0xaf4   :  { %6714 = vmatpush1.bf16.msra.mxu1 %v7400_v26  ;;  %v3391_v24 = vld [vmem:[#allocation4 + $0xaf8] sm:$0xff] }
 0xaf5   :  { %6715 = vmatprep.subr.bf16.mxu1 %v7393_v31  ;;  %6757 = vmatpush1.bf16.msra.mxu0 %v7520_v39  ;;  %v3499_v61 = vld [vmem:[#allocation4 + $0xe58] sm:$0xff]  ;;  %v7473_v29 = vcombine.high %v3387_v18, %v3391_v24  ;;  %v7472_v36 = vcombine.low %v3387_v18, %v3391_v24 }
 0xaf6   :  { %6758 = vmatprep.subr.bf16.mxu0 %v7513_v55  ;;  %v3503_v9 = vld [vmem:[#allocation4 + $0xe78] sm:$0xff] }
 0xaf7   :  { %v3379_v27 = vld [vmem:[#allocation4 + $0xa98] sm:$0xff]  ;;  %v7585_v1 = vcombine.high %v3499_v61, %v3503_v9  ;;  %v7584_v40 = vcombine.low %v3499_v61, %v3503_v9  ;;  %v3572_v61 = vsub.s32 6, %v8099_v19  ;;  %v3576_v9 = vsub.s32 7, %v8099_v19 }
 0xaf8   :  { %6716 = vmatpush1.bf16.msra.mxu1 %v7392_v44  ;;  %v3383_v11 = vld [vmem:[#allocation4 + $0xab8] sm:$0xff] }
 0xaf9   :  { %6717 = vmatprep.subr.bf16.mxu1 %v7385_v46  ;;  %6759 = vmatpush1.bf16.msra.mxu0 %v7512_v56  ;;  %v3491_v32 = vld [vmem:[#allocation4 + $0xe18] sm:$0xff]  ;;  %v7465_v20 = vcombine.high %v3379_v27, %v3383_v11  ;;  %v7464_v42 = vcombine.low %v3379_v27, %v3383_v11 }
 0xafa   :  { %6762 = vmatprep.subr.bf16.mxu0 %v6127_v63  ;;  %v3495_v33 = vld [vmem:[#allocation4 + $0xe38] sm:$0xff]  ;;  %v3565_v63 = vrot.slane %v8555_v14, %v3564_v35 }
 0xafb   :  { %v3371_v26 = vld [vmem:[#allocation4 + $0xa58] sm:$0xff]  ;;  %v7577_v39 = vcombine.high %v3491_v32, %v3495_v33  ;;  %v7576_v55 = vcombine.low %v3491_v32, %v3495_v33 }
 0xafc   :  { %6718 = vmatpush1.bf16.msra.mxu1 %v7384_v52  ;;  %v3375_v31 = vld [vmem:[#allocation4 + $0xa78] sm:$0xff] }
 0xafd   :  { %6719 = vmatprep.subr.bf16.mxu1 %v7505_v12  ;;  %6763 = vmatpush2.bf16.msra.mxu0 %v6124_v34  ;;  %v7457_v41 = vcombine.high %v3371_v26, %v3375_v31  ;;  %v3363_v23 = vld [vmem:[#allocation4 + $0xa18] sm:$0xff]  ;;  %v7456_v46 = vcombine.low %v3371_v26, %v3375_v31 }
 0xafe   :  { %6764 = vmatprep.subr.bf16.mxu0 %v7617_v38  ;;  %v3367_v44 = vld [vmem:[#allocation4 + $0xa38] sm:$0xff] }
 0xaff   :  { %v7449_v56 = vcombine.high %v3363_v23, %v3367_v44  ;;  %v7448_v47 = vcombine.low %v3363_v23, %v3367_v44 }
 0xb00   :  { %6720 = vmatpush2.bf16.msra.mxu1 %v7504_v60 }
 0xb01   :  { %6721 = vmatprep.subr.bf16.mxu1 %v7497_v57  ;;  %6765 = vmatpush2.bf16.msra.mxu0 %v7616_v15 }
 0xb02   :  { %6766 = vmatprep.subr.bf16.mxu0 %v7609_v0 }
 0xb04   :  { %6722 = vmatpush2.bf16.msra.mxu1 %v7496_v48 }
 0xb05   :  { %6723 = vmatprep.subr.bf16.mxu1 %v7489_v28  ;;  %6767 = vmatpush2.bf16.msra.mxu0 %v7608_v62 }
 0xb06   :  { %6768 = vmatprep.subr.bf16.mxu0 %v7601_v10 }
 0xb08   :  { %6724 = vmatpush2.bf16.msra.mxu1 %v7488_v22 }
 0xb09   :  { %6725 = vmatprep.subr.bf16.mxu1 %v7481_v13  ;;  %6769 = vmatpush2.bf16.msra.mxu0 %v7600_v30 }
 0xb0a   :  { %6770 = vmatprep.subr.bf16.mxu0 %v7593_v25 }
 0xb0c   :  { %6726 = vmatpush2.bf16.msra.mxu1 %v7480_v5  ;;  %v3573_v5 = vrot.slane %v8555_v14, %v3572_v61 }
 0xb0d   :  { %6727 = vmatprep.subr.bf16.mxu1 %v7473_v29  ;;  %6771 = vmatpush2.bf16.msra.mxu0 %v7592_v43  ;;  %v3577_v29 = vrot.slane %v8555_v14, %v3576_v9 }
 0xb0e   :  { %6772 = vmatprep.subr.bf16.mxu0 %v7585_v1 }
 0xb10   :  { %6728 = vmatpush2.bf16.msra.mxu1 %v7472_v36 }
 0xb11   :  { %6729 = vmatprep.subr.bf16.mxu1 %v7465_v20  ;;  %6773 = vmatpush2.bf16.msra.mxu0 %v7584_v40 }
 0xb12   :  { %6774 = vmatprep.subr.bf16.mxu0 %v7577_v39 }
 0xb14   :  { %6730 = vmatpush2.bf16.msra.mxu1 %v7464_v42 }
 0xb15   :  { %6731 = vmatprep.subr.bf16.mxu1 %v7457_v41  ;;  %6775 = vmatpush2.bf16.msra.mxu0 %v7576_v55 }
 0xb18   :  { %6732 = vmatpush2.bf16.msra.mxu1 %v7456_v46  ;;  %6777 = vmatmul.mubr.bf16.vlgmr.msra.gmra.mxu0 %v8490_v51 }
 0xb19   :  { %6733 = vmatprep.subr.bf16.mxu1 %v7449_v56 }
 0xb1c   :  { %6734 = vmatpush2.bf16.msra.mxu1 %v7448_v47  ;;  %v6491_v50 = vpop.f32.mrf.mxu0 }
 0xb1d   :  { %v6492_v12 = vadd.f32 %v6491_v50, %v3565_v63 }
 0xb1e   :  { %v6493_v52 = vpop.f32.mrf.mxu0 }
 0xb1f   :  { %6736 = vmatmul.mubr.bf16.vlgmr.msra.gmra.mxu1 %v8484_v3  ;;  %v6494_v59 = vadd.f32 %v6493_v52, %v3569_v49 }
 0xb20   :  { %v6495_v34 = vpop.f32.mrf.mxu0 }
 0xb22   :  { %v6496_v45 = vpop.f32.mrf.mxu0 }
 0xb23   :  { %v6532_v38 = vpop.f32.mrf.mxu1 }
 0xb24   :  { %v6533_v51 = vadd.f32 %v6532_v38, %v6492_v12 }
 0xb25   :  { %v6534_v7 = vpop.f32.mrf.mxu1 }
 0xb26   :  { %v6535_v37 = vadd.f32 %v6534_v7, %v6494_v59 }
 0xb27   :  { %v6536_v60 = vpop.f32.mrf.mxu1 }
 0xb29   :  { %v6537_v57 = vpop.f32.mrf.mxu1 }
 0xb5c   :  { %v6573_v15 = vpop.f32.mrf.mxu0 }
 0xb5d   :  { %v6574_v58 = vadd.f32 %v6573_v15, %v6533_v51 }
 0xb5e   :  { %v6575_v54 = vpop.f32.mrf.mxu0 }
 0xb5f   :  { %v6576_v0 = vadd.f32 %v6575_v54, %v6535_v37  ;;  %v6614_v16 = vpop.f32.mrf.mxu1 }
 0xb60   :  { %v6615_v17 = vadd.f32 %v6614_v16, %v6574_v58  ;;  %v6577_v48 = vpop.f32.mrf.mxu0 }
 0xb61   :  { %v6616_v28 = vpop.f32.mrf.mxu1 }
 0xb62   :  { %v6617_v62 = vadd.f32 %v6616_v28, %v6576_v0  ;;  %v6578_v3 = vpop.f32.mrf.mxu0 }
 0xb63   :  { %v6618_v8 = vpop.f32.mrf.mxu1 }
 0xb64   :  { %v6810_v4 = vcombine.low %v6615_v17, %v6617_v62 }
 0xb65   :  { %v6619_v10 = vpop.f32.mrf.mxu1 }
 0xb66   :  { %v6818_v23 = vrot.slane %v6810_v4, %v8569_v6 }
 0xb9c   :  { %v6696_v53 = vpop.f32.mrf.mxu0 }
 0xb9e   :  { %v6698_v21 = vpop.f32.mrf.mxu0 }
 0xb9f   :  { %v6655_v22 = vpop.f32.mrf.mxu1 }
 0xba0   :  { %v6700_v13 = vpop.f32.mrf.mxu0  ;;  %v6656_v27 = vadd.f32 %v6655_v22, %v3573_v5 }
 0xba1   :  { %v6657_v30 = vpop.f32.mrf.mxu1 }
 0xba2   :  { %v6701_v18 = vpop.f32.mrf.mxu0  ;;  %v6658_v1 = vadd.f32 %v6657_v30, %v3577_v29  ;;  %v6697_v33 = vadd.f32 %v6696_v53, %v6656_v27 }
 0xba3   :  { %v6659_v24 = vpop.f32.mrf.mxu1 }
 0xba4   :  { %v6699_v40 = vadd.f32 %v6698_v21, %v6658_v1 }
 0xba5   :  { %v6660_v25 = vpop.f32.mrf.mxu1 }
 0xbd8   :  { %v6778_v43 = vpop.f32.mrf.mxu0 }
 0xbda   :  { %v6780_v11 = vpop.f32.mrf.mxu0 }
 0xbdc   :  { %v6782_v32 = vpop.f32.mrf.mxu0 }
 0xbde   :  { %v6783_v36 = vpop.f32.mrf.mxu0 }
 0xbdf   :  { %v6737_v20 = vpop.f32.mrf.mxu1 }
 0xbe0   :  { %v6738_v26 = vadd.f32 %v6737_v20, %v6697_v33 }
 0xbe1   :  { %v6739_v31 = vpop.f32.mrf.mxu1 }
 0xbe2   :  { %v6740_v39 = vadd.f32 %v6739_v31, %v6699_v40  ;;  %v6779_v19 = vadd.f32 %v6778_v43, %v6738_v26 }
 0xbe3   :  { %v6741_v42 = vpop.f32.mrf.mxu1 }
 0xbe4   :  { %v6781_v41 = vadd.f32 %v6780_v11, %v6740_v39 }
 0xbe5   :  { %v6742_v14 = vpop.f32.mrf.mxu1 }
 0xbe6   :  { %v6811_v55 = vcombine.low %v6779_v19, %v6781_v41 }
 0xbe8   :  { %v6825_v44 = vrot.slane %v6811_v55, %v8569_v6 }
 0xbea   :  { %v6826_v46 = vcombine.low %v6818_v23, %v6825_v44 }
 0xbec   :  { %6836 = vst.msk [vmem:[#allocation14 + $0x8] sm:$0xff] %vm6835_vm6, %v6826_v46 }
 0xbed   :  { %7961 = shalt.err (!%p7958_p11)
}
 0xbee   :  { %6846 = dma.vmem_to_hbm [thread:$0]  %s6844_s1, 256, %s8601_s7, [#allocation8]  }
 0xbef   :  { %7982 = dma.done.wait [#allocation8], 256  }
 0xbf0   :  { %7983 = vsyncadd [#allocation8], 4294967040 }
 0xbf1   :  { %6850 = vsyncpa [#allocation7], 1 }
 0xbf2   :  { %6851 = vsyncpa [#allocation10], 1 }
 0xbf3   :  { %6852 = vsyncpa [#allocation13], 1 }
 0xbf4   :  { %6853 = vsyncpa [#allocation8], 1 }
 0xbf5   :  { %6854 = vsyncmov [#allocation5] }
 0xbf8   :  { %s6855_s19 = vpop.sfrf %6854 }
 0xbf9   :  { %p7630_p12 = scmp.ne.s32.totalorder %s6855_s19, 0 }
 0xbfb   :  { %6859 = shalt.err (%p7630_p12)  }
 0xbfc   :  { %6861 = vsyncmov [#allocation5 + $0x1] }
 0xbff   :  { %s6862_s0 = vpop.sfrf %6861 }
 0xc00   :  { %p7631_p13 = scmp.ne.s32.totalorder %s6862_s0, 0 }
 0xc02   :  { %6866 = shalt.err (%p7631_p13)  }
 0xc03   :  { %6868 = vsyncmov [#allocation5 + $0x2] }
 0xc06   :  { %s6869_s20 = vpop.sfrf %6868 }
 0xc07   :  { %p7632_p0 = scmp.ne.s32.totalorder %s6869_s20, 0 }
 0xc09   :  { %6873 = shalt.err (%p7632_p0)  }

</bundles_post_ra>
